<compile_context>
chip_gen: v5e
topology: v5e:2x2
jax: 0.10.0
libtpu: 0.0.40
codegen_flags: <defaults>
</compile_context>

<pallas_src>
import functools

import jax
import jax.numpy as jnp
from jax import lax
from jax.experimental import pallas as pl
from jax.experimental.pallas import tpu as pltpu


_VMEM = pl.BlockSpec(memory_space=pltpu.MemorySpace.VMEM)


# ----------------------------------------------------------------------------
# Bidirectional GRU layer kernel: both directions in one call, in-kernel time
# loop, fused-gate matmuls, length mask computed in-kernel.
# ----------------------------------------------------------------------------
def _bigru_layer_kernel(lens_ref, x_ref, h0_ref, wih_ref, whh_ref, bih_ref,
                        bhh_ref, out_f_ref, out_b_ref, hn_ref):
    T = x_ref.shape[0]
    H = hn_ref.shape[-1]

    lens = lens_ref[...]                       # (B, 1) int32, per-sequence length

    # Hoist (loop-invariant) weight/bias loads; weights arrive already in bf16.
    wih_f, wih_b = wih_ref[0], wih_ref[1]      # (In, 3H)
    whh_f, whh_b = whh_ref[0], whh_ref[1]      # (H, 3H)
    bih_f, bih_b = bih_ref[0], bih_ref[1]      # (1, 3H) f32
    bhh_f, bhh_b = bhh_ref[0], bhh_ref[1]      # (1, 3H) f32

    def cell(x, h, wih, whh, bih, bhh):
        # Single fused matmul per weight (gate order r, z, n along last dim).
        gi = jnp.dot(x.astype(jnp.bfloat16), wih,
                     preferred_element_type=jnp.float32) + bih
        gh = jnp.dot(h.astype(jnp.bfloat16), whh,
                     preferred_element_type=jnp.float32) + bhh
        r = jax.nn.sigmoid(gi[:, :H] + gh[:, :H])
        z = jax.nn.sigmoid(gi[:, H:2 * H] + gh[:, H:2 * H])
        n = jnp.tanh(gi[:, 2 * H:] + r * gh[:, 2 * H:])
        return (1.0 - z) * n + z * h

    def step(t, carry):
        h_f, h_b = carry
        tr = T - 1 - t                          # reversed index for bwd direction
        x_f = x_ref[t]                          # (B, In)
        x_b = x_ref[tr]
        m_f = (t < lens).astype(jnp.float32)    # (B, 1) valid-step masks
        m_b = (tr < lens).astype(jnp.float32)

        h_f_new = cell(x_f, h_f, wih_f, whh_f, bih_f, bhh_f)
        h_b_new = cell(x_b, h_b, wih_b, whh_b, bih_b, bhh_b)

        # pad_packed_sequence -> zeros at padded positions.
        out_f_ref[t] = h_f_new * m_f
        out_b_ref[tr] = h_b_new * m_b

        # Freeze hidden past each sequence's length (pack semantics).
        h_f = m_f * h_f_new + (1.0 - m_f) * h_f
        h_b = m_b * h_b_new + (1.0 - m_b) * h_b
        return (h_f, h_b)

    h_f, h_b = lax.fori_loop(0, T, step, (h0_ref[0], h0_ref[1]))
    hn_ref[0] = h_f
    hn_ref[1] = h_b


def bigru_layer(x_tbe, lens_b1, h0_2bh, wih, whh, bih, bhh):
    """One bidirectional GRU layer. x_tbe is time-major (T, B, In)."""
    T, B, _ = x_tbe.shape
    H = whh.shape[1]
    # Whole slabs resident in VMEM; no grid (the time loop is inside the
    # kernel).  At production T / hidden sizes, audit VMEM (v7x has 64 MiB)
    # and tile over T chunks if needed.
    out_f, out_b, hn = pl.pallas_call(
        _bigru_layer_kernel,
        out_shape=(jax.ShapeDtypeStruct((T, B, H), jnp.float32),
                   jax.ShapeDtypeStruct((T, B, H), jnp.float32),
                   jax.ShapeDtypeStruct((2, B, H), jnp.float32)),
        in_specs=[_VMEM] * 7,
        out_specs=(_VMEM, _VMEM, _VMEM),
    )(lens_b1, x_tbe, h0_2bh,
      wih.astype(jnp.bfloat16), whh.astype(jnp.bfloat16), bih, bhh)
    return out_f, out_b, hn


def bi_gru_2layer(x_bte, lengths, h0_4bh, gru_params):
    """2-layer bidirectional GRU; returns bi_combined output and h_n(4,B,H)."""
    B = x_bte.shape[0]
    x_tbe = jnp.transpose(x_bte, (1, 0, 2))               # time-major once
    lens = lengths.astype(jnp.int32).reshape(B, 1)

    out_f0, out_b0, hn0 = bigru_layer(x_tbe, lens, h0_4bh[0:2],
                                      *gru_params["l0"])
    x1 = jnp.concatenate([out_f0, out_b0], axis=-1)       # (T, B, 2H)
    out_f1, out_b1, hn1 = bigru_layer(x1, lens, h0_4bh[2:4],
                                      *gru_params["l1"])

    # bi_combine output part: out[:, :, :H] + out[:, :, H:]
    word_output = jnp.transpose(out_f1 + out_b1, (1, 0, 2))   # (B, T, H)
    h_n = jnp.concatenate([hn0, hn1], axis=0)                 # (4, B, H)
    return word_output, h_n


# ----------------------------------------------------------------------------
# word_word knowledge graph: fused pairwise-L2 + sigmoid/threshold.
# Pass 1 emits per-batch distance sums (for the global mean); pass 2 recomputes
# distances and writes word_word directly (the norm tensor never hits HBM).
# ----------------------------------------------------------------------------
def _pdist_sum_kernel(x_ref, sum_ref):
    x = x_ref[0]                                           # (N, E) f32
    sq = jnp.sum(x * x, axis=-1, keepdims=True)            # (N, 1)
    g = lax.dot_general(x, x, (((1,), (1,)), ((), ())),
                        preferred_element_type=jnp.float32)
    d2 = jnp.maximum(sq + jnp.transpose(sq) - 2.0 * g, 0.0)
    sum_ref[0] = jnp.sum(jnp.sqrt(d2), axis=(0, 1), keepdims=True)


def _word_word_kernel(mean_ref, x_ref, o_ref, *, thr):
    m = mean_ref[...]                                      # (1, 1)
    x = x_ref[0]
    sq = jnp.sum(x * x, axis=-1, keepdims=True)
    g = lax.dot_general(x, x, (((1,), (1,)), ((), ())),
                        preferred_element_type=jnp.float32)
    d2 = jnp.maximum(sq + jnp.transpose(sq) - 2.0 * g, 0.0)
    ww = jax.nn.sigmoid(m - jnp.sqrt(d2))                  # sigmoid(mean - norm)
    o_ref[0] = jnp.where(ww < thr, 0.0, ww)


def word_word_graph(all_word, thr):
    B, N, E = all_word.shape
    sums = pl.pallas_call(
        _pdist_sum_kernel,
        out_shape=jax.ShapeDtypeStruct((B, 1, 1), jnp.float32),
        grid_spec=pltpu.PrefetchScalarGridSpec(
            num_scalar_prefetch=0, grid=(B,),
            in_specs=[pl.BlockSpec((1, N, E), lambda b: (b, 0, 0))],
            out_specs=pl.BlockSpec((1, 1, 1), lambda b: (b, 0, 0))),
        compiler_params=pltpu.CompilerParams(
            dimension_semantics=("parallel",)),
    )(all_word)
    mean = (jnp.sum(sums) / (B * N * N)).reshape(1, 1).astype(jnp.float32)

    return pl.pallas_call(
        functools.partial(_word_word_kernel, thr=thr),
        out_shape=jax.ShapeDtypeStruct((B, N, N), jnp.float32),
        grid_spec=pltpu.PrefetchScalarGridSpec(
            num_scalar_prefetch=0, grid=(B,),
            in_specs=[pl.BlockSpec((1, 1), lambda b: (0, 0)),
                      pl.BlockSpec((1, N, E), lambda b: (b, 0, 0))],
            out_specs=pl.BlockSpec((1, N, N), lambda b: (b, 0, 0))),
        compiler_params=pltpu.CompilerParams(
            dimension_semantics=("parallel",)),
    )(mean, all_word)


# ----------------------------------------------------------------------------
# Attention kernel (Luong "mix" attention used for span_attn).
# Unused attention weights are NOT emitted; softmax divide goes to the EUP.
# ----------------------------------------------------------------------------
def _attention_kernel(q_ref, c_ref, m_ref, w_ref, b_ref, out_ref):
    q = q_ref[0]                                           # (S, H) f32
    c = c_ref[0]                                           # (S, H) f32
    msk = m_ref[0]                                         # (1, S): 1.0 == pad key
    qb = q.astype(jnp.bfloat16)
    cb = c.astype(jnp.bfloat16)

    scores = lax.dot_general(qb, cb, (((1,), (1,)), ((), ())),
                             preferred_element_type=jnp.float32)
    scores = jnp.where(msk > 0.5, -1e30, scores)           # mask fill stays f32
    scores = scores - jnp.max(scores, axis=-1, keepdims=True)
    e = jnp.exp(scores)
    attn = e * pl.reciprocal(jnp.sum(e, axis=-1, keepdims=True), approx=True)

    mix = jnp.dot(attn.astype(jnp.bfloat16), cb,
                  preferred_element_type=jnp.float32)
    out = jnp.tanh(
        jnp.dot(mix.astype(jnp.bfloat16), w_ref[0],
                preferred_element_type=jnp.float32)
        + jnp.dot(qb, w_ref[1], preferred_element_type=jnp.float32)
        + b_ref[...])
    out_ref[0] = out


def attention(q, c, mask_bs, w_stack, b_row):
    B, S, H = q.shape
    mask3 = mask_bs[:, None, :].astype(jnp.float32)
    return pl.pallas_call(
        _attention_kernel,
        out_shape=jax.ShapeDtypeStruct((B, S, H), jnp.float32),
        grid_spec=pltpu.PrefetchScalarGridSpec(
            num_scalar_prefetch=0, grid=(B,),
            in_specs=[pl.BlockSpec((1, S, H), lambda b: (b, 0, 0)),
                      pl.BlockSpec((1, S, H), lambda b: (b, 0, 0)),
                      pl.BlockSpec((1, 1, S), lambda b: (b, 0, 0)),
                      pl.BlockSpec((2, H, H), lambda b: (0, 0, 0)),
                      pl.BlockSpec((1, H), lambda b: (0, 0))],
            out_specs=pl.BlockSpec((1, S, H), lambda b: (b, 0, 0))),
        compiler_params=pltpu.CompilerParams(
            dimension_semantics=("parallel",)),
    )(q, c, mask3, w_stack.astype(jnp.bfloat16), b_row)


# ----------------------------------------------------------------------------
# Flattened linear kernel (the `knowledge_base` projection): one matmul over
# all tokens of all spans at once.
# ----------------------------------------------------------------------------
def _linear_kernel(x_ref, w_ref, b_ref, o_ref):
    o_ref[...] = (jnp.dot(x_ref[...].astype(jnp.bfloat16), w_ref[...],
                          preferred_element_type=jnp.float32) + b_ref[...])


def batched_linear(x_bne, w_eo, b_row):
    B, N, E = x_bne.shape
    O = w_eo.shape[-1]
    out = pl.pallas_call(
        _linear_kernel,
        out_shape=jax.ShapeDtypeStruct((B * N, O), jnp.float32),
        in_specs=[_VMEM, _VMEM, _VMEM],
        out_specs=_VMEM,
    )(x_bne.reshape(B * N, E), w_eo.astype(jnp.bfloat16), b_row)
    return out.reshape(B, N, O)


# ----------------------------------------------------------------------------
# Encoder forward (trees=None path)
# ----------------------------------------------------------------------------
def encoder_forward(params, input_vars, input_lengths, span_length, *,
                    hidden_size, word_know_threshold):
    H = hidden_size
    B = input_vars[0].shape[0]

    word_outputs, span_inputs = [], []
    depend_relation, word_init = [], []
    bi_word_hidden = jnp.zeros((4, B, H), jnp.float32)

    for si, tokens in enumerate(input_vars):
        lengths = input_lengths[si]
        init_embedded = jnp.take(params["embedding"], tokens, axis=0)   # (B,T,E)
        word_init.append(init_embedded)
        # dropout -> identity (eval mode)
        pad_len = jnp.where(lengths == 0, 1, lengths)

        word_output, bi_word_hidden = bi_gru_2layer(
            init_embedded, pad_len, bi_word_hidden, params["gru"])
        word_outputs.append(word_output)

        T = tokens.shape[1]
        # tree is None: span input = pad_hidden (zeros), adjacency = identity
        span_inputs.append(jnp.zeros((B, 1, H), jnp.float32))
        depend_relation.append(
            jnp.broadcast_to(jnp.eye(T, dtype=jnp.float32), (B, T, T)))

    all_word = jnp.concatenate(word_init, axis=1)                       # (B,N,E)
    # knowledge_base applied per token: equal to per-span application + concat.
    word_operator = batched_linear(all_word, params["kb_w"], params["kb_b"])
    word_word = word_word_graph(all_word, word_know_threshold)          # Pallas

    span_input = jnp.concatenate(span_inputs, axis=1)                   # (B,S,H)
    S = span_input.shape[1]
    span_mask = (jnp.arange(S)[None, :] >= span_length[:, None]).astype(
        jnp.float32)

    span_output = span_input + params["pe"][:S]                         # pos enc
    # dropout -> identity (eval mode)
    span_output = attention(span_output, span_output, span_mask,
                            params["attn_w"], params["attn_b"])
    span_output = span_output * (span_mask == 0)[..., None].astype(jnp.float32)

    span_hidden = span_output[jnp.arange(B), span_length - 1][None]     # (1,B,H)

    return ([span_output, word_outputs],
            [word_operator, word_word, depend_relation],
            span_hidden)


# ----------------------------------------------------------------------------
# Deterministic parameter init
# ----------------------------------------------------------------------------
def _uniform(key, shape, scale=0.1):
    return jax.random.uniform(key, shape, jnp.float32, -scale, scale)


def init_params(key, *, vocab, embed, hidden, op_size, span_size):
    ks = jax.random.split(key, 10)

    def gru_layer(k, in_dim):
        k1, k2, k3, k4 = jax.random.split(k, 4)
        # dim 0 = direction (fwd, bwd); gates (r, z, n) fused along last dim.
        return (_uniform(k1, (2, in_dim, 3 * hidden)),   # W_ih^T
                _uniform(k2, (2, hidden, 3 * hidden)),   # W_hh^T
                _uniform(k3, (2, 1, 3 * hidden)),        # b_ih
                _uniform(k4, (2, 1, 3 * hidden)))        # b_hh

    params = {
        "embedding": _uniform(ks[0], (vocab, embed), 0.5),
        "gru": {
            "l0": gru_layer(ks[1], embed),
            "l1": gru_layer(ks[2], 2 * hidden),
        },
        "pe": jax.random.uniform(ks[3], (span_size, hidden),
                                 jnp.float32) * 2.0 - 1.0,
        "attn_w": _uniform(ks[4], (2, hidden, hidden)),   # [W_mix^T, W_query^T]
        "attn_b": _uniform(ks[5], (1, hidden)),
        "kb_w": _uniform(ks[6], (embed, op_size)),
        "kb_b": _uniform(ks[7], (1, op_size)),
    }
    return params


if __name__ == "__main__":
    B, num_spans, T = 2, 2, 8
    vocab, E, H, O, span_size = 20, 16, 32, 8, 4

    key = jax.random.PRNGKey(0)
    k_par, k_t0, k_t1 = jax.random.split(key, 3)
    params = init_params(k_par, vocab=vocab, embed=E, hidden=H,
                         op_size=O, span_size=span_size)

    input_vars = [jax.random.randint(k_t0, (B, T), 0, vocab, dtype=jnp.int32),
                  jax.random.randint(k_t1, (B, T), 0, vocab, dtype=jnp.int32)]
    input_lengths = [jnp.array([8, 6], dtype=jnp.int32),
                     jnp.array([5, 0], dtype=jnp.int32)]
    span_length = jnp.array([2, 1], dtype=jnp.int32)

    enc = jax.jit(functools.partial(encoder_forward, hidden_size=H,
                                    word_know_threshold=0.5))
    out = enc(params, input_vars, input_lengths, span_length)
    jax.block_until_ready(out)
    print("KERNEL_OK")
</pallas_src>

<mosaic_0001>
module attributes {stable_mosaic.version = 11 : i64} {
  func.func @_bigru_layer_kernel(%arg0: memref<2x1xi32, #tpu.memory_space<vmem>>, %arg1: memref<8x2x16xf32, #tpu.memory_space<vmem>>, %arg2: memref<2x2x32xf32, #tpu.memory_space<vmem>>, %arg3: memref<2x16x96xbf16, #tpu.memory_space<vmem>>, %arg4: memref<2x32x96xbf16, #tpu.memory_space<vmem>>, %arg5: memref<2x1x96xf32, #tpu.memory_space<vmem>>, %arg6: memref<2x1x96xf32, #tpu.memory_space<vmem>>, %arg7: memref<8x2x32xf32, #tpu.memory_space<vmem>>, %arg8: memref<8x2x32xf32, #tpu.memory_space<vmem>>, %arg9: memref<2x2x32xf32, #tpu.memory_space<vmem>>) attributes {dimension_semantics = [], scalar_prefetch = 0 : i64, scratch_operands = 0 : i64, tpu.core_type = #tpu.core_type<tc>} {
    %c0 = arith.constant 0 : index
    %c0_0 = arith.constant 0 : index
    %0 = vector.load %arg0[%c0, %c0_0] : memref<2x1xi32, #tpu.memory_space<vmem>>, vector<2x1xi32>
    %c0_1 = arith.constant 0 : index
    %c0_2 = arith.constant 0 : index
    %c0_3 = arith.constant 0 : index
    %1 = vector.load %arg3[%c0_1, %c0_2, %c0_3] : memref<2x16x96xbf16, #tpu.memory_space<vmem>>, vector<1x16x96xbf16>
    %2 = vector.shape_cast %1 : vector<1x16x96xbf16> to vector<16x96xbf16>
    %c1 = arith.constant 1 : index
    %c0_4 = arith.constant 0 : index
    %c0_5 = arith.constant 0 : index
    %3 = vector.load %arg3[%c1, %c0_4, %c0_5] : memref<2x16x96xbf16, #tpu.memory_space<vmem>>, vector<1x16x96xbf16>
    %4 = vector.shape_cast %3 : vector<1x16x96xbf16> to vector<16x96xbf16>
    %c0_6 = arith.constant 0 : index
    %c0_7 = arith.constant 0 : index
    %c0_8 = arith.constant 0 : index
    %5 = vector.load %arg4[%c0_6, %c0_7, %c0_8] : memref<2x32x96xbf16, #tpu.memory_space<vmem>>, vector<1x32x96xbf16>
    %6 = vector.shape_cast %5 : vector<1x32x96xbf16> to vector<32x96xbf16>
    %c1_9 = arith.constant 1 : index
    %c0_10 = arith.constant 0 : index
    %c0_11 = arith.constant 0 : index
    %7 = vector.load %arg4[%c1_9, %c0_10, %c0_11] : memref<2x32x96xbf16, #tpu.memory_space<vmem>>, vector<1x32x96xbf16>
    %8 = vector.shape_cast %7 : vector<1x32x96xbf16> to vector<32x96xbf16>
    %c0_12 = arith.constant 0 : index
    %c0_13 = arith.constant 0 : index
    %c0_14 = arith.constant 0 : index
    %9 = vector.load %arg5[%c0_12, %c0_13, %c0_14] : memref<2x1x96xf32, #tpu.memory_space<vmem>>, vector<1x1x96xf32>
    %10 = vector.shape_cast %9 : vector<1x1x96xf32> to vector<1x96xf32>
    %c1_15 = arith.constant 1 : index
    %c0_16 = arith.constant 0 : index
    %c0_17 = arith.constant 0 : index
    %11 = vector.load %arg5[%c1_15, %c0_16, %c0_17] : memref<2x1x96xf32, #tpu.memory_space<vmem>>, vector<1x1x96xf32>
    %12 = vector.shape_cast %11 : vector<1x1x96xf32> to vector<1x96xf32>
    %c0_18 = arith.constant 0 : index
    %c0_19 = arith.constant 0 : index
    %c0_20 = arith.constant 0 : index
    %13 = vector.load %arg6[%c0_18, %c0_19, %c0_20] : memref<2x1x96xf32, #tpu.memory_space<vmem>>, vector<1x1x96xf32>
    %14 = vector.shape_cast %13 : vector<1x1x96xf32> to vector<1x96xf32>
    %c1_21 = arith.constant 1 : index
    %c0_22 = arith.constant 0 : index
    %c0_23 = arith.constant 0 : index
    %15 = vector.load %arg6[%c1_21, %c0_22, %c0_23] : memref<2x1x96xf32, #tpu.memory_space<vmem>>, vector<1x1x96xf32>
    %16 = vector.shape_cast %15 : vector<1x1x96xf32> to vector<1x96xf32>
    %c0_24 = arith.constant 0 : index
    %c0_25 = arith.constant 0 : index
    %c0_26 = arith.constant 0 : index
    %17 = vector.load %arg2[%c0_24, %c0_25, %c0_26] : memref<2x2x32xf32, #tpu.memory_space<vmem>>, vector<1x2x32xf32>
    %18 = vector.shape_cast %17 : vector<1x2x32xf32> to vector<2x32xf32>
    %c1_27 = arith.constant 1 : index
    %c0_28 = arith.constant 0 : index
    %c0_29 = arith.constant 0 : index
    %19 = vector.load %arg2[%c1_27, %c0_28, %c0_29] : memref<2x2x32xf32, #tpu.memory_space<vmem>>, vector<1x2x32xf32>
    %20 = vector.shape_cast %19 : vector<1x2x32xf32> to vector<2x32xf32>
    %c0_i32 = arith.constant 0 : i32
    %c8_i32 = arith.constant 8 : i32
    %21 = arith.addi %c0_i32, %c8_i32 : i32
    %c1_i32 = arith.constant 1 : i32
    %22:2 = scf.for %arg10 = %c0_i32 to %21 step %c1_i32 iter_args(%arg11 = %18, %arg12 = %20) -> (vector<2x32xf32>, vector<2x32xf32>)  : i32 {
      %c7_i32 = arith.constant 7 : i32
      %29 = arith.subi %c7_i32, %arg10 : i32
      %30 = arith.index_cast %arg10 : i32 to index
      %c0_37 = arith.constant 0 : index
      %c0_38 = arith.constant 0 : index
      %31 = vector.load %arg1[%30, %c0_37, %c0_38] : memref<8x2x16xf32, #tpu.memory_space<vmem>>, vector<1x2x16xf32>
      %32 = vector.shape_cast %31 : vector<1x2x16xf32> to vector<2x16xf32>
      %33 = arith.index_cast %29 : i32 to index
      %c0_39 = arith.constant 0 : index
      %c0_40 = arith.constant 0 : index
      %34 = vector.load %arg1[%33, %c0_39, %c0_40] : memref<8x2x16xf32, #tpu.memory_space<vmem>>, vector<1x2x16xf32>
      %35 = vector.shape_cast %34 : vector<1x2x16xf32> to vector<2x16xf32>
      %36 = vector.broadcast %arg10 : i32 to vector<2x1xi32>
      %37 = arith.cmpi slt, %36, %0 : vector<2x1xi32>
      %38 = arith.extui %37 : vector<2x1xi1> to vector<2x1xi32>
      %39 = arith.sitofp %38 : vector<2x1xi32> to vector<2x1xf32>
      %40 = vector.broadcast %29 : i32 to vector<2x1xi32>
      %41 = arith.cmpi slt, %40, %0 : vector<2x1xi32>
      %42 = arith.extui %41 : vector<2x1xi1> to vector<2x1xi32>
      %43 = arith.sitofp %42 : vector<2x1xi32> to vector<2x1xf32>
      %44 = arith.truncf %32 : vector<2x16xf32> to vector<2x16xbf16>
      %cst = arith.constant dense<0.000000e+00> : vector<2x96xf32>
      %45 = tpu.matmul %44, %2, %cst {dimension_numbers = #tpu.dot_dimension_numbers<[1], [0], [0], [1], [0, 0, 1, 1], [], []>} : vector<2x16xbf16>, vector<16x96xbf16>, vector<2x96xf32> -> vector<2x96xf32>
      %46 = vector.broadcast %10 : vector<1x96xf32> to vector<2x96xf32>
      %47 = arith.addf %45, %46 : vector<2x96xf32>
      %48 = arith.truncf %arg11 : vector<2x32xf32> to vector<2x32xbf16>
      %cst_41 = arith.constant dense<0.000000e+00> : vector<2x96xf32>
      %49 = tpu.matmul %48, %6, %cst_41 {dimension_numbers = #tpu.dot_dimension_numbers<[1], [0], [0], [1], [0, 0, 1, 1], [], []>} : vector<2x32xbf16>, vector<32x96xbf16>, vector<2x96xf32> -> vector<2x96xf32>
      %50 = vector.broadcast %14 : vector<1x96xf32> to vector<2x96xf32>
      %51 = arith.addf %49, %50 : vector<2x96xf32>
      %52 = vector.extract_strided_slice %47 {offsets = [0, 0], sizes = [2, 32], strides = [1, 1]} : vector<2x96xf32> to vector<2x32xf32>
      %53 = vector.extract_strided_slice %51 {offsets = [0, 0], sizes = [2, 32], strides = [1, 1]} : vector<2x96xf32> to vector<2x32xf32>
      %54 = arith.addf %52, %53 : vector<2x32xf32>
      %55 = arith.negf %54 : vector<2x32xf32>
      %56 = math.exp %55 : vector<2x32xf32>
      %cst_42 = arith.constant 1.000000e+00 : f32
      %57 = vector.broadcast %cst_42 : f32 to vector<2x32xf32>
      %58 = arith.addf %57, %56 : vector<2x32xf32>
      %59 = arith.divf %57, %58 : vector<2x32xf32>
      %60 = vector.extract_strided_slice %47 {offsets = [0, 32], sizes = [2, 32], strides = [1, 1]} : vector<2x96xf32> to vector<2x32xf32>
      %61 = vector.extract_strided_slice %51 {offsets = [0, 32], sizes = [2, 32], strides = [1, 1]} : vector<2x96xf32> to vector<2x32xf32>
      %62 = arith.addf %60, %61 : vector<2x32xf32>
      %63 = arith.negf %62 : vector<2x32xf32>
      %64 = math.exp %63 : vector<2x32xf32>
      %cst_43 = arith.constant 1.000000e+00 : f32
      %65 = vector.broadcast %cst_43 : f32 to vector<2x32xf32>
      %66 = arith.addf %65, %64 : vector<2x32xf32>
      %67 = arith.divf %65, %66 : vector<2x32xf32>
      %68 = vector.extract_strided_slice %47 {offsets = [0, 64], sizes = [2, 32], strides = [1, 1]} : vector<2x96xf32> to vector<2x32xf32>
      %69 = vector.extract_strided_slice %51 {offsets = [0, 64], sizes = [2, 32], strides = [1, 1]} : vector<2x96xf32> to vector<2x32xf32>
      %70 = arith.mulf %59, %69 : vector<2x32xf32>
      %71 = arith.addf %68, %70 : vector<2x32xf32>
      %72 = math.tanh %71 : vector<2x32xf32>
      %cst_44 = arith.constant 1.000000e+00 : f32
      %73 = vector.broadcast %cst_44 : f32 to vector<2x32xf32>
      %74 = arith.subf %73, %67 : vector<2x32xf32>
      %75 = arith.mulf %74, %72 : vector<2x32xf32>
      %76 = arith.mulf %67, %arg11 : vector<2x32xf32>
      %77 = arith.addf %75, %76 : vector<2x32xf32>
      %78 = arith.truncf %35 : vector<2x16xf32> to vector<2x16xbf16>
      %cst_45 = arith.constant dense<0.000000e+00> : vector<2x96xf32>
      %79 = tpu.matmul %78, %4, %cst_45 {dimension_numbers = #tpu.dot_dimension_numbers<[1], [0], [0], [1], [0, 0, 1, 1], [], []>} : vector<2x16xbf16>, vector<16x96xbf16>, vector<2x96xf32> -> vector<2x96xf32>
      %80 = vector.broadcast %12 : vector<1x96xf32> to vector<2x96xf32>
      %81 = arith.addf %79, %80 : vector<2x96xf32>
      %82 = arith.truncf %arg12 : vector<2x32xf32> to vector<2x32xbf16>
      %cst_46 = arith.constant dense<0.000000e+00> : vector<2x96xf32>
      %83 = tpu.matmul %82, %8, %cst_46 {dimension_numbers = #tpu.dot_dimension_numbers<[1], [0], [0], [1], [0, 0, 1, 1], [], []>} : vector<2x32xbf16>, vector<32x96xbf16>, vector<2x96xf32> -> vector<2x96xf32>
      %84 = vector.broadcast %16 : vector<1x96xf32> to vector<2x96xf32>
      %85 = arith.addf %83, %84 : vector<2x96xf32>
      %86 = vector.extract_strided_slice %81 {offsets = [0, 0], sizes = [2, 32], strides = [1, 1]} : vector<2x96xf32> to vector<2x32xf32>
      %87 = vector.extract_strided_slice %85 {offsets = [0, 0], sizes = [2, 32], strides = [1, 1]} : vector<2x96xf32> to vector<2x32xf32>
      %88 = arith.addf %86, %87 : vector<2x32xf32>
      %89 = arith.negf %88 : vector<2x32xf32>
      %90 = math.exp %89 : vector<2x32xf32>
      %cst_47 = arith.constant 1.000000e+00 : f32
      %91 = vector.broadcast %cst_47 : f32 to vector<2x32xf32>
      %92 = arith.addf %91, %90 : vector<2x32xf32>
      %93 = arith.divf %91, %92 : vector<2x32xf32>
      %94 = vector.extract_strided_slice %81 {offsets = [0, 32], sizes = [2, 32], strides = [1, 1]} : vector<2x96xf32> to vector<2x32xf32>
      %95 = vector.extract_strided_slice %85 {offsets = [0, 32], sizes = [2, 32], strides = [1, 1]} : vector<2x96xf32> to vector<2x32xf32>
      %96 = arith.addf %94, %95 : vector<2x32xf32>
      %97 = arith.negf %96 : vector<2x32xf32>
      %98 = math.exp %97 : vector<2x32xf32>
      %cst_48 = arith.constant 1.000000e+00 : f32
      %99 = vector.broadcast %cst_48 : f32 to vector<2x32xf32>
      %100 = arith.addf %99, %98 : vector<2x32xf32>
      %101 = arith.divf %99, %100 : vector<2x32xf32>
      %102 = vector.extract_strided_slice %81 {offsets = [0, 64], sizes = [2, 32], strides = [1, 1]} : vector<2x96xf32> to vector<2x32xf32>
      %103 = vector.extract_strided_slice %85 {offsets = [0, 64], sizes = [2, 32], strides = [1, 1]} : vector<2x96xf32> to vector<2x32xf32>
      %104 = arith.mulf %93, %103 : vector<2x32xf32>
      %105 = arith.addf %102, %104 : vector<2x32xf32>
      %106 = math.tanh %105 : vector<2x32xf32>
      %cst_49 = arith.constant 1.000000e+00 : f32
      %107 = vector.broadcast %cst_49 : f32 to vector<2x32xf32>
      %108 = arith.subf %107, %101 : vector<2x32xf32>
      %109 = arith.mulf %108, %106 : vector<2x32xf32>
      %110 = arith.mulf %101, %arg12 : vector<2x32xf32>
      %111 = arith.addf %109, %110 : vector<2x32xf32>
      %112 = vector.broadcast %39 : vector<2x1xf32> to vector<2x32xf32>
      %113 = arith.mulf %77, %112 : vector<2x32xf32>
      %114 = arith.index_cast %arg10 : i32 to index
      %c0_50 = arith.constant 0 : index
      %c0_51 = arith.constant 0 : index
      %115 = vector.load %arg7[%114, %c0_50, %c0_51] : memref<8x2x32xf32, #tpu.memory_space<vmem>>, vector<1x2x32xf32>
      %116 = vector.shape_cast %115 : vector<1x2x32xf32> to vector<2x32xf32>
      %117 = vector.shape_cast %113 : vector<2x32xf32> to vector<1x2x32xf32>
      tpu.vector_store %arg7[%114, %c0_50, %c0_51], %117 {strides = array<i32>} : memref<8x2x32xf32, #tpu.memory_space<vmem>>, vector<1x2x32xf32>,
      %118 = vector.broadcast %43 : vector<2x1xf32> to vector<2x32xf32>
      %119 = arith.mulf %111, %118 : vector<2x32xf32>
      %120 = arith.index_cast %29 : i32 to index
      %c0_52 = arith.constant 0 : index
      %c0_53 = arith.constant 0 : index
      %121 = vector.load %arg8[%120, %c0_52, %c0_53] : memref<8x2x32xf32, #tpu.memory_space<vmem>>, vector<1x2x32xf32>
      %122 = vector.shape_cast %121 : vector<1x2x32xf32> to vector<2x32xf32>
      %123 = vector.shape_cast %119 : vector<2x32xf32> to vector<1x2x32xf32>
      tpu.vector_store %arg8[%120, %c0_52, %c0_53], %123 {strides = array<i32>} : memref<8x2x32xf32, #tpu.memory_space<vmem>>, vector<1x2x32xf32>,
      %124 = vector.broadcast %39 : vector<2x1xf32> to vector<2x32xf32>
      %125 = arith.mulf %124, %77 : vector<2x32xf32>
      %cst_54 = arith.constant 1.000000e+00 : f32
      %126 = vector.broadcast %cst_54 : f32 to vector<2x1xf32>
      %127 = arith.subf %126, %39 : vector<2x1xf32>
      %128 = vector.broadcast %127 : vector<2x1xf32> to vector<2x32xf32>
      %129 = arith.mulf %128, %arg11 : vector<2x32xf32>
      %130 = arith.addf %125, %129 : vector<2x32xf32>
      %131 = vector.broadcast %43 : vector<2x1xf32> to vector<2x32xf32>
      %132 = arith.mulf %131, %111 : vector<2x32xf32>
      %cst_55 = arith.constant 1.000000e+00 : f32
      %133 = vector.broadcast %cst_55 : f32 to vector<2x1xf32>
      %134 = arith.subf %133, %43 : vector<2x1xf32>
      %135 = vector.broadcast %134 : vector<2x1xf32> to vector<2x32xf32>
      %136 = arith.mulf %135, %arg12 : vector<2x32xf32>
      %137 = arith.addf %132, %136 : vector<2x32xf32>
      scf.yield %130, %137 : vector<2x32xf32>, vector<2x32xf32>
    }
    %c8_i32_30 = arith.constant 8 : i32
    %c0_31 = arith.constant 0 : index
    %c0_32 = arith.constant 0 : index
    %c0_33 = arith.constant 0 : index
    %23 = vector.load %arg9[%c0_31, %c0_32, %c0_33] : memref<2x2x32xf32, #tpu.memory_space<vmem>>, vector<1x2x32xf32>
    %24 = vector.shape_cast %23 : vector<1x2x32xf32> to vector<2x32xf32>
    %25 = vector.shape_cast %22#0 : vector<2x32xf32> to vector<1x2x32xf32>
    tpu.vector_store %arg9[%c0_31, %c0_32, %c0_33], %25 {strides = array<i32>} : memref<2x2x32xf32, #tpu.memory_space<vmem>>, vector<1x2x32xf32>,
    %c1_34 = arith.constant 1 : index
    %c0_35 = arith.constant 0 : index
    %c0_36 = arith.constant 0 : index
    %26 = vector.load %arg9[%c1_34, %c0_35, %c0_36] : memref<2x2x32xf32, #tpu.memory_space<vmem>>, vector<1x2x32xf32>
    %27 = vector.shape_cast %26 : vector<1x2x32xf32> to vector<2x32xf32>
    %28 = vector.shape_cast %22#1 : vector<2x32xf32> to vector<1x2x32xf32>
    tpu.vector_store %arg9[%c1_34, %c0_35, %c0_36], %28 {strides = array<i32>} : memref<2x2x32xf32, #tpu.memory_space<vmem>>, vector<1x2x32xf32>,
    return
  }
}

module attributes {stable_mosaic.version = 11 : i64} {
  func.func @_bigru_layer_kernel(%arg0: memref<2x1xi32, #tpu.memory_space<vmem>>, %arg1: memref<8x2x64xf32, #tpu.memory_space<vmem>>, %arg2: memref<2x2x32xf32, #tpu.memory_space<vmem>>, %arg3: memref<2x64x96xbf16, #tpu.memory_space<vmem>>, %arg4: memref<2x32x96xbf16, #tpu.memory_space<vmem>>, %arg5: memref<2x1x96xf32, #tpu.memory_space<vmem>>, %arg6: memref<2x1x96xf32, #tpu.memory_space<vmem>>, %arg7: memref<8x2x32xf32, #tpu.memory_space<vmem>>, %arg8: memref<8x2x32xf32, #tpu.memory_space<vmem>>, %arg9: memref<2x2x32xf32, #tpu.memory_space<vmem>>) attributes {dimension_semantics = [], scalar_prefetch = 0 : i64, scratch_operands = 0 : i64, tpu.core_type = #tpu.core_type<tc>} {
    %c0 = arith.constant 0 : index
    %c0_0 = arith.constant 0 : index
    %0 = vector.load %arg0[%c0, %c0_0] : memref<2x1xi32, #tpu.memory_space<vmem>>, vector<2x1xi32>
    %c0_1 = arith.constant 0 : index
    %c0_2 = arith.constant 0 : index
    %c0_3 = arith.constant 0 : index
    %1 = vector.load %arg3[%c0_1, %c0_2, %c0_3] : memref<2x64x96xbf16, #tpu.memory_space<vmem>>, vector<1x64x96xbf16>
    %2 = vector.shape_cast %1 : vector<1x64x96xbf16> to vector<64x96xbf16>
    %c1 = arith.constant 1 : index
    %c0_4 = arith.constant 0 : index
    %c0_5 = arith.constant 0 : index
    %3 = vector.load %arg3[%c1, %c0_4, %c0_5] : memref<2x64x96xbf16, #tpu.memory_space<vmem>>, vector<1x64x96xbf16>
    %4 = vector.shape_cast %3 : vector<1x64x96xbf16> to vector<64x96xbf16>
    %c0_6 = arith.constant 0 : index
    %c0_7 = arith.constant 0 : index
    %c0_8 = arith.constant 0 : index
    %5 = vector.load %arg4[%c0_6, %c0_7, %c0_8] : memref<2x32x96xbf16, #tpu.memory_space<vmem>>, vector<1x32x96xbf16>
    %6 = vector.shape_cast %5 : vector<1x32x96xbf16> to vector<32x96xbf16>
    %c1_9 = arith.constant 1 : index
    %c0_10 = arith.constant 0 : index
    %c0_11 = arith.constant 0 : index
    %7 = vector.load %arg4[%c1_9, %c0_10, %c0_11] : memref<2x32x96xbf16, #tpu.memory_space<vmem>>, vector<1x32x96xbf16>
    %8 = vector.shape_cast %7 : vector<1x32x96xbf16> to vector<32x96xbf16>
    %c0_12 = arith.constant 0 : index
    %c0_13 = arith.constant 0 : index
    %c0_14 = arith.constant 0 : index
    %9 = vector.load %arg5[%c0_12, %c0_13, %c0_14] : memref<2x1x96xf32, #tpu.memory_space<vmem>>, vector<1x1x96xf32>
    %10 = vector.shape_cast %9 : vector<1x1x96xf32> to vector<1x96xf32>
    %c1_15 = arith.constant 1 : index
    %c0_16 = arith.constant 0 : index
    %c0_17 = arith.constant 0 : index
    %11 = vector.load %arg5[%c1_15, %c0_16, %c0_17] : memref<2x1x96xf32, #tpu.memory_space<vmem>>, vector<1x1x96xf32>
    %12 = vector.shape_cast %11 : vector<1x1x96xf32> to vector<1x96xf32>
    %c0_18 = arith.constant 0 : index
    %c0_19 = arith.constant 0 : index
    %c0_20 = arith.constant 0 : index
    %13 = vector.load %arg6[%c0_18, %c0_19, %c0_20] : memref<2x1x96xf32, #tpu.memory_space<vmem>>, vector<1x1x96xf32>
    %14 = vector.shape_cast %13 : vector<1x1x96xf32> to vector<1x96xf32>
    %c1_21 = arith.constant 1 : index
    %c0_22 = arith.constant 0 : index
    %c0_23 = arith.constant 0 : index
    %15 = vector.load %arg6[%c1_21, %c0_22, %c0_23] : memref<2x1x96xf32, #tpu.memory_space<vmem>>, vector<1x1x96xf32>
    %16 = vector.shape_cast %15 : vector<1x1x96xf32> to vector<1x96xf32>
    %c0_24 = arith.constant 0 : index
    %c0_25 = arith.constant 0 : index
    %c0_26 = arith.constant 0 : index
    %17 = vector.load %arg2[%c0_24, %c0_25, %c0_26] : memref<2x2x32xf32, #tpu.memory_space<vmem>>, vector<1x2x32xf32>
    %18 = vector.shape_cast %17 : vector<1x2x32xf32> to vector<2x32xf32>
    %c1_27 = arith.constant 1 : index
    %c0_28 = arith.constant 0 : index
    %c0_29 = arith.constant 0 : index
    %19 = vector.load %arg2[%c1_27, %c0_28, %c0_29] : memref<2x2x32xf32, #tpu.memory_space<vmem>>, vector<1x2x32xf32>
    %20 = vector.shape_cast %19 : vector<1x2x32xf32> to vector<2x32xf32>
    %c0_i32 = arith.constant 0 : i32
    %c8_i32 = arith.constant 8 : i32
    %21 = arith.addi %c0_i32, %c8_i32 : i32
    %c1_i32 = arith.constant 1 : i32
    %22:2 = scf.for %arg10 = %c0_i32 to %21 step %c1_i32 iter_args(%arg11 = %18, %arg12 = %20) -> (vector<2x32xf32>, vector<2x32xf32>)  : i32 {
      %c7_i32 = arith.constant 7 : i32
      %29 = arith.subi %c7_i32, %arg10 : i32
      %30 = arith.index_cast %arg10 : i32 to index
      %c0_37 = arith.constant 0 : index
      %c0_38 = arith.constant 0 : index
      %31 = vector.load %arg1[%30, %c0_37, %c0_38] : memref<8x2x64xf32, #tpu.memory_space<vmem>>, vector<1x2x64xf32>
      %32 = vector.shape_cast %31 : vector<1x2x64xf32> to vector<2x64xf32>
      %33 = arith.index_cast %29 : i32 to index
      %c0_39 = arith.constant 0 : index
      %c0_40 = arith.constant 0 : index
      %34 = vector.load %arg1[%33, %c0_39, %c0_40] : memref<8x2x64xf32, #tpu.memory_space<vmem>>, vector<1x2x64xf32>
      %35 = vector.shape_cast %34 : vector<1x2x64xf32> to vector<2x64xf32>
      %36 = vector.broadcast %arg10 : i32 to vector<2x1xi32>
      %37 = arith.cmpi slt, %36, %0 : vector<2x1xi32>
      %38 = arith.extui %37 : vector<2x1xi1> to vector<2x1xi32>
      %39 = arith.sitofp %38 : vector<2x1xi32> to vector<2x1xf32>
      %40 = vector.broadcast %29 : i32 to vector<2x1xi32>
      %41 = arith.cmpi slt, %40, %0 : vector<2x1xi32>
      %42 = arith.extui %41 : vector<2x1xi1> to vector<2x1xi32>
      %43 = arith.sitofp %42 : vector<2x1xi32> to vector<2x1xf32>
      %44 = arith.truncf %32 : vector<2x64xf32> to vector<2x64xbf16>
      %cst = arith.constant dense<0.000000e+00> : vector<2x96xf32>
      %45 = tpu.matmul %44, %2, %cst {dimension_numbers = #tpu.dot_dimension_numbers<[1], [0], [0], [1], [0, 0, 1, 1], [], []>} : vector<2x64xbf16>, vector<64x96xbf16>, vector<2x96xf32> -> vector<2x96xf32>
      %46 = vector.broadcast %10 : vector<1x96xf32> to vector<2x96xf32>
      %47 = arith.addf %45, %46 : vector<2x96xf32>
      %48 = arith.truncf %arg11 : vector<2x32xf32> to vector<2x32xbf16>
      %cst_41 = arith.constant dense<0.000000e+00> : vector<2x96xf32>
      %49 = tpu.matmul %48, %6, %cst_41 {dimension_numbers = #tpu.dot_dimension_numbers<[1], [0], [0], [1], [0, 0, 1, 1], [], []>} : vector<2x32xbf16>, vector<32x96xbf16>, vector<2x96xf32> -> vector<2x96xf32>
      %50 = vector.broadcast %14 : vector<1x96xf32> to vector<2x96xf32>
      %51 = arith.addf %49, %50 : vector<2x96xf32>
      %52 = vector.extract_strided_slice %47 {offsets = [0, 0], sizes = [2, 32], strides = [1, 1]} : vector<2x96xf32> to vector<2x32xf32>
      %53 = vector.extract_strided_slice %51 {offsets = [0, 0], sizes = [2, 32], strides = [1, 1]} : vector<2x96xf32> to vector<2x32xf32>
      %54 = arith.addf %52, %53 : vector<2x32xf32>
      %55 = arith.negf %54 : vector<2x32xf32>
      %56 = math.exp %55 : vector<2x32xf32>
      %cst_42 = arith.constant 1.000000e+00 : f32
      %57 = vector.broadcast %cst_42 : f32 to vector<2x32xf32>
      %58 = arith.addf %57, %56 : vector<2x32xf32>
      %59 = arith.divf %57, %58 : vector<2x32xf32>
      %60 = vector.extract_strided_slice %47 {offsets = [0, 32], sizes = [2, 32], strides = [1, 1]} : vector<2x96xf32> to vector<2x32xf32>
      %61 = vector.extract_strided_slice %51 {offsets = [0, 32], sizes = [2, 32], strides = [1, 1]} : vector<2x96xf32> to vector<2x32xf32>
      %62 = arith.addf %60, %61 : vector<2x32xf32>
      %63 = arith.negf %62 : vector<2x32xf32>
      %64 = math.exp %63 : vector<2x32xf32>
      %cst_43 = arith.constant 1.000000e+00 : f32
      %65 = vector.broadcast %cst_43 : f32 to vector<2x32xf32>
      %66 = arith.addf %65, %64 : vector<2x32xf32>
      %67 = arith.divf %65, %66 : vector<2x32xf32>
      %68 = vector.extract_strided_slice %47 {offsets = [0, 64], sizes = [2, 32], strides = [1, 1]} : vector<2x96xf32> to vector<2x32xf32>
      %69 = vector.extract_strided_slice %51 {offsets = [0, 64], sizes = [2, 32], strides = [1, 1]} : vector<2x96xf32> to vector<2x32xf32>
      %70 = arith.mulf %59, %69 : vector<2x32xf32>
      %71 = arith.addf %68, %70 : vector<2x32xf32>
      %72 = math.tanh %71 : vector<2x32xf32>
      %cst_44 = arith.constant 1.000000e+00 : f32
      %73 = vector.broadcast %cst_44 : f32 to vector<2x32xf32>
      %74 = arith.subf %73, %67 : vector<2x32xf32>
      %75 = arith.mulf %74, %72 : vector<2x32xf32>
      %76 = arith.mulf %67, %arg11 : vector<2x32xf32>
      %77 = arith.addf %75, %76 : vector<2x32xf32>
      %78 = arith.truncf %35 : vector<2x64xf32> to vector<2x64xbf16>
      %cst_45 = arith.constant dense<0.000000e+00> : vector<2x96xf32>
      %79 = tpu.matmul %78, %4, %cst_45 {dimension_numbers = #tpu.dot_dimension_numbers<[1], [0], [0], [1], [0, 0, 1, 1], [], []>} : vector<2x64xbf16>, vector<64x96xbf16>, vector<2x96xf32> -> vector<2x96xf32>
      %80 = vector.broadcast %12 : vector<1x96xf32> to vector<2x96xf32>
      %81 = arith.addf %79, %80 : vector<2x96xf32>
      %82 = arith.truncf %arg12 : vector<2x32xf32> to vector<2x32xbf16>
      %cst_46 = arith.constant dense<0.000000e+00> : vector<2x96xf32>
      %83 = tpu.matmul %82, %8, %cst_46 {dimension_numbers = #tpu.dot_dimension_numbers<[1], [0], [0], [1], [0, 0, 1, 1], [], []>} : vector<2x32xbf16>, vector<32x96xbf16>, vector<2x96xf32> -> vector<2x96xf32>
      %84 = vector.broadcast %16 : vector<1x96xf32> to vector<2x96xf32>
      %85 = arith.addf %83, %84 : vector<2x96xf32>
      %86 = vector.extract_strided_slice %81 {offsets = [0, 0], sizes = [2, 32], strides = [1, 1]} : vector<2x96xf32> to vector<2x32xf32>
      %87 = vector.extract_strided_slice %85 {offsets = [0, 0], sizes = [2, 32], strides = [1, 1]} : vector<2x96xf32> to vector<2x32xf32>
      %88 = arith.addf %86, %87 : vector<2x32xf32>
      %89 = arith.negf %88 : vector<2x32xf32>
      %90 = math.exp %89 : vector<2x32xf32>
      %cst_47 = arith.constant 1.000000e+00 : f32
      %91 = vector.broadcast %cst_47 : f32 to vector<2x32xf32>
      %92 = arith.addf %91, %90 : vector<2x32xf32>
      %93 = arith.divf %91, %92 : vector<2x32xf32>
      %94 = vector.extract_strided_slice %81 {offsets = [0, 32], sizes = [2, 32], strides = [1, 1]} : vector<2x96xf32> to vector<2x32xf32>
      %95 = vector.extract_strided_slice %85 {offsets = [0, 32], sizes = [2, 32], strides = [1, 1]} : vector<2x96xf32> to vector<2x32xf32>
      %96 = arith.addf %94, %95 : vector<2x32xf32>
      %97 = arith.negf %96 : vector<2x32xf32>
      %98 = math.exp %97 : vector<2x32xf32>
      %cst_48 = arith.constant 1.000000e+00 : f32
      %99 = vector.broadcast %cst_48 : f32 to vector<2x32xf32>
      %100 = arith.addf %99, %98 : vector<2x32xf32>
      %101 = arith.divf %99, %100 : vector<2x32xf32>
      %102 = vector.extract_strided_slice %81 {offsets = [0, 64], sizes = [2, 32], strides = [1, 1]} : vector<2x96xf32> to vector<2x32xf32>
      %103 = vector.extract_strided_slice %85 {offsets = [0, 64], sizes = [2, 32], strides = [1, 1]} : vector<2x96xf32> to vector<2x32xf32>
      %104 = arith.mulf %93, %103 : vector<2x32xf32>
      %105 = arith.addf %102, %104 : vector<2x32xf32>
      %106 = math.tanh %105 : vector<2x32xf32>
      %cst_49 = arith.constant 1.000000e+00 : f32
      %107 = vector.broadcast %cst_49 : f32 to vector<2x32xf32>
      %108 = arith.subf %107, %101 : vector<2x32xf32>
      %109 = arith.mulf %108, %106 : vector<2x32xf32>
      %110 = arith.mulf %101, %arg12 : vector<2x32xf32>
      %111 = arith.addf %109, %110 : vector<2x32xf32>
      %112 = vector.broadcast %39 : vector<2x1xf32> to vector<2x32xf32>
      %113 = arith.mulf %77, %112 : vector<2x32xf32>
      %114 = arith.index_cast %arg10 : i32 to index
      %c0_50 = arith.constant 0 : index
      %c0_51 = arith.constant 0 : index
      %115 = vector.load %arg7[%114, %c0_50, %c0_51] : memref<8x2x32xf32, #tpu.memory_space<vmem>>, vector<1x2x32xf32>
      %116 = vector.shape_cast %115 : vector<1x2x32xf32> to vector<2x32xf32>
      %117 = vector.shape_cast %113 : vector<2x32xf32> to vector<1x2x32xf32>
      tpu.vector_store %arg7[%114, %c0_50, %c0_51], %117 {strides = array<i32>} : memref<8x2x32xf32, #tpu.memory_space<vmem>>, vector<1x2x32xf32>,
      %118 = vector.broadcast %43 : vector<2x1xf32> to vector<2x32xf32>
      %119 = arith.mulf %111, %118 : vector<2x32xf32>
      %120 = arith.index_cast %29 : i32 to index
      %c0_52 = arith.constant 0 : index
      %c0_53 = arith.constant 0 : index
      %121 = vector.load %arg8[%120, %c0_52, %c0_53] : memref<8x2x32xf32, #tpu.memory_space<vmem>>, vector<1x2x32xf32>
      %122 = vector.shape_cast %121 : vector<1x2x32xf32> to vector<2x32xf32>
      %123 = vector.shape_cast %119 : vector<2x32xf32> to vector<1x2x32xf32>
      tpu.vector_store %arg8[%120, %c0_52, %c0_53], %123 {strides = array<i32>} : memref<8x2x32xf32, #tpu.memory_space<vmem>>, vector<1x2x32xf32>,
      %124 = vector.broadcast %39 : vector<2x1xf32> to vector<2x32xf32>
      %125 = arith.mulf %124, %77 : vector<2x32xf32>
      %cst_54 = arith.constant 1.000000e+00 : f32
      %126 = vector.broadcast %cst_54 : f32 to vector<2x1xf32>
      %127 = arith.subf %126, %39 : vector<2x1xf32>
      %128 = vector.broadcast %127 : vector<2x1xf32> to vector<2x32xf32>
      %129 = arith.mulf %128, %arg11 : vector<2x32xf32>
      %130 = arith.addf %125, %129 : vector<2x32xf32>
      %131 = vector.broadcast %43 : vector<2x1xf32> to vector<2x32xf32>
      %132 = arith.mulf %131, %111 : vector<2x32xf32>
      %cst_55 = arith.constant 1.000000e+00 : f32
      %133 = vector.broadcast %cst_55 : f32 to vector<2x1xf32>
      %134 = arith.subf %133, %43 : vector<2x1xf32>
      %135 = vector.broadcast %134 : vector<2x1xf32> to vector<2x32xf32>
      %136 = arith.mulf %135, %arg12 : vector<2x32xf32>
      %137 = arith.addf %132, %136 : vector<2x32xf32>
      scf.yield %130, %137 : vector<2x32xf32>, vector<2x32xf32>
    }
    %c8_i32_30 = arith.constant 8 : i32
    %c0_31 = arith.constant 0 : index
    %c0_32 = arith.constant 0 : index
    %c0_33 = arith.constant 0 : index
    %23 = vector.load %arg9[%c0_31, %c0_32, %c0_33] : memref<2x2x32xf32, #tpu.memory_space<vmem>>, vector<1x2x32xf32>
    %24 = vector.shape_cast %23 : vector<1x2x32xf32> to vector<2x32xf32>
    %25 = vector.shape_cast %22#0 : vector<2x32xf32> to vector<1x2x32xf32>
    tpu.vector_store %arg9[%c0_31, %c0_32, %c0_33], %25 {strides = array<i32>} : memref<2x2x32xf32, #tpu.memory_space<vmem>>, vector<1x2x32xf32>,
    %c1_34 = arith.constant 1 : index
    %c0_35 = arith.constant 0 : index
    %c0_36 = arith.constant 0 : index
    %26 = vector.load %arg9[%c1_34, %c0_35, %c0_36] : memref<2x2x32xf32, #tpu.memory_space<vmem>>, vector<1x2x32xf32>
    %27 = vector.shape_cast %26 : vector<1x2x32xf32> to vector<2x32xf32>
    %28 = vector.shape_cast %22#1 : vector<2x32xf32> to vector<1x2x32xf32>
    tpu.vector_store %arg9[%c1_34, %c0_35, %c0_36], %28 {strides = array<i32>} : memref<2x2x32xf32, #tpu.memory_space<vmem>>, vector<1x2x32xf32>,
    return
  }
}

module attributes {stable_mosaic.version = 11 : i64} {
  func.func @_bigru_layer_kernel(%arg0: memref<2x1xi32, #tpu.memory_space<vmem>>, %arg1: memref<8x2x64xf32, #tpu.memory_space<vmem>>, %arg2: memref<2x2x32xf32, #tpu.memory_space<vmem>>, %arg3: memref<2x64x96xbf16, #tpu.memory_space<vmem>>, %arg4: memref<2x32x96xbf16, #tpu.memory_space<vmem>>, %arg5: memref<2x1x96xf32, #tpu.memory_space<vmem>>, %arg6: memref<2x1x96xf32, #tpu.memory_space<vmem>>, %arg7: memref<8x2x32xf32, #tpu.memory_space<vmem>>, %arg8: memref<8x2x32xf32, #tpu.memory_space<vmem>>, %arg9: memref<2x2x32xf32, #tpu.memory_space<vmem>>) attributes {dimension_semantics = [], scalar_prefetch = 0 : i64, scratch_operands = 0 : i64, tpu.core_type = #tpu.core_type<tc>} {
    %c0 = arith.constant 0 : index
    %c0_0 = arith.constant 0 : index
    %0 = vector.load %arg0[%c0, %c0_0] : memref<2x1xi32, #tpu.memory_space<vmem>>, vector<2x1xi32>
    %c0_1 = arith.constant 0 : index
    %c0_2 = arith.constant 0 : index
    %c0_3 = arith.constant 0 : index
    %1 = vector.load %arg3[%c0_1, %c0_2, %c0_3] : memref<2x64x96xbf16, #tpu.memory_space<vmem>>, vector<1x64x96xbf16>
    %2 = vector.shape_cast %1 : vector<1x64x96xbf16> to vector<64x96xbf16>
    %c1 = arith.constant 1 : index
    %c0_4 = arith.constant 0 : index
    %c0_5 = arith.constant 0 : index
    %3 = vector.load %arg3[%c1, %c0_4, %c0_5] : memref<2x64x96xbf16, #tpu.memory_space<vmem>>, vector<1x64x96xbf16>
    %4 = vector.shape_cast %3 : vector<1x64x96xbf16> to vector<64x96xbf16>
    %c0_6 = arith.constant 0 : index
    %c0_7 = arith.constant 0 : index
    %c0_8 = arith.constant 0 : index
    %5 = vector.load %arg4[%c0_6, %c0_7, %c0_8] : memref<2x32x96xbf16, #tpu.memory_space<vmem>>, vector<1x32x96xbf16>
    %6 = vector.shape_cast %5 : vector<1x32x96xbf16> to vector<32x96xbf16>
    %c1_9 = arith.constant 1 : index
    %c0_10 = arith.constant 0 : index
    %c0_11 = arith.constant 0 : index
    %7 = vector.load %arg4[%c1_9, %c0_10, %c0_11] : memref<2x32x96xbf16, #tpu.memory_space<vmem>>, vector<1x32x96xbf16>
    %8 = vector.shape_cast %7 : vector<1x32x96xbf16> to vector<32x96xbf16>
    %c0_12 = arith.constant 0 : index
    %c0_13 = arith.constant 0 : index
    %c0_14 = arith.constant 0 : index
    %9 = vector.load %arg5[%c0_12, %c0_13, %c0_14] : memref<2x1x96xf32, #tpu.memory_space<vmem>>, vector<1x1x96xf32>
    %10 = vector.shape_cast %9 : vector<1x1x96xf32> to vector<1x96xf32>
    %c1_15 = arith.constant 1 : index
    %c0_16 = arith.constant 0 : index
    %c0_17 = arith.constant 0 : index
    %11 = vector.load %arg5[%c1_15, %c0_16, %c0_17] : memref<2x1x96xf32, #tpu.memory_space<vmem>>, vector<1x1x96xf32>
    %12 = vector.shape_cast %11 : vector<1x1x96xf32> to vector<1x96xf32>
    %c0_18 = arith.constant 0 : index
    %c0_19 = arith.constant 0 : index
    %c0_20 = arith.constant 0 : index
    %13 = vector.load %arg6[%c0_18, %c0_19, %c0_20] : memref<2x1x96xf32, #tpu.memory_space<vmem>>, vector<1x1x96xf32>
    %14 = vector.shape_cast %13 : vector<1x1x96xf32> to vector<1x96xf32>
    %c1_21 = arith.constant 1 : index
    %c0_22 = arith.constant 0 : index
    %c0_23 = arith.constant 0 : index
    %15 = vector.load %arg6[%c1_21, %c0_22, %c0_23] : memref<2x1x96xf32, #tpu.memory_space<vmem>>, vector<1x1x96xf32>
    %16 = vector.shape_cast %15 : vector<1x1x96xf32> to vector<1x96xf32>
    %c0_24 = arith.constant 0 : index
    %c0_25 = arith.constant 0 : index
    %c0_26 = arith.constant 0 : index
    %17 = vector.load %arg2[%c0_24, %c0_25, %c0_26] : memref<2x2x32xf32, #tpu.memory_space<vmem>>, vector<1x2x32xf32>
    %18 = vector.shape_cast %17 : vector<1x2x32xf32> to vector<2x32xf32>
    %c1_27 = arith.constant 1 : index
    %c0_28 = arith.constant 0 : index
    %c0_29 = arith.constant 0 : index
    %19 = vector.load %arg2[%c1_27, %c0_28, %c0_29] : memref<2x2x32xf32, #tpu.memory_space<vmem>>, vector<1x2x32xf32>
    %20 = vector.shape_cast %19 : vector<1x2x32xf32> to vector<2x32xf32>
    %c0_i32 = arith.constant 0 : i32
    %c8_i32 = arith.constant 8 : i32
    %21 = arith.addi %c0_i32, %c8_i32 : i32
    %c1_i32 = arith.constant 1 : i32
    %22:2 = scf.for %arg10 = %c0_i32 to %21 step %c1_i32 iter_args(%arg11 = %18, %arg12 = %20) -> (vector<2x32xf32>, vector<2x32xf32>)  : i32 {
      %c7_i32 = arith.constant 7 : i32
      %29 = arith.subi %c7_i32, %arg10 : i32
      %30 = arith.index_cast %arg10 : i32 to index
      %c0_37 = arith.constant 0 : index
      %c0_38 = arith.constant 0 : index
      %31 = vector.load %arg1[%30, %c0_37, %c0_38] : memref<8x2x64xf32, #tpu.memory_space<vmem>>, vector<1x2x64xf32>
      %32 = vector.shape_cast %31 : vector<1x2x64xf32> to vector<2x64xf32>
      %33 = arith.index_cast %29 : i32 to index
      %c0_39 = arith.constant 0 : index
      %c0_40 = arith.constant 0 : index
      %34 = vector.load %arg1[%33, %c0_39, %c0_40] : memref<8x2x64xf32, #tpu.memory_space<vmem>>, vector<1x2x64xf32>
      %35 = vector.shape_cast %34 : vector<1x2x64xf32> to vector<2x64xf32>
      %36 = vector.broadcast %arg10 : i32 to vector<2x1xi32>
      %37 = arith.cmpi slt, %36, %0 : vector<2x1xi32>
      %38 = arith.extui %37 : vector<2x1xi1> to vector<2x1xi32>
      %39 = arith.sitofp %38 : vector<2x1xi32> to vector<2x1xf32>
      %40 = vector.broadcast %29 : i32 to vector<2x1xi32>
      %41 = arith.cmpi slt, %40, %0 : vector<2x1xi32>
      %42 = arith.extui %41 : vector<2x1xi1> to vector<2x1xi32>
      %43 = arith.sitofp %42 : vector<2x1xi32> to vector<2x1xf32>
      %44 = arith.truncf %32 : vector<2x64xf32> to vector<2x64xbf16>
      %cst = arith.constant dense<0.000000e+00> : vector<2x96xf32>
      %45 = tpu.matmul %44, %2, %cst {dimension_numbers = #tpu.dot_dimension_numbers<[1], [0], [0], [1], [0, 0, 1, 1], [], []>} : vector<2x64xbf16>, vector<64x96xbf16>, vector<2x96xf32> -> vector<2x96xf32>
      %46 = vector.broadcast %10 : vector<1x96xf32> to vector<2x96xf32>
      %47 = arith.addf %45, %46 : vector<2x96xf32>
      %48 = arith.truncf %arg11 : vector<2x32xf32> to vector<2x32xbf16>
      %cst_41 = arith.constant dense<0.000000e+00> : vector<2x96xf32>
      %49 = tpu.matmul %48, %6, %cst_41 {dimension_numbers = #tpu.dot_dimension_numbers<[1], [0], [0], [1], [0, 0, 1, 1], [], []>} : vector<2x32xbf16>, vector<32x96xbf16>, vector<2x96xf32> -> vector<2x96xf32>
      %50 = vector.broadcast %14 : vector<1x96xf32> to vector<2x96xf32>
      %51 = arith.addf %49, %50 : vector<2x96xf32>
      %52 = vector.extract_strided_slice %47 {offsets = [0, 0], sizes = [2, 32], strides = [1, 1]} : vector<2x96xf32> to vector<2x32xf32>
      %53 = vector.extract_strided_slice %51 {offsets = [0, 0], sizes = [2, 32], strides = [1, 1]} : vector<2x96xf32> to vector<2x32xf32>
      %54 = arith.addf %52, %53 : vector<2x32xf32>
      %55 = arith.negf %54 : vector<2x32xf32>
      %56 = math.exp %55 : vector<2x32xf32>
      %cst_42 = arith.constant 1.000000e+00 : f32
      %57 = vector.broadcast %cst_42 : f32 to vector<2x32xf32>
      %58 = arith.addf %57, %56 : vector<2x32xf32>
      %59 = arith.divf %57, %58 : vector<2x32xf32>
      %60 = vector.extract_strided_slice %47 {offsets = [0, 32], sizes = [2, 32], strides = [1, 1]} : vector<2x96xf32> to vector<2x32xf32>
      %61 = vector.extract_strided_slice %51 {offsets = [0, 32], sizes = [2, 32], strides = [1, 1]} : vector<2x96xf32> to vector<2x32xf32>
      %62 = arith.addf %60, %61 : vector<2x32xf32>
      %63 = arith.negf %62 : vector<2x32xf32>
      %64 = math.exp %63 : vector<2x32xf32>
      %cst_43 = arith.constant 1.000000e+00 : f32
      %65 = vector.broadcast %cst_43 : f32 to vector<2x32xf32>
      %66 = arith.addf %65, %64 : vector<2x32xf32>
      %67 = arith.divf %65, %66 : vector<2x32xf32>
      %68 = vector.extract_strided_slice %47 {offsets = [0, 64], sizes = [2, 32], strides = [1, 1]} : vector<2x96xf32> to vector<2x32xf32>
      %69 = vector.extract_strided_slice %51 {offsets = [0, 64], sizes = [2, 32], strides = [1, 1]} : vector<2x96xf32> to vector<2x32xf32>
      %70 = arith.mulf %59, %69 : vector<2x32xf32>
      %71 = arith.addf %68, %70 : vector<2x32xf32>
      %72 = math.tanh %71 : vector<2x32xf32>
      %cst_44 = arith.constant 1.000000e+00 : f32
      %73 = vector.broadcast %cst_44 : f32 to vector<2x32xf32>
      %74 = arith.subf %73, %67 : vector<2x32xf32>
      %75 = arith.mulf %74, %72 : vector<2x32xf32>
      %76 = arith.mulf %67, %arg11 : vector<2x32xf32>
      %77 = arith.addf %75, %76 : vector<2x32xf32>
      %78 = arith.truncf %35 : vector<2x64xf32> to vector<2x64xbf16>
      %cst_45 = arith.constant dense<0.000000e+00> : vector<2x96xf32>
      %79 = tpu.matmul %78, %4, %cst_45 {dimension_numbers = #tpu.dot_dimension_numbers<[1], [0], [0], [1], [0, 0, 1, 1], [], []>} : vector<2x64xbf16>, vector<64x96xbf16>, vector<2x96xf32> -> vector<2x96xf32>
      %80 = vector.broadcast %12 : vector<1x96xf32> to vector<2x96xf32>
      %81 = arith.addf %79, %80 : vector<2x96xf32>
      %82 = arith.truncf %arg12 : vector<2x32xf32> to vector<2x32xbf16>
      %cst_46 = arith.constant dense<0.000000e+00> : vector<2x96xf32>
      %83 = tpu.matmul %82, %8, %cst_46 {dimension_numbers = #tpu.dot_dimension_numbers<[1], [0], [0], [1], [0, 0, 1, 1], [], []>} : vector<2x32xbf16>, vector<32x96xbf16>, vector<2x96xf32> -> vector<2x96xf32>
      %84 = vector.broadcast %16 : vector<1x96xf32> to vector<2x96xf32>
      %85 = arith.addf %83, %84 : vector<2x96xf32>
      %86 = vector.extract_strided_slice %81 {offsets = [0, 0], sizes = [2, 32], strides = [1, 1]} : vector<2x96xf32> to vector<2x32xf32>
      %87 = vector.extract_strided_slice %85 {offsets = [0, 0], sizes = [2, 32], strides = [1, 1]} : vector<2x96xf32> to vector<2x32xf32>
      %88 = arith.addf %86, %87 : vector<2x32xf32>
      %89 = arith.negf %88 : vector<2x32xf32>
      %90 = math.exp %89 : vector<2x32xf32>
      %cst_47 = arith.constant 1.000000e+00 : f32
      %91 = vector.broadcast %cst_47 : f32 to vector<2x32xf32>
      %92 = arith.addf %91, %90 : vector<2x32xf32>
      %93 = arith.divf %91, %92 : vector<2x32xf32>
      %94 = vector.extract_strided_slice %81 {offsets = [0, 32], sizes = [2, 32], strides = [1, 1]} : vector<2x96xf32> to vector<2x32xf32>
      %95 = vector.extract_strided_slice %85 {offsets = [0, 32], sizes = [2, 32], strides = [1, 1]} : vector<2x96xf32> to vector<2x32xf32>
      %96 = arith.addf %94, %95 : vector<2x32xf32>
      %97 = arith.negf %96 : vector<2x32xf32>
      %98 = math.exp %97 : vector<2x32xf32>
      %cst_48 = arith.constant 1.000000e+00 : f32
      %99 = vector.broadcast %cst_48 : f32 to vector<2x32xf32>
      %100 = arith.addf %99, %98 : vector<2x32xf32>
      %101 = arith.divf %99, %100 : vector<2x32xf32>
      %102 = vector.extract_strided_slice %81 {offsets = [0, 64], sizes = [2, 32], strides = [1, 1]} : vector<2x96xf32> to vector<2x32xf32>
      %103 = vector.extract_strided_slice %85 {offsets = [0, 64], sizes = [2, 32], strides = [1, 1]} : vector<2x96xf32> to vector<2x32xf32>
      %104 = arith.mulf %93, %103 : vector<2x32xf32>
      %105 = arith.addf %102, %104 : vector<2x32xf32>
      %106 = math.tanh %105 : vector<2x32xf32>
      %cst_49 = arith.constant 1.000000e+00 : f32
      %107 = vector.broadcast %cst_49 : f32 to vector<2x32xf32>
      %108 = arith.subf %107, %101 : vector<2x32xf32>
      %109 = arith.mulf %108, %106 : vector<2x32xf32>
      %110 = arith.mulf %101, %arg12 : vector<2x32xf32>
      %111 = arith.addf %109, %110 : vector<2x32xf32>
      %112 = vector.broadcast %39 : vector<2x1xf32> to vector<2x32xf32>
      %113 = arith.mulf %77, %112 : vector<2x32xf32>
      %114 = arith.index_cast %arg10 : i32 to index
      %c0_50 = arith.constant 0 : index
      %c0_51 = arith.constant 0 : index
      %115 = vector.load %arg7[%114, %c0_50, %c0_51] : memref<8x2x32xf32, #tpu.memory_space<vmem>>, vector<1x2x32xf32>
      %116 = vector.shape_cast %115 : vector<1x2x32xf32> to vector<2x32xf32>
      %117 = vector.shape_cast %113 : vector<2x32xf32> to vector<1x2x32xf32>
      tpu.vector_store %arg7[%114, %c0_50, %c0_51], %117 {strides = array<i32>} : memref<8x2x32xf32, #tpu.memory_space<vmem>>, vector<1x2x32xf32>,
      %118 = vector.broadcast %43 : vector<2x1xf32> to vector<2x32xf32>
      %119 = arith.mulf %111, %118 : vector<2x32xf32>
      %120 = arith.index_cast %29 : i32 to index
      %c0_52 = arith.constant 0 : index
      %c0_53 = arith.constant 0 : index
      %121 = vector.load %arg8[%120, %c0_52, %c0_53] : memref<8x2x32xf32, #tpu.memory_space<vmem>>, vector<1x2x32xf32>
      %122 = vector.shape_cast %121 : vector<1x2x32xf32> to vector<2x32xf32>
      %123 = vector.shape_cast %119 : vector<2x32xf32> to vector<1x2x32xf32>
      tpu.vector_store %arg8[%120, %c0_52, %c0_53], %123 {strides = array<i32>} : memref<8x2x32xf32, #tpu.memory_space<vmem>>, vector<1x2x32xf32>,
      %124 = vector.broadcast %39 : vector<2x1xf32> to vector<2x32xf32>
      %125 = arith.mulf %124, %77 : vector<2x32xf32>
      %cst_54 = arith.constant 1.000000e+00 : f32
      %126 = vector.broadcast %cst_54 : f32 to vector<2x1xf32>
      %127 = arith.subf %126, %39 : vector<2x1xf32>
      %128 = vector.broadcast %127 : vector<2x1xf32> to vector<2x32xf32>
      %129 = arith.mulf %128, %arg11 : vector<2x32xf32>
      %130 = arith.addf %125, %129 : vector<2x32xf32>
      %131 = vector.broadcast %43 : vector<2x1xf32> to vector<2x32xf32>
      %132 = arith.mulf %131, %111 : vector<2x32xf32>
      %cst_55 = arith.constant 1.000000e+00 : f32
      %133 = vector.broadcast %cst_55 : f32 to vector<2x1xf32>
      %134 = arith.subf %133, %43 : vector<2x1xf32>
      %135 = vector.broadcast %134 : vector<2x1xf32> to vector<2x32xf32>
      %136 = arith.mulf %135, %arg12 : vector<2x32xf32>
      %137 = arith.addf %132, %136 : vector<2x32xf32>
      scf.yield %130, %137 : vector<2x32xf32>, vector<2x32xf32>
    }
    %c8_i32_30 = arith.constant 8 : i32
    %c0_31 = arith.constant 0 : index
    %c0_32 = arith.constant 0 : index
    %c0_33 = arith.constant 0 : index
    %23 = vector.load %arg9[%c0_31, %c0_32, %c0_33] : memref<2x2x32xf32, #tpu.memory_space<vmem>>, vector<1x2x32xf32>
    %24 = vector.shape_cast %23 : vector<1x2x32xf32> to vector<2x32xf32>
    %25 = vector.shape_cast %22#0 : vector<2x32xf32> to vector<1x2x32xf32>
    tpu.vector_store %arg9[%c0_31, %c0_32, %c0_33], %25 {strides = array<i32>} : memref<2x2x32xf32, #tpu.memory_space<vmem>>, vector<1x2x32xf32>,
    %c1_34 = arith.constant 1 : index
    %c0_35 = arith.constant 0 : index
    %c0_36 = arith.constant 0 : index
    %26 = vector.load %arg9[%c1_34, %c0_35, %c0_36] : memref<2x2x32xf32, #tpu.memory_space<vmem>>, vector<1x2x32xf32>
    %27 = vector.shape_cast %26 : vector<1x2x32xf32> to vector<2x32xf32>
    %28 = vector.shape_cast %22#1 : vector<2x32xf32> to vector<1x2x32xf32>
    tpu.vector_store %arg9[%c1_34, %c0_35, %c0_36], %28 {strides = array<i32>} : memref<2x2x32xf32, #tpu.memory_space<vmem>>, vector<1x2x32xf32>,
    return
  }
}

module attributes {stable_mosaic.version = 11 : i64} {
  func.func @_bigru_layer_kernel(%arg0: memref<2x1xi32, #tpu.memory_space<vmem>>, %arg1: memref<8x2x16xf32, #tpu.memory_space<vmem>>, %arg2: memref<2x2x32xf32, #tpu.memory_space<vmem>>, %arg3: memref<2x16x96xbf16, #tpu.memory_space<vmem>>, %arg4: memref<2x32x96xbf16, #tpu.memory_space<vmem>>, %arg5: memref<2x1x96xf32, #tpu.memory_space<vmem>>, %arg6: memref<2x1x96xf32, #tpu.memory_space<vmem>>, %arg7: memref<8x2x32xf32, #tpu.memory_space<vmem>>, %arg8: memref<8x2x32xf32, #tpu.memory_space<vmem>>, %arg9: memref<2x2x32xf32, #tpu.memory_space<vmem>>) attributes {dimension_semantics = [], scalar_prefetch = 0 : i64, scratch_operands = 0 : i64, tpu.core_type = #tpu.core_type<tc>} {
    %c0 = arith.constant 0 : index
    %c0_0 = arith.constant 0 : index
    %0 = vector.load %arg0[%c0, %c0_0] : memref<2x1xi32, #tpu.memory_space<vmem>>, vector<2x1xi32>
    %c0_1 = arith.constant 0 : index
    %c0_2 = arith.constant 0 : index
    %c0_3 = arith.constant 0 : index
    %1 = vector.load %arg3[%c0_1, %c0_2, %c0_3] : memref<2x16x96xbf16, #tpu.memory_space<vmem>>, vector<1x16x96xbf16>
    %2 = vector.shape_cast %1 : vector<1x16x96xbf16> to vector<16x96xbf16>
    %c1 = arith.constant 1 : index
    %c0_4 = arith.constant 0 : index
    %c0_5 = arith.constant 0 : index
    %3 = vector.load %arg3[%c1, %c0_4, %c0_5] : memref<2x16x96xbf16, #tpu.memory_space<vmem>>, vector<1x16x96xbf16>
    %4 = vector.shape_cast %3 : vector<1x16x96xbf16> to vector<16x96xbf16>
    %c0_6 = arith.constant 0 : index
    %c0_7 = arith.constant 0 : index
    %c0_8 = arith.constant 0 : index
    %5 = vector.load %arg4[%c0_6, %c0_7, %c0_8] : memref<2x32x96xbf16, #tpu.memory_space<vmem>>, vector<1x32x96xbf16>
    %6 = vector.shape_cast %5 : vector<1x32x96xbf16> to vector<32x96xbf16>
    %c1_9 = arith.constant 1 : index
    %c0_10 = arith.constant 0 : index
    %c0_11 = arith.constant 0 : index
    %7 = vector.load %arg4[%c1_9, %c0_10, %c0_11] : memref<2x32x96xbf16, #tpu.memory_space<vmem>>, vector<1x32x96xbf16>
    %8 = vector.shape_cast %7 : vector<1x32x96xbf16> to vector<32x96xbf16>
    %c0_12 = arith.constant 0 : index
    %c0_13 = arith.constant 0 : index
    %c0_14 = arith.constant 0 : index
    %9 = vector.load %arg5[%c0_12, %c0_13, %c0_14] : memref<2x1x96xf32, #tpu.memory_space<vmem>>, vector<1x1x96xf32>
    %10 = vector.shape_cast %9 : vector<1x1x96xf32> to vector<1x96xf32>
    %c1_15 = arith.constant 1 : index
    %c0_16 = arith.constant 0 : index
    %c0_17 = arith.constant 0 : index
    %11 = vector.load %arg5[%c1_15, %c0_16, %c0_17] : memref<2x1x96xf32, #tpu.memory_space<vmem>>, vector<1x1x96xf32>
    %12 = vector.shape_cast %11 : vector<1x1x96xf32> to vector<1x96xf32>
    %c0_18 = arith.constant 0 : index
    %c0_19 = arith.constant 0 : index
    %c0_20 = arith.constant 0 : index
    %13 = vector.load %arg6[%c0_18, %c0_19, %c0_20] : memref<2x1x96xf32, #tpu.memory_space<vmem>>, vector<1x1x96xf32>
    %14 = vector.shape_cast %13 : vector<1x1x96xf32> to vector<1x96xf32>
    %c1_21 = arith.constant 1 : index
    %c0_22 = arith.constant 0 : index
    %c0_23 = arith.constant 0 : index
    %15 = vector.load %arg6[%c1_21, %c0_22, %c0_23] : memref<2x1x96xf32, #tpu.memory_space<vmem>>, vector<1x1x96xf32>
    %16 = vector.shape_cast %15 : vector<1x1x96xf32> to vector<1x96xf32>
    %c0_24 = arith.constant 0 : index
    %c0_25 = arith.constant 0 : index
    %c0_26 = arith.constant 0 : index
    %17 = vector.load %arg2[%c0_24, %c0_25, %c0_26] : memref<2x2x32xf32, #tpu.memory_space<vmem>>, vector<1x2x32xf32>
    %18 = vector.shape_cast %17 : vector<1x2x32xf32> to vector<2x32xf32>
    %c1_27 = arith.constant 1 : index
    %c0_28 = arith.constant 0 : index
    %c0_29 = arith.constant 0 : index
    %19 = vector.load %arg2[%c1_27, %c0_28, %c0_29] : memref<2x2x32xf32, #tpu.memory_space<vmem>>, vector<1x2x32xf32>
    %20 = vector.shape_cast %19 : vector<1x2x32xf32> to vector<2x32xf32>
    %c0_i32 = arith.constant 0 : i32
    %c8_i32 = arith.constant 8 : i32
    %21 = arith.addi %c0_i32, %c8_i32 : i32
    %c1_i32 = arith.constant 1 : i32
    %22:2 = scf.for %arg10 = %c0_i32 to %21 step %c1_i32 iter_args(%arg11 = %18, %arg12 = %20) -> (vector<2x32xf32>, vector<2x32xf32>)  : i32 {
      %c7_i32 = arith.constant 7 : i32
      %29 = arith.subi %c7_i32, %arg10 : i32
      %30 = arith.index_cast %arg10 : i32 to index
      %c0_37 = arith.constant 0 : index
      %c0_38 = arith.constant 0 : index
      %31 = vector.load %arg1[%30, %c0_37, %c0_38] : memref<8x2x16xf32, #tpu.memory_space<vmem>>, vector<1x2x16xf32>
      %32 = vector.shape_cast %31 : vector<1x2x16xf32> to vector<2x16xf32>
      %33 = arith.index_cast %29 : i32 to index
      %c0_39 = arith.constant 0 : index
      %c0_40 = arith.constant 0 : index
      %34 = vector.load %arg1[%33, %c0_39, %c0_40] : memref<8x2x16xf32, #tpu.memory_space<vmem>>, vector<1x2x16xf32>
      %35 = vector.shape_cast %34 : vector<1x2x16xf32> to vector<2x16xf32>
      %36 = vector.broadcast %arg10 : i32 to vector<2x1xi32>
      %37 = arith.cmpi slt, %36, %0 : vector<2x1xi32>
      %38 = arith.extui %37 : vector<2x1xi1> to vector<2x1xi32>
      %39 = arith.sitofp %38 : vector<2x1xi32> to vector<2x1xf32>
      %40 = vector.broadcast %29 : i32 to vector<2x1xi32>
      %41 = arith.cmpi slt, %40, %0 : vector<2x1xi32>
      %42 = arith.extui %41 : vector<2x1xi1> to vector<2x1xi32>
      %43 = arith.sitofp %42 : vector<2x1xi32> to vector<2x1xf32>
      %44 = arith.truncf %32 : vector<2x16xf32> to vector<2x16xbf16>
      %cst = arith.constant dense<0.000000e+00> : vector<2x96xf32>
      %45 = tpu.matmul %44, %2, %cst {dimension_numbers = #tpu.dot_dimension_numbers<[1], [0], [0], [1], [0, 0, 1, 1], [], []>} : vector<2x16xbf16>, vector<16x96xbf16>, vector<2x96xf32> -> vector<2x96xf32>
      %46 = vector.broadcast %10 : vector<1x96xf32> to vector<2x96xf32>
      %47 = arith.addf %45, %46 : vector<2x96xf32>
      %48 = arith.truncf %arg11 : vector<2x32xf32> to vector<2x32xbf16>
      %cst_41 = arith.constant dense<0.000000e+00> : vector<2x96xf32>
      %49 = tpu.matmul %48, %6, %cst_41 {dimension_numbers = #tpu.dot_dimension_numbers<[1], [0], [0], [1], [0, 0, 1, 1], [], []>} : vector<2x32xbf16>, vector<32x96xbf16>, vector<2x96xf32> -> vector<2x96xf32>
      %50 = vector.broadcast %14 : vector<1x96xf32> to vector<2x96xf32>
      %51 = arith.addf %49, %50 : vector<2x96xf32>
      %52 = vector.extract_strided_slice %47 {offsets = [0, 0], sizes = [2, 32], strides = [1, 1]} : vector<2x96xf32> to vector<2x32xf32>
      %53 = vector.extract_strided_slice %51 {offsets = [0, 0], sizes = [2, 32], strides = [1, 1]} : vector<2x96xf32> to vector<2x32xf32>
      %54 = arith.addf %52, %53 : vector<2x32xf32>
      %55 = arith.negf %54 : vector<2x32xf32>
      %56 = math.exp %55 : vector<2x32xf32>
      %cst_42 = arith.constant 1.000000e+00 : f32
      %57 = vector.broadcast %cst_42 : f32 to vector<2x32xf32>
      %58 = arith.addf %57, %56 : vector<2x32xf32>
      %59 = arith.divf %57, %58 : vector<2x32xf32>
      %60 = vector.extract_strided_slice %47 {offsets = [0, 32], sizes = [2, 32], strides = [1, 1]} : vector<2x96xf32> to vector<2x32xf32>
      %61 = vector.extract_strided_slice %51 {offsets = [0, 32], sizes = [2, 32], strides = [1, 1]} : vector<2x96xf32> to vector<2x32xf32>
      %62 = arith.addf %60, %61 : vector<2x32xf32>
      %63 = arith.negf %62 : vector<2x32xf32>
      %64 = math.exp %63 : vector<2x32xf32>
      %cst_43 = arith.constant 1.000000e+00 : f32
      %65 = vector.broadcast %cst_43 : f32 to vector<2x32xf32>
      %66 = arith.addf %65, %64 : vector<2x32xf32>
      %67 = arith.divf %65, %66 : vector<2x32xf32>
      %68 = vector.extract_strided_slice %47 {offsets = [0, 64], sizes = [2, 32], strides = [1, 1]} : vector<2x96xf32> to vector<2x32xf32>
      %69 = vector.extract_strided_slice %51 {offsets = [0, 64], sizes = [2, 32], strides = [1, 1]} : vector<2x96xf32> to vector<2x32xf32>
      %70 = arith.mulf %59, %69 : vector<2x32xf32>
      %71 = arith.addf %68, %70 : vector<2x32xf32>
      %72 = math.tanh %71 : vector<2x32xf32>
      %cst_44 = arith.constant 1.000000e+00 : f32
      %73 = vector.broadcast %cst_44 : f32 to vector<2x32xf32>
      %74 = arith.subf %73, %67 : vector<2x32xf32>
      %75 = arith.mulf %74, %72 : vector<2x32xf32>
      %76 = arith.mulf %67, %arg11 : vector<2x32xf32>
      %77 = arith.addf %75, %76 : vector<2x32xf32>
      %78 = arith.truncf %35 : vector<2x16xf32> to vector<2x16xbf16>
      %cst_45 = arith.constant dense<0.000000e+00> : vector<2x96xf32>
      %79 = tpu.matmul %78, %4, %cst_45 {dimension_numbers = #tpu.dot_dimension_numbers<[1], [0], [0], [1], [0, 0, 1, 1], [], []>} : vector<2x16xbf16>, vector<16x96xbf16>, vector<2x96xf32> -> vector<2x96xf32>
      %80 = vector.broadcast %12 : vector<1x96xf32> to vector<2x96xf32>
      %81 = arith.addf %79, %80 : vector<2x96xf32>
      %82 = arith.truncf %arg12 : vector<2x32xf32> to vector<2x32xbf16>
      %cst_46 = arith.constant dense<0.000000e+00> : vector<2x96xf32>
      %83 = tpu.matmul %82, %8, %cst_46 {dimension_numbers = #tpu.dot_dimension_numbers<[1], [0], [0], [1], [0, 0, 1, 1], [], []>} : vector<2x32xbf16>, vector<32x96xbf16>, vector<2x96xf32> -> vector<2x96xf32>
      %84 = vector.broadcast %16 : vector<1x96xf32> to vector<2x96xf32>
      %85 = arith.addf %83, %84 : vector<2x96xf32>
      %86 = vector.extract_strided_slice %81 {offsets = [0, 0], sizes = [2, 32], strides = [1, 1]} : vector<2x96xf32> to vector<2x32xf32>
      %87 = vector.extract_strided_slice %85 {offsets = [0, 0], sizes = [2, 32], strides = [1, 1]} : vector<2x96xf32> to vector<2x32xf32>
      %88 = arith.addf %86, %87 : vector<2x32xf32>
      %89 = arith.negf %88 : vector<2x32xf32>
      %90 = math.exp %89 : vector<2x32xf32>
      %cst_47 = arith.constant 1.000000e+00 : f32
      %91 = vector.broadcast %cst_47 : f32 to vector<2x32xf32>
      %92 = arith.addf %91, %90 : vector<2x32xf32>
      %93 = arith.divf %91, %92 : vector<2x32xf32>
      %94 = vector.extract_strided_slice %81 {offsets = [0, 32], sizes = [2, 32], strides = [1, 1]} : vector<2x96xf32> to vector<2x32xf32>
      %95 = vector.extract_strided_slice %85 {offsets = [0, 32], sizes = [2, 32], strides = [1, 1]} : vector<2x96xf32> to vector<2x32xf32>
      %96 = arith.addf %94, %95 : vector<2x32xf32>
      %97 = arith.negf %96 : vector<2x32xf32>
      %98 = math.exp %97 : vector<2x32xf32>
      %cst_48 = arith.constant 1.000000e+00 : f32
      %99 = vector.broadcast %cst_48 : f32 to vector<2x32xf32>
      %100 = arith.addf %99, %98 : vector<2x32xf32>
      %101 = arith.divf %99, %100 : vector<2x32xf32>
      %102 = vector.extract_strided_slice %81 {offsets = [0, 64], sizes = [2, 32], strides = [1, 1]} : vector<2x96xf32> to vector<2x32xf32>
      %103 = vector.extract_strided_slice %85 {offsets = [0, 64], sizes = [2, 32], strides = [1, 1]} : vector<2x96xf32> to vector<2x32xf32>
      %104 = arith.mulf %93, %103 : vector<2x32xf32>
      %105 = arith.addf %102, %104 : vector<2x32xf32>
      %106 = math.tanh %105 : vector<2x32xf32>
      %cst_49 = arith.constant 1.000000e+00 : f32
      %107 = vector.broadcast %cst_49 : f32 to vector<2x32xf32>
      %108 = arith.subf %107, %101 : vector<2x32xf32>
      %109 = arith.mulf %108, %106 : vector<2x32xf32>
      %110 = arith.mulf %101, %arg12 : vector<2x32xf32>
      %111 = arith.addf %109, %110 : vector<2x32xf32>
      %112 = vector.broadcast %39 : vector<2x1xf32> to vector<2x32xf32>
      %113 = arith.mulf %77, %112 : vector<2x32xf32>
      %114 = arith.index_cast %arg10 : i32 to index
      %c0_50 = arith.constant 0 : index
      %c0_51 = arith.constant 0 : index
      %115 = vector.load %arg7[%114, %c0_50, %c0_51] : memref<8x2x32xf32, #tpu.memory_space<vmem>>, vector<1x2x32xf32>
      %116 = vector.shape_cast %115 : vector<1x2x32xf32> to vector<2x32xf32>
      %117 = vector.shape_cast %113 : vector<2x32xf32> to vector<1x2x32xf32>
      tpu.vector_store %arg7[%114, %c0_50, %c0_51], %117 {strides = array<i32>} : memref<8x2x32xf32, #tpu.memory_space<vmem>>, vector<1x2x32xf32>,
      %118 = vector.broadcast %43 : vector<2x1xf32> to vector<2x32xf32>
      %119 = arith.mulf %111, %118 : vector<2x32xf32>
      %120 = arith.index_cast %29 : i32 to index
      %c0_52 = arith.constant 0 : index
      %c0_53 = arith.constant 0 : index
      %121 = vector.load %arg8[%120, %c0_52, %c0_53] : memref<8x2x32xf32, #tpu.memory_space<vmem>>, vector<1x2x32xf32>
      %122 = vector.shape_cast %121 : vector<1x2x32xf32> to vector<2x32xf32>
      %123 = vector.shape_cast %119 : vector<2x32xf32> to vector<1x2x32xf32>
      tpu.vector_store %arg8[%120, %c0_52, %c0_53], %123 {strides = array<i32>} : memref<8x2x32xf32, #tpu.memory_space<vmem>>, vector<1x2x32xf32>,
      %124 = vector.broadcast %39 : vector<2x1xf32> to vector<2x32xf32>
      %125 = arith.mulf %124, %77 : vector<2x32xf32>
      %cst_54 = arith.constant 1.000000e+00 : f32
      %126 = vector.broadcast %cst_54 : f32 to vector<2x1xf32>
      %127 = arith.subf %126, %39 : vector<2x1xf32>
      %128 = vector.broadcast %127 : vector<2x1xf32> to vector<2x32xf32>
      %129 = arith.mulf %128, %arg11 : vector<2x32xf32>
      %130 = arith.addf %125, %129 : vector<2x32xf32>
      %131 = vector.broadcast %43 : vector<2x1xf32> to vector<2x32xf32>
      %132 = arith.mulf %131, %111 : vector<2x32xf32>
      %cst_55 = arith.constant 1.000000e+00 : f32
      %133 = vector.broadcast %cst_55 : f32 to vector<2x1xf32>
      %134 = arith.subf %133, %43 : vector<2x1xf32>
      %135 = vector.broadcast %134 : vector<2x1xf32> to vector<2x32xf32>
      %136 = arith.mulf %135, %arg12 : vector<2x32xf32>
      %137 = arith.addf %132, %136 : vector<2x32xf32>
      scf.yield %130, %137 : vector<2x32xf32>, vector<2x32xf32>
    }
    %c8_i32_30 = arith.constant 8 : i32
    %c0_31 = arith.constant 0 : index
    %c0_32 = arith.constant 0 : index
    %c0_33 = arith.constant 0 : index
    %23 = vector.load %arg9[%c0_31, %c0_32, %c0_33] : memref<2x2x32xf32, #tpu.memory_space<vmem>>, vector<1x2x32xf32>
    %24 = vector.shape_cast %23 : vector<1x2x32xf32> to vector<2x32xf32>
    %25 = vector.shape_cast %22#0 : vector<2x32xf32> to vector<1x2x32xf32>
    tpu.vector_store %arg9[%c0_31, %c0_32, %c0_33], %25 {strides = array<i32>} : memref<2x2x32xf32, #tpu.memory_space<vmem>>, vector<1x2x32xf32>,
    %c1_34 = arith.constant 1 : index
    %c0_35 = arith.constant 0 : index
    %c0_36 = arith.constant 0 : index
    %26 = vector.load %arg9[%c1_34, %c0_35, %c0_36] : memref<2x2x32xf32, #tpu.memory_space<vmem>>, vector<1x2x32xf32>
    %27 = vector.shape_cast %26 : vector<1x2x32xf32> to vector<2x32xf32>
    %28 = vector.shape_cast %22#1 : vector<2x32xf32> to vector<1x2x32xf32>
    tpu.vector_store %arg9[%c1_34, %c0_35, %c0_36], %28 {strides = array<i32>} : memref<2x2x32xf32, #tpu.memory_space<vmem>>, vector<1x2x32xf32>,
    return
  }
}

module attributes {stable_mosaic.version = 11 : i64} {
  func.func @_pdist_sum_kernel(%arg0: i32, %arg1: memref<1x16x16xf32, #tpu.memory_space<vmem>>, %arg2: memref<1x1x1xf32, #tpu.memory_space<vmem>>) attributes {dimension_semantics = [#tpu.dimension_semantics<parallel>], iteration_bounds = array<i64: 2>, scalar_prefetch = 0 : i64, scratch_operands = 0 : i64, tpu.core_type = #tpu.core_type<tc>, window_params = [{transform_indices = @transform_0, window_bounds = array<i64: 1, 16, 16>}, {transform_indices = @transform_1, window_bounds = array<i64: 1, 1, 1>}]} {
    %c0 = arith.constant 0 : index
    %c0_0 = arith.constant 0 : index
    %c0_1 = arith.constant 0 : index
    %0 = vector.load %arg1[%c0, %c0_0, %c0_1] : memref<1x16x16xf32, #tpu.memory_space<vmem>>, vector<1x16x16xf32>
    %1 = vector.shape_cast %0 : vector<1x16x16xf32> to vector<16x16xf32>
    %2 = arith.mulf %1, %1 : vector<16x16xf32>
    %cst = arith.constant dense<0.000000e+00> : vector<16xf32>
    %3 = vector.multi_reduction <add>, %2, %cst [1] : vector<16x16xf32> to vector<16xf32>
    %4 = vector.shape_cast %3 : vector<16xf32> to vector<16x1xf32>
    %cst_2 = arith.constant dense<0.000000e+00> : vector<16x16xf32>
    %5 = tpu.matmul %1, %1, %cst_2 {dimension_numbers = #tpu.dot_dimension_numbers<[1], [1], [0], [0], [0, 0, 1, 0], [], []>} : vector<16x16xf32>, vector<16x16xf32>, vector<16x16xf32> -> vector<16x16xf32>
    %6 = tpu.transpose %4, [1, 0] : vector<16x1xf32> -> vector<1x16xf32>
    %7 = vector.broadcast %4 : vector<16x1xf32> to vector<16x16xf32>
    %8 = vector.broadcast %6 : vector<1x16xf32> to vector<16x16xf32>
    %9 = arith.addf %7, %8 : vector<16x16xf32>
    %cst_3 = arith.constant 2.000000e+00 : f32
    %10 = vector.broadcast %cst_3 : f32 to vector<16x16xf32>
    %11 = arith.mulf %10, %5 : vector<16x16xf32>
    %12 = arith.subf %9, %11 : vector<16x16xf32>
    %cst_4 = arith.constant 0.000000e+00 : f32
    %13 = vector.broadcast %cst_4 : f32 to vector<16x16xf32>
    %14 = arith.maximumf %12, %13 : vector<16x16xf32>
    %15 = math.sqrt %14 : vector<16x16xf32>
    %16 = vector.shape_cast %15 : vector<16x16xf32> to vector<1x16x16xf32>
    %cst_5 = arith.constant dense<0.000000e+00> : vector<1xf32>
    %17 = vector.multi_reduction <add>, %16, %cst_5 [1, 2] : vector<1x16x16xf32> to vector<1xf32>
    %18 = vector.shape_cast %17 : vector<1xf32> to vector<1x1x1xf32>
    %19 = vector.extract %18[0, 0, 0] : f32 from vector<1x1x1xf32>
    %20 = vector.broadcast %19 : f32 to vector<1x1xf32>
    %c0_6 = arith.constant 0 : index
    %c0_7 = arith.constant 0 : index
    %c0_8 = arith.constant 0 : index
    %21 = vector.load %arg2[%c0_6, %c0_7, %c0_8] : memref<1x1x1xf32, #tpu.memory_space<vmem>>, vector<1x1x1xf32>
    %22 = vector.shape_cast %21 : vector<1x1x1xf32> to vector<1x1xf32>
    %23 = vector.shape_cast %20 : vector<1x1xf32> to vector<1x1x1xf32>
    tpu.vector_store %arg2[%c0_6, %c0_7, %c0_8], %23 {strides = array<i32>} : memref<1x1x1xf32, #tpu.memory_space<vmem>>, vector<1x1x1xf32>,
    return
  }
  func.func @transform_0(%arg0: i32) -> (i32, i32, i32) {
    %c0_i32 = arith.constant 0 : i32
    %c0_i32_0 = arith.constant 0 : i32
    %c0_i32_1 = arith.constant 0 : i32
    return %arg0, %c0_i32, %c0_i32_0 : i32, i32, i32
  }
  func.func @transform_1(%arg0: i32) -> (i32, i32, i32) {
    %c0_i32 = arith.constant 0 : i32
    %c0_i32_0 = arith.constant 0 : i32
    %c0_i32_1 = arith.constant 0 : i32
    return %arg0, %c0_i32, %c0_i32_0 : i32, i32, i32
  }
}

module attributes {stable_mosaic.version = 11 : i64} {
  func.func @_word_word_kernel(%arg0: i32, %arg1: memref<1x1xf32, #tpu.memory_space<vmem>>, %arg2: memref<1x16x16xf32, #tpu.memory_space<vmem>>, %arg3: memref<1x16x16xf32, #tpu.memory_space<vmem>>) attributes {dimension_semantics = [#tpu.dimension_semantics<parallel>], iteration_bounds = array<i64: 2>, scalar_prefetch = 0 : i64, scratch_operands = 0 : i64, tpu.core_type = #tpu.core_type<tc>, window_params = [{pipeline_mode = #tpu.pipeline_mode<synchronous>, transform_indices = @transform_0, window_bounds = array<i64: 1, 1>}, {transform_indices = @transform_1, window_bounds = array<i64: 1, 16, 16>}, {transform_indices = @transform_2, window_bounds = array<i64: 1, 16, 16>}]} {
    %c0 = arith.constant 0 : index
    %c0_0 = arith.constant 0 : index
    %0 = vector.load %arg1[%c0, %c0_0] : memref<1x1xf32, #tpu.memory_space<vmem>>, vector<1x1xf32>
    %c0_1 = arith.constant 0 : index
    %c0_2 = arith.constant 0 : index
    %c0_3 = arith.constant 0 : index
    %1 = vector.load %arg2[%c0_1, %c0_2, %c0_3] : memref<1x16x16xf32, #tpu.memory_space<vmem>>, vector<1x16x16xf32>
    %2 = vector.shape_cast %1 : vector<1x16x16xf32> to vector<16x16xf32>
    %3 = arith.mulf %2, %2 : vector<16x16xf32>
    %cst = arith.constant dense<0.000000e+00> : vector<16xf32>
    %4 = vector.multi_reduction <add>, %3, %cst [1] : vector<16x16xf32> to vector<16xf32>
    %5 = vector.shape_cast %4 : vector<16xf32> to vector<16x1xf32>
    %cst_4 = arith.constant dense<0.000000e+00> : vector<16x16xf32>
    %6 = tpu.matmul %2, %2, %cst_4 {dimension_numbers = #tpu.dot_dimension_numbers<[1], [1], [0], [0], [0, 0, 1, 0], [], []>} : vector<16x16xf32>, vector<16x16xf32>, vector<16x16xf32> -> vector<16x16xf32>
    %7 = tpu.transpose %5, [1, 0] : vector<16x1xf32> -> vector<1x16xf32>
    %8 = vector.broadcast %5 : vector<16x1xf32> to vector<16x16xf32>
    %9 = vector.broadcast %7 : vector<1x16xf32> to vector<16x16xf32>
    %10 = arith.addf %8, %9 : vector<16x16xf32>
    %cst_5 = arith.constant 2.000000e+00 : f32
    %11 = vector.broadcast %cst_5 : f32 to vector<16x16xf32>
    %12 = arith.mulf %11, %6 : vector<16x16xf32>
    %13 = arith.subf %10, %12 : vector<16x16xf32>
    %cst_6 = arith.constant 0.000000e+00 : f32
    %14 = vector.broadcast %cst_6 : f32 to vector<16x16xf32>
    %15 = arith.maximumf %13, %14 : vector<16x16xf32>
    %16 = math.sqrt %15 : vector<16x16xf32>
    %17 = vector.broadcast %0 : vector<1x1xf32> to vector<16x16xf32>
    %18 = arith.subf %17, %16 : vector<16x16xf32>
    %19 = arith.negf %18 : vector<16x16xf32>
    %20 = math.exp %19 : vector<16x16xf32>
    %cst_7 = arith.constant 1.000000e+00 : f32
    %21 = vector.broadcast %cst_7 : f32 to vector<16x16xf32>
    %22 = arith.addf %21, %20 : vector<16x16xf32>
    %23 = arith.divf %21, %22 : vector<16x16xf32>
    %cst_8 = arith.constant 5.000000e-01 : f32
    %24 = vector.broadcast %cst_8 : f32 to vector<16x16xf32>
    %25 = arith.cmpf olt, %23, %24 : vector<16x16xf32>
    %cst_9 = arith.constant 0.000000e+00 : f32
    %26 = vector.broadcast %cst_9 : f32 to vector<16x16xf32>
    %27 = arith.select %25, %26, %23 : vector<16x16xi1>, vector<16x16xf32>
    %c0_10 = arith.constant 0 : index
    %c0_11 = arith.constant 0 : index
    %c0_12 = arith.constant 0 : index
    %28 = vector.load %arg3[%c0_10, %c0_11, %c0_12] : memref<1x16x16xf32, #tpu.memory_space<vmem>>, vector<1x16x16xf32>
    %29 = vector.shape_cast %28 : vector<1x16x16xf32> to vector<16x16xf32>
    %30 = vector.shape_cast %27 : vector<16x16xf32> to vector<1x16x16xf32>
    tpu.vector_store %arg3[%c0_10, %c0_11, %c0_12], %30 {strides = array<i32>} : memref<1x16x16xf32, #tpu.memory_space<vmem>>, vector<1x16x16xf32>,
    return
  }
  func.func @transform_0(%arg0: i32) -> (i32, i32) {
    %c0_i32 = arith.constant 0 : i32
    %c0_i32_0 = arith.constant 0 : i32
    %c0_i32_1 = arith.constant 0 : i32
    return %c0_i32, %c0_i32_0 : i32, i32
  }
  func.func @transform_1(%arg0: i32) -> (i32, i32, i32) {
    %c0_i32 = arith.constant 0 : i32
    %c0_i32_0 = arith.constant 0 : i32
    %c0_i32_1 = arith.constant 0 : i32
    return %arg0, %c0_i32, %c0_i32_0 : i32, i32, i32
  }
  func.func @transform_2(%arg0: i32) -> (i32, i32, i32) {
    %c0_i32 = arith.constant 0 : i32
    %c0_i32_0 = arith.constant 0 : i32
    %c0_i32_1 = arith.constant 0 : i32
    return %arg0, %c0_i32, %c0_i32_0 : i32, i32, i32
  }
}

module attributes {stable_mosaic.version = 11 : i64} {
  func.func @_linear_kernel(%arg0: memref<32x16xf32, #tpu.memory_space<vmem>>, %arg1: memref<16x8xbf16, #tpu.memory_space<vmem>>, %arg2: memref<1x8xf32, #tpu.memory_space<vmem>>, %arg3: memref<32x8xf32, #tpu.memory_space<vmem>>) attributes {dimension_semantics = [], scalar_prefetch = 0 : i64, scratch_operands = 0 : i64, tpu.core_type = #tpu.core_type<tc>} {
    %c0 = arith.constant 0 : index
    %c0_0 = arith.constant 0 : index
    %0 = vector.load %arg0[%c0, %c0_0] : memref<32x16xf32, #tpu.memory_space<vmem>>, vector<32x16xf32>
    %1 = arith.truncf %0 : vector<32x16xf32> to vector<32x16xbf16>
    %c0_1 = arith.constant 0 : index
    %c0_2 = arith.constant 0 : index
    %2 = vector.load %arg1[%c0_1, %c0_2] : memref<16x8xbf16, #tpu.memory_space<vmem>>, vector<16x8xbf16>
    %cst = arith.constant dense<0.000000e+00> : vector<32x8xf32>
    %3 = tpu.matmul %1, %2, %cst {dimension_numbers = #tpu.dot_dimension_numbers<[1], [0], [0], [1], [0, 0, 1, 1], [], []>} : vector<32x16xbf16>, vector<16x8xbf16>, vector<32x8xf32> -> vector<32x8xf32>
    %c0_3 = arith.constant 0 : index
    %c0_4 = arith.constant 0 : index
    %4 = vector.load %arg2[%c0_3, %c0_4] : memref<1x8xf32, #tpu.memory_space<vmem>>, vector<1x8xf32>
    %5 = vector.broadcast %4 : vector<1x8xf32> to vector<32x8xf32>
    %6 = arith.addf %3, %5 : vector<32x8xf32>
    %c0_5 = arith.constant 0 : index
    %c0_6 = arith.constant 0 : index
    %7 = vector.load %arg3[%c0_5, %c0_6] : memref<32x8xf32, #tpu.memory_space<vmem>>, vector<32x8xf32>
    tpu.vector_store %arg3[%c0_5, %c0_6], %6 {strides = array<i32>} : memref<32x8xf32, #tpu.memory_space<vmem>>, vector<32x8xf32>,
    return
  }
}

module attributes {stable_mosaic.version = 11 : i64} {
  func.func @_attention_kernel(%arg0: i32, %arg1: memref<1x2x32xf32, #tpu.memory_space<vmem>>, %arg2: memref<1x2x32xf32, #tpu.memory_space<vmem>>, %arg3: memref<1x1x2xf32, #tpu.memory_space<vmem>>, %arg4: memref<2x32x32xbf16, #tpu.memory_space<vmem>>, %arg5: memref<1x32xf32, #tpu.memory_space<vmem>>, %arg6: memref<1x2x32xf32, #tpu.memory_space<vmem>>) attributes {dimension_semantics = [#tpu.dimension_semantics<parallel>], iteration_bounds = array<i64: 2>, scalar_prefetch = 0 : i64, scratch_operands = 0 : i64, tpu.core_type = #tpu.core_type<tc>, window_params = [{transform_indices = @transform_0, window_bounds = array<i64: 1, 2, 32>}, {transform_indices = @transform_1, window_bounds = array<i64: 1, 2, 32>}, {transform_indices = @transform_2, window_bounds = array<i64: 1, 1, 2>}, {pipeline_mode = #tpu.pipeline_mode<synchronous>, transform_indices = @transform_3, window_bounds = array<i64: 2, 32, 32>}, {pipeline_mode = #tpu.pipeline_mode<synchronous>, transform_indices = @transform_4, window_bounds = array<i64: 1, 32>}, {transform_indices = @transform_5, window_bounds = array<i64: 1, 2, 32>}]} {
    %c0 = arith.constant 0 : index
    %c0_0 = arith.constant 0 : index
    %c0_1 = arith.constant 0 : index
    %0 = vector.load %arg1[%c0, %c0_0, %c0_1] : memref<1x2x32xf32, #tpu.memory_space<vmem>>, vector<1x2x32xf32>
    %1 = vector.shape_cast %0 : vector<1x2x32xf32> to vector<2x32xf32>
    %c0_2 = arith.constant 0 : index
    %c0_3 = arith.constant 0 : index
    %c0_4 = arith.constant 0 : index
    %2 = vector.load %arg2[%c0_2, %c0_3, %c0_4] : memref<1x2x32xf32, #tpu.memory_space<vmem>>, vector<1x2x32xf32>
    %3 = vector.shape_cast %2 : vector<1x2x32xf32> to vector<2x32xf32>
    %c0_5 = arith.constant 0 : index
    %c0_6 = arith.constant 0 : index
    %c0_7 = arith.constant 0 : index
    %4 = vector.load %arg3[%c0_5, %c0_6, %c0_7] : memref<1x1x2xf32, #tpu.memory_space<vmem>>, vector<1x1x2xf32>
    %5 = vector.shape_cast %4 : vector<1x1x2xf32> to vector<1x2xf32>
    %6 = arith.truncf %1 : vector<2x32xf32> to vector<2x32xbf16>
    %7 = arith.truncf %3 : vector<2x32xf32> to vector<2x32xbf16>
    %cst = arith.constant dense<0.000000e+00> : vector<2x2xf32>
    %8 = tpu.matmul %6, %7, %cst {dimension_numbers = #tpu.dot_dimension_numbers<[1], [1], [0], [0], [0, 0, 1, 0], [], []>} : vector<2x32xbf16>, vector<2x32xbf16>, vector<2x2xf32> -> vector<2x2xf32>
    %cst_8 = arith.constant 5.000000e-01 : f32
    %9 = vector.broadcast %cst_8 : f32 to vector<1x2xf32>
    %10 = arith.cmpf ogt, %5, %9 : vector<1x2xf32>
    %cst_9 = arith.constant -1.000000e+30 : f32
    %11 = vector.shape_cast %10 : vector<1x2xi1> to vector<1x2xi1>
    %12 = vector.broadcast %11 : vector<1x2xi1> to vector<2x2xi1>
    %13 = vector.broadcast %cst_9 : f32 to vector<2x2xf32>
    %14 = arith.select %12, %13, %8 : vector<2x2xi1>, vector<2x2xf32>
    %cst_10 = arith.constant dense<0xFF800000> : vector<2xf32>
    %15 = vector.multi_reduction <maximumf>, %14, %cst_10 [1] : vector<2x2xf32> to vector<2xf32>
    %16 = vector.shape_cast %15 : vector<2xf32> to vector<2x1xf32>
    %17 = vector.broadcast %16 : vector<2x1xf32> to vector<2x2xf32>
    %18 = arith.subf %14, %17 : vector<2x2xf32>
    %19 = math.exp %18 : vector<2x2xf32>
    %cst_11 = arith.constant dense<0.000000e+00> : vector<2xf32>
    %20 = vector.multi_reduction <add>, %19, %cst_11 [1] : vector<2x2xf32> to vector<2xf32>
    %21 = vector.shape_cast %20 : vector<2xf32> to vector<2x1xf32>
    %22 = tpu.reciprocal %21 {approx = true} : vector<2x1xf32> -> vector<2x1xf32>
    %23 = vector.broadcast %22 : vector<2x1xf32> to vector<2x2xf32>
    %24 = arith.mulf %19, %23 : vector<2x2xf32>
    %25 = arith.truncf %24 : vector<2x2xf32> to vector<2x2xbf16>
    %cst_12 = arith.constant dense<0.000000e+00> : vector<2x32xf32>
    %26 = tpu.matmul %25, %7, %cst_12 {dimension_numbers = #tpu.dot_dimension_numbers<[1], [0], [0], [1], [0, 0, 1, 1], [], []>} : vector<2x2xbf16>, vector<2x32xbf16>, vector<2x32xf32> -> vector<2x32xf32>
    %27 = arith.truncf %26 : vector<2x32xf32> to vector<2x32xbf16>
    %c0_13 = arith.constant 0 : index
    %c0_14 = arith.constant 0 : index
    %c0_15 = arith.constant 0 : index
    %28 = vector.load %arg4[%c0_13, %c0_14, %c0_15] : memref<2x32x32xbf16, #tpu.memory_space<vmem>>, vector<1x32x32xbf16>
    %29 = vector.shape_cast %28 : vector<1x32x32xbf16> to vector<32x32xbf16>
    %cst_16 = arith.constant dense<0.000000e+00> : vector<2x32xf32>
    %30 = tpu.matmul %27, %29, %cst_16 {dimension_numbers = #tpu.dot_dimension_numbers<[1], [0], [0], [1], [0, 0, 1, 1], [], []>} : vector<2x32xbf16>, vector<32x32xbf16>, vector<2x32xf32> -> vector<2x32xf32>
    %c1 = arith.constant 1 : index
    %c0_17 = arith.constant 0 : index
    %c0_18 = arith.constant 0 : index
    %31 = vector.load %arg4[%c1, %c0_17, %c0_18] : memref<2x32x32xbf16, #tpu.memory_space<vmem>>, vector<1x32x32xbf16>
    %32 = vector.shape_cast %31 : vector<1x32x32xbf16> to vector<32x32xbf16>
    %cst_19 = arith.constant dense<0.000000e+00> : vector<2x32xf32>
    %33 = tpu.matmul %6, %32, %cst_19 {dimension_numbers = #tpu.dot_dimension_numbers<[1], [0], [0], [1], [0, 0, 1, 1], [], []>} : vector<2x32xbf16>, vector<32x32xbf16>, vector<2x32xf32> -> vector<2x32xf32>
    %34 = arith.addf %30, %33 : vector<2x32xf32>
    %c0_20 = arith.constant 0 : index
    %c0_21 = arith.constant 0 : index
    %35 = vector.load %arg5[%c0_20, %c0_21] : memref<1x32xf32, #tpu.memory_space<vmem>>, vector<1x32xf32>
    %36 = vector.broadcast %35 : vector<1x32xf32> to vector<2x32xf32>
    %37 = arith.addf %34, %36 : vector<2x32xf32>
    %38 = math.tanh %37 : vector<2x32xf32>
    %c0_22 = arith.constant 0 : index
    %c0_23 = arith.constant 0 : index
    %c0_24 = arith.constant 0 : index
    %39 = vector.load %arg6[%c0_22, %c0_23, %c0_24] : memref<1x2x32xf32, #tpu.memory_space<vmem>>, vector<1x2x32xf32>
    %40 = vector.shape_cast %39 : vector<1x2x32xf32> to vector<2x32xf32>
    %41 = vector.shape_cast %38 : vector<2x32xf32> to vector<1x2x32xf32>
    tpu.vector_store %arg6[%c0_22, %c0_23, %c0_24], %41 {strides = array<i32>} : memref<1x2x32xf32, #tpu.memory_space<vmem>>, vector<1x2x32xf32>,
    return
  }
  func.func @transform_0(%arg0: i32) -> (i32, i32, i32) {
    %c0_i32 = arith.constant 0 : i32
    %c0_i32_0 = arith.constant 0 : i32
    %c0_i32_1 = arith.constant 0 : i32
    return %arg0, %c0_i32, %c0_i32_0 : i32, i32, i32
  }
  func.func @transform_1(%arg0: i32) -> (i32, i32, i32) {
    %c0_i32 = arith.constant 0 : i32
    %c0_i32_0 = arith.constant 0 : i32
    %c0_i32_1 = arith.constant 0 : i32
    return %arg0, %c0_i32, %c0_i32_0 : i32, i32, i32
  }
  func.func @transform_2(%arg0: i32) -> (i32, i32, i32) {
    %c0_i32 = arith.constant 0 : i32
    %c0_i32_0 = arith.constant 0 : i32
    %c0_i32_1 = arith.constant 0 : i32
    return %arg0, %c0_i32, %c0_i32_0 : i32, i32, i32
  }
  func.func @transform_3(%arg0: i32) -> (i32, i32, i32) {
    %c0_i32 = arith.constant 0 : i32
    %c0_i32_0 = arith.constant 0 : i32
    %c0_i32_1 = arith.constant 0 : i32
    %c0_i32_2 = arith.constant 0 : i32
    return %c0_i32, %c0_i32_0, %c0_i32_1 : i32, i32, i32
  }
  func.func @transform_4(%arg0: i32) -> (i32, i32) {
    %c0_i32 = arith.constant 0 : i32
    %c0_i32_0 = arith.constant 0 : i32
    %c0_i32_1 = arith.constant 0 : i32
    return %c0_i32, %c0_i32_0 : i32, i32
  }
  func.func @transform_5(%arg0: i32) -> (i32, i32, i32) {
    %c0_i32 = arith.constant 0 : i32
    %c0_i32_0 = arith.constant 0 : i32
    %c0_i32_1 = arith.constant 0 : i32
    return %arg0, %c0_i32, %c0_i32_0 : i32, i32, i32
  }
}

</mosaic_0001>

<bundles_post_ra>
// kernel: encoder_forward.9
= control target key start
LH: loop header
LB: loop body
LE: loop exit
PB: predicated region body
PF: predicated region fallthrough
CT: control target
= control target key end

     0   :  { %s905_s0 = inlined_call_operand.vmem [shape: s32[2,1], index: 0, kind: input, shape index: {}]   ;;  %s906_s1 = inlined_call_operand.vmem [shape: f32[8,2,64], index: 1, kind: input, shape index: {}]   ;;  %s907_s3 = inlined_call_operand.vmem [shape: bf16[2,64,96], index: 3, kind: input, shape index: {}]   ;;  %s908_s7 = inlined_call_operand.vmem [shape: f32[8,2,32], index: 7, kind: output, shape index: {0}]   ;;  %s909_s8 = inlined_call_operand.vmem [shape: f32[8,2,32], index: 8, kind: output, shape index: {1}]   ;;  %s910_s9 = inlined_call_operand.vmem [shape: f32[2,2,32], index: 9, kind: output, shape index: {2}]   ;;  %s911_s4 = inlined_call_operand.vmem [shape: bf16[2,32,96], index: 4, kind: input, shape index: {}]   ;;  %s912_s5 = inlined_call_operand.vmem [shape: f32[2,1,96], index: 5, kind: input, shape index: {}]   ;;  %s913_s2 = inlined_call_operand.vmem [shape: f32[2,2,32], index: 2, kind: input, shape index: {}]   ;;  %s914_s6 = inlined_call_operand.vmem [shape: f32[2,1,96], index: 6, kind: input, shape index: {}]  }
   0x1   :  { %v638_v0 = vld [vmem:[%s905_s0] sm:$0x3]  ;;  %v648_v2 = vld [vmem:[%s907_s3] sm:$0xf0]  ;;  %v653_v3 = vld [vmem:[%s907_s3 + $0x8] sm:$0xf] }
   0x2   :  { %v643_v1 = vld [vmem:[%s907_s3] sm:$0xf]  ;;  %v658_v4 = vld [vmem:[%s907_s3 + $0x8] sm:$0xf0]  ;;  %v663_v5 = vld [vmem:[%s907_s3 + $0x10] sm:$0xf] }
   0x3   :  { %v668_v6 = vld [vmem:[%s907_s3 + $0x10] sm:$0xf0]  ;;  %v673_v7 = vld [vmem:[%s907_s3 + $0x18] sm:$0xf]  ;;  %v678_v8 = vld [vmem:[%s907_s3 + $0x18] sm:$0xf0] }
   0x4   :  { %v683_v9 = vld [vmem:[%s907_s3 + $0x20] sm:$0xf]  ;;  %v688_v10 = vld [vmem:[%s907_s3 + $0x20] sm:$0xf0]  ;;  %v693_v11 = vld [vmem:[%s907_s3 + $0x28] sm:$0xf] }
   0x5   :  { %v698_v12 = vld [vmem:[%s907_s3 + $0x28] sm:$0xf0]  ;;  %v703_v13 = vld [vmem:[%s907_s3 + $0x30] sm:$0xf]  ;;  %v708_v14 = vld [vmem:[%s907_s3 + $0x30] sm:$0xf0] }
   0x6   :  { %v713_v15 = vld [vmem:[%s907_s3 + $0x38] sm:$0xf]  ;;  %v718_v16 = vld [vmem:[%s907_s3 + $0x38] sm:$0xf0]  ;;  %v723_v17 = vld [vmem:[%s911_s4] sm:$0xf] }
   0x7   :  { %v728_v18 = vld [vmem:[%s911_s4] sm:$0xf0]  ;;  %v733_v19 = vld [vmem:[%s911_s4 + $0x8] sm:$0xf]  ;;  %v738_v20 = vld [vmem:[%s911_s4 + $0x8] sm:$0xf0] }
   0x8   :  { %v743_v21 = vld [vmem:[%s911_s4 + $0x10] sm:$0xf]  ;;  %v748_v22 = vld [vmem:[%s911_s4 + $0x10] sm:$0xf0]  ;;  %v753_v23 = vld [vmem:[%s911_s4 + $0x18] sm:$0xf] }
   0x9   :  { %v758_v24 = vld [vmem:[%s911_s4 + $0x18] sm:$0xf0]  ;;  %v763_v25 = vld [vmem:[%s912_s5] sm:$0x1]  ;;  %v768_v26 = vld [vmem:[%s912_s5 + $0x1] sm:$0x1] }
   0xa   :  { %v773_v27 = vld [vmem:[%s914_s6] sm:$0x1]  ;;  %v778_v28 = vld [vmem:[%s914_s6 + $0x1] sm:$0x1]  ;;  %v435_v30 = vld [vmem:[%s913_s2 + $0x2] sm:$0x3]  }
   0xb   :  { %v63_v29 = vld [vmem:[%s913_s2] sm:$0x3]   ;;  %s790_s5 = smov 0  }
   0xc LB: > { %v455_v31 = vor.u32 %v678_v8, %v673_v7  ;;  %v464_v32 = vor.u32 %v738_v20, %v733_v19  ;;  %v482_v33 = vor.u32 %v718_v16, %v713_v15  ;;  %v491_v34 = vor.u32 %v758_v24, %v753_v23  ;;  %s74_s2 = ssub.s32 7, %s578_s5  ;;  %s436_s6 = sshll.u32 %s578_s5, 1  ;;  %s578_s5 = sphi %s790_s5, %s71_s5   ;;  %v574_v29 = vphi %v63_v29, %v916_v29   ;;  %v570_v30 = vphi %v435_v30, %v915_v30  }
   0xd   : > { %v451_v35 = vor.u32 %v668_v6, %v663_v5  ;;  %v460_v36 = vor.u32 %v728_v18, %v723_v17  ;;  %v478_v37 = vor.u32 %v708_v14, %v703_v13  ;;  %v487_v38 = vor.u32 %v748_v22, %v743_v21  ;;  %s823_s24 = sshll.u32 %s74_s2, 1  ;;  %s76_s27 = scalar_lea.vmem %s906_s1, %s436_s6 }
   0xe   : > { %125 = vmatpush.bf16.msra.mxu0 %v455_v31  ;;  %160 = vmatpush.bf16.msra.mxu1 %v464_v32  ;;  %v134_v39 = vpack.c.bf16 %v574_v29, %v574_v29  ;;  %vm150_vm0 = vcmask 261120   ;;  %v447_v40 = vor.u32 %v658_v4, %v653_v3  ;;  %v254_v41 = vpack.c.bf16 %v570_v30, %v570_v30  ;;  %s79_s29 = scalar_lea.vmem %s906_s1, %s823_s24  ;;  %v77_v44 = vld [vmem:[%s76_s27] sm:$0x3]  ;;  %s580_s30 = smov 64  }
   0xf   : > { %245 = vmatpush.bf16.msra.mxu2 %v482_v33  ;;  %279 = vmatpush.bf16.msra.mxu3 %v491_v34  ;;  %v474_v42 = vor.u32 %v698_v12, %v693_v11  ;;  %v443_v43 = vor.u32 %v648_v2, %v643_v1  ;;  %v470_v45 = vor.u32 %v688_v10, %v683_v9  ;;  %v80_v46 = vld [vmem:[%s79_s29] sm:$0x3]  ;;  %vm117_vm1 = vcmask 523264   ;;  %s581_s10 = smov 32   ;;  %s584_s11 = smov 96  }
  0x10   : > { %v89_v47 = vpack.c.bf16 %v77_v44, %v77_v44  ;;  %v210_v48 = vpack.c.bf16 %v80_v46, %v80_v46  ;;  %v136_v49 = vperm.slane %v773_v27, 0  ;;  %v256_v52 = vperm.slane %v778_v28, 0  ;;  %s352_s14 = scalar_lea.vmem %s909_s8, %s823_s24  ;;  %s339_s17 = scalar_lea.vmem %s908_s7, %s436_s6 }
  0x11   : > { %v91_v61 = vperm.slane %v763_v25, 0  ;;  %v212_v31 = vperm.slane %v768_v26, 0  ;;  %v81_v44 = vstv %s578_s5  ;;  %v582_v46 = vmov 0   ;;  %s71_s5 = sadd.s32 1, %s578_s5  }
  0x12   : > { %126 = vmatpush.bf16.msra.mxu0 %v451_v35  ;;  %161 = vmatpush.bf16.msra.mxu1 %v460_v36  ;;  %vm82_vm2 = vcmp.lt.s32.totalorder %v81_v44, %v638_v0  ;;  %vm340_vm12 = vcmask 254976   ;;  %p68_p0 = scmp.ge.s32.totalorder %s71_s5, 8  }
  0x13   : > { %246 = vmatpush.bf16.msra.mxu2 %v478_v37  ;;  %280 = vmatpush.bf16.msra.mxu3 %v487_v38 }
  0x14   : > { %536 = vset.pattern.permute.xlu2 %v582_v46  ;;  %537 = vset.pattern.permute.xlu1 %v582_v46 }
  0x15   : > { %465 = vmatmul.msk.bf16.vlgmr.msra.gmra.mxu1 %vm150_vm0, %v134_v39  ;;  %543 = vset.pattern.permute.xlu0 %v582_v46 }
  0x16   : > { %127 = vmatpush.bf16.msra.mxu0 %v447_v40  ;;  %492 = vmatmul.msk.bf16.vlgmr.msra.gmra.mxu3 %vm150_vm0, %v254_v41 }
  0x17   : > { %247 = vmatpush.bf16.msra.mxu2 %v474_v42 }
  0x1a   : > { %128 = vmatpush.bf16.msra.mxu0 %v443_v43 }
  0x1b   : > { %248 = vmatpush.bf16.msra.mxu2 %v470_v45  ;;  %v85_v45 = vstv %s74_s2 }
  0x1c   : > { %vm86_vm3 = vcmp.lt.s32.totalorder %v85_v45, %v638_v0 }
  0x1d   : > { %456 = vmatmul.msk.bf16.vlgmr.msra.gmra.mxu0 %vm117_vm1, %v89_v47 }
  0x1e   : > { %483 = vmatmul.msk.bf16.vlgmr.msra.gmra.mxu2 %vm117_vm1, %v210_v48 }
  0x92   : > { %v163_v50 = vpop.f32.mrf.mxu1 }
  0x93   : > { %v164_v51 = vadd.f32 %v163_v50, %v136_v49  ;;  %v583_v49 = vmov 0.0  }
  0x94   : > { %v438_v50 = vsel %vm82_vm2, 1.0, %v583_v49 }
  0x95   : > { %188 = vrot.lane.b32.xlu0 %v164_v51, %s580_s30 }
  0x99   : > { %v282_v53 = vpop.f32.mrf.mxu3 }
  0x9a   : > { %v130_v54 = vpop.f32.mrf.mxu0  ;;  %v165_v55 = vpop.f32.mrf.mxu1  ;;  %v283_v56 = vadd.f32 %v282_v53, %v256_v52 }
  0x9b   : > { %v851_v62 = vadd.f32 %v130_v54, %v91_v61  ;;  %v439_v54 = vsel %vm86_vm3, 1.0, %v583_v49 }
  0x9d   : > { %307 = vrot.lane.b32.xlu0 %v283_v56, %s580_s30  ;;  %v167_v63 = vadd.f32 %v164_v51, %v851_v62  ;;  %v354_v51 = vsub.f32 1.0, %v438_v50 }
  0x9f   : > { %v466_v32 = vmul.f32 -1.442695, %v167_v63  ;;  %357 = vperm.xlu2 %536, %v354_v51  }
  0xa1   : > { %v250_v57 = vpop.f32.mrf.mxu2  ;;  %v284_v58 = vpop.f32.mrf.mxu3  ;;  %544 = vpow2.f32 %v466_v32 }
  0xa2   : > { %v132_v59 = vpop.f32.mrf.mxu0  ;;  %v855_v33 = vadd.f32 %v250_v57, %v212_v31  ;;  %v366_v57 = vsub.f32 1.0, %v439_v54 }
  0xa4   : > { %v286_v34 = vadd.f32 %v283_v56, %v855_v33 }
  0xa5   : > { %324 = vrot.lane.b32.xlu0 %v570_v30, %s581_s10 }
  0xa6   : > { %v493_v35 = vmul.f32 -1.442695, %v286_v34 }
  0xa7   : > { %v545_v36 = vpop.eup %544  ;;  %369 = vperm.xlu2 %536, %v366_v57  }
  0xa8   : > { %546 = vpow2.f32 %v493_v35  ;;  %v171_v37 = vadd.f32 1.0, %v545_v36 }
  0xa9   : > { %v252_v60 = vpop.f32.mrf.mxu2 }
  0xaa   : > { %548 = vrcp.f32 %v171_v37  ;;  %v183_v55 = vand.u32 2147483648, %v171_v37  ;;  %vm177_vm5 = vweird.f32 %v171_v37  ;;  %v181_v56 = vand.u32 2147483647, %v171_v37 }
  0xac   : > { %v184_v60 = vor.u32 1.1754944e-38, %v183_v55  ;;  %vm182_vm7 = vcmp.eq.f32.partialorder %v181_v56, 8.507059e+37 }
  0xae   : > { %v547_v38 = vpop.eup %546 }
  0xaf   : > { %v290_v39 = vadd.f32 1.0, %v547_v38 }
  0xb0   : > { %v549_v40 = vpop.eup %548 }
  0xb1   : > { %550 = vrcp.f32 %v290_v39  ;;  %v173_v41 = vmul.f32 %v549_v40, %v171_v37  ;;  %vm178_vm4 = vweird.f32 %v549_v40  ;;  %vm296_vm8 = vweird.f32 %v290_v39 }
  0xb2   : > { %vm179_vm6 = vmor %vm177_vm5, %vm178_vm4  ;;  %v302_v31 = vand.u32 2147483648, %v290_v39  ;;  %v300_v35 = vand.u32 2147483647, %v290_v39 }
  0xb3   : > { %v174_v42 = vsub.f32 1.0, %v173_v41 }
  0xb4   : > { %v303_v36 = vor.u32 1.1754944e-38, %v302_v31  ;;  %vm301_vm11 = vcmp.eq.f32.partialorder %v300_v35, 8.507059e+37 }
  0xb5   : > { %v175_v47 = vmul.f32 %v549_v40, %v174_v42  ;;  %v538_v42 = vpack.i.bf16 %v439_v54, %v438_v50 }
  0xb7   : > { %v551_v43 = vpop.eup %550  ;;  %v176_v52 = vadd.f32 %v549_v40, %v175_v47 }
  0xb8   : > { %v292_v48 = vmul.f32 %v551_v43, %v290_v39  ;;  %vm297_vm9 = vweird.f32 %v551_v43 }
  0xb9   : > { %v180_v58 = vsel %vm179_vm6, %v549_v40, %v176_v52  ;;  %vm298_vm10 = vmor %vm296_vm8, %vm297_vm9 }
  0xba   : > { %v293_v53 = vsub.f32 1.0, %v292_v48  ;;  %v185_v63 = vsel %vm182_vm7, %v184_v60, %v180_v58 }
  0xbc   : > { %v294_v59 = vmul.f32 %v551_v43, %v293_v53 }
  0xbe   : > { %v295_v34 = vadd.f32 %v551_v43, %v294_v59 }
  0xc0   : > { %v299_v37 = vsel %vm298_vm10, %v551_v43, %v295_v34 }
  0xc1   : > { %v304_v40 = vsel %vm301_vm11, %v303_v36, %v299_v37 }
  0xf9   : > { %v358_v39 = vpop.permute.xlu2 %357 }
 0x101   : > { %v370_v48 = vpop.permute.xlu2 %369 }
 0x102   : > { %v372_v49 = vmul.f32 %v570_v30, %v370_v48  ;;  %v198_v30 = vsub.f32 1.0, %v185_v63 }
 0x107   : > { %v189_v61 = vpop.permute.xlu0 %188 }
 0x108   : > { %v191_v32 = vmul.f32 %v189_v61, %v185_v63 }
 0x10a   : > { %193 = vrot.lane.b32.xlu1 %v191_v32, %s580_s30 }
 0x10f   : > { %v308_v38 = vpop.permute.xlu0 %307 }
 0x110   : > { %v310_v41 = vmul.f32 %v308_v38, %v304_v40 }
 0x112   : > { %312 = vrot.lane.b32.xlu1 %v310_v41, %s580_s30 }
 0x117   : > { %v325_v52 = vpop.permute.xlu0 %324 }
 0x118   : > { %v327_v55 = vmul.f32 %v325_v52, %v304_v40 }
 0x11a   : > { %205 = vrot.lane.b32.xlu1 %v574_v29, %s581_s10 }
 0x122   : > { %539 = vperm.xlu1 %537, %v538_v42  }
 0x17c   : > { %v194_v44 = vpop.permute.xlu1 %193 }
 0x17d   : > { %v196_v45 = vadd.f32 %v194_v44, %v851_v62  ;;  %v360_v62 = vmul.f32 %v574_v29, %v358_v39 }
 0x17f   : > { %552 = vtanh.f32 %v196_v45 }
 0x184   : > { %v313_v46 = vpop.permute.xlu1 %312 }
 0x185   : > { %v553_v47 = vpop.eup %552  ;;  %v315_v43 = vadd.f32 %v313_v46, %v855_v33  ;;  %v317_v33 = vsub.f32 1.0, %v304_v40 }
 0x186   : > { %200 = vrot.lane.b32.xlu0 %v553_v47, %s584_s11 }
 0x187   : > { %554 = vtanh.f32 %v315_v43 }
 0x18c   : > { %v206_v50 = vpop.permute.xlu1 %205 }
 0x18d   : > { %v555_v51 = vpop.eup %554  ;;  %v208_v61 = vmul.f32 %v206_v50, %v185_v63 }
 0x18e   : > { %374 = vrot.lane.b32.xlu0 %v372_v49, %s581_s10  ;;  %319 = vrot.lane.b32.xlu2 %v555_v51, %s584_s11 }
 0x194   : > { %v540_v53 = vpop.permute.xlu1 %539 }
 0x195   : > { %v542_v57 = vunpack.i.h.bf16 %v540_v53  ;;  %v541_v29 = vunpack.i.l.bf16 %v540_v53 }
 0x196   : > { %362 = vrot.lane.b32.xlu2 %v360_v62, %s581_s10 }
 0x1e8   : > { %v320_v54 = vpop.permute.xlu2 %319 }
 0x1e9   : > { %v322_v56 = vmul.f32 %v320_v54, %v317_v33 }
 0x1eb   : > { %v328_v58 = vadd.f32 %v327_v55, %v322_v56 }
 0x1ed   : > { %v347_v59 = vmul.f32 %v542_v57, %v328_v58 }
 0x1ef   : > { %349 = vrot.lane.b32.xlu2 %v347_v59, %s584_s11 }
 0x1f0   : > { %v363_v35 = vpop.permute.xlu2 %362 }
 0x1f8   : > { %v201_v60 = vpop.permute.xlu0 %200 }
 0x1f9   : > { %v203_v31 = vmul.f32 %v201_v60, %v198_v30 }
 0x1fb   : > { %v209_v32 = vadd.f32 %v208_v61, %v203_v31 }
 0x1fd   : > { %v334_v34 = vmul.f32 %v541_v29, %v209_v32 }
 0x1ff   : > { %336 = vrot.lane.b32.xlu1 %v334_v34, %s584_s11  ;;  %v365_v36 = vadd.f32 %v363_v35, %v334_v34 }
 0x200   : > { %v375_v37 = vpop.permute.xlu0 %374 }
 0x201   : > { %379 = vrot.lane.b32.xlu0 %v365_v36, %s584_s11  ;;  %v377_v38 = vadd.f32 %v375_v37, %v347_v59 }
 0x207   : > { %383 = vrot.lane.b32.xlu1 %v377_v38, %s584_s11 }
 0x249   : > { %v350_v63 = vpop.permute.xlu2 %349 }
 0x24a   : > { %353 = vst.msk [vmem:[%s352_s14] sm:$0x3] %vm340_vm12, %v350_v63 }
 0x271   : > { %v337_v40 = vpop.permute.xlu1 %336 }
 0x272   : > { %341 = vst.msk [vmem:[%s339_s17] sm:$0x3] %vm340_vm12, %v337_v40 }
 0x273   : > { %v380_v41 = vpop.permute.xlu0 %379  }
 0x274   : > { %v916_v29 = vmov %v380_v41  ;;  %387 = vst.msk [vmem:[%s910_s9] sm:$0x3] (%p68_p0), %vm340_vm12, %v380_v41 }
 0x276   :  { %70 = sbr.rel (!%p68_p0) target bundleno = 12 (0xc), region = 81 }
 0x279   : > { %v384_v42 = vpop.permute.xlu1 %383  }
 0x27a   : > { %v915_v30 = vmov %v384_v42  ;;  %494 = vst.msk [vmem:[%s910_s9 + $0x2] sm:$0x3] (%p68_p0), %vm340_vm12, %v384_v42 }

// kernel: encoder_forward.11
= control target key start
LH: loop header
LB: loop body
LE: loop exit
PB: predicated region body
PF: predicated region fallthrough
CT: control target
= control target key end

     0   :  { %15 = vsyncpa [#allocation3], 0  ;;  %s948_s0 = inlined_call_operand.vmem [shape: s32[2,1], index: 0, kind: input, shape index: {}]   ;;  %s949_s1 = inlined_call_operand.vmem [shape: f32[8,2,64], index: 1, kind: input, shape index: {}]   ;;  %s950_s2 = inlined_call_operand.vmem [shape: f32[2,2,32], index: 2, kind: input, shape index: {}]   ;;  %s951_s3 = inlined_call_operand.vmem [shape: bf16[2,64,96], index: 3, kind: input, shape index: {}]   ;;  %s952_s4 = inlined_call_operand.vmem [shape: bf16[2,32,96], index: 4, kind: input, shape index: {}]   ;;  %s953_s5 = inlined_call_operand.vmem [shape: f32[2,1,96], index: 5, kind: input, shape index: {}]   ;;  %s954_s6 = inlined_call_operand.vmem [shape: f32[2,1,96], index: 6, kind: input, shape index: {}]   ;;  %s955_s7 = inlined_call_operand.vmem [shape: f32[8,2,32], index: 7, kind: output, shape index: {0}]   ;;  %s956_s8 = inlined_call_operand.vmem [shape: f32[8,2,32], index: 8, kind: output, shape index: {1}]   ;;  %s957_s9 = inlined_call_operand.hbm [shape: f32[2,2,32], index: 9, kind: output, shape index: {2}]  }
   0x1   :  { %v684_v0 = vld [vmem:[%s948_s0] sm:$0x3]  ;;  %v694_v2 = vld [vmem:[%s951_s3] sm:$0xf0]  ;;  %v699_v3 = vld [vmem:[%s951_s3 + $0x8] sm:$0xf] }
   0x2   :  { %v689_v1 = vld [vmem:[%s951_s3] sm:$0xf]  ;;  %v704_v4 = vld [vmem:[%s951_s3 + $0x8] sm:$0xf0]  ;;  %v709_v5 = vld [vmem:[%s951_s3 + $0x10] sm:$0xf] }
   0x3   :  { %v714_v6 = vld [vmem:[%s951_s3 + $0x10] sm:$0xf0]  ;;  %v719_v7 = vld [vmem:[%s951_s3 + $0x18] sm:$0xf]  ;;  %v724_v8 = vld [vmem:[%s951_s3 + $0x18] sm:$0xf0] }
   0x4   :  { %v729_v9 = vld [vmem:[%s951_s3 + $0x20] sm:$0xf]  ;;  %v734_v10 = vld [vmem:[%s951_s3 + $0x20] sm:$0xf0]  ;;  %v739_v11 = vld [vmem:[%s951_s3 + $0x28] sm:$0xf] }
   0x5   :  { %v744_v12 = vld [vmem:[%s951_s3 + $0x28] sm:$0xf0]  ;;  %v749_v13 = vld [vmem:[%s951_s3 + $0x30] sm:$0xf]  ;;  %v754_v14 = vld [vmem:[%s951_s3 + $0x30] sm:$0xf0] }
   0x6   :  { %v759_v15 = vld [vmem:[%s951_s3 + $0x38] sm:$0xf]  ;;  %v764_v16 = vld [vmem:[%s951_s3 + $0x38] sm:$0xf0]  ;;  %v769_v17 = vld [vmem:[%s952_s4] sm:$0xf] }
   0x7   :  { %v774_v18 = vld [vmem:[%s952_s4] sm:$0xf0]  ;;  %v779_v19 = vld [vmem:[%s952_s4 + $0x8] sm:$0xf]  ;;  %v784_v20 = vld [vmem:[%s952_s4 + $0x8] sm:$0xf0] }
   0x8   :  { %v789_v21 = vld [vmem:[%s952_s4 + $0x10] sm:$0xf]  ;;  %v794_v22 = vld [vmem:[%s952_s4 + $0x10] sm:$0xf0]  ;;  %v799_v23 = vld [vmem:[%s952_s4 + $0x18] sm:$0xf] }
   0x9   :  { %v804_v24 = vld [vmem:[%s952_s4 + $0x18] sm:$0xf0]  ;;  %v809_v25 = vld [vmem:[%s953_s5] sm:$0x1]  ;;  %v814_v26 = vld [vmem:[%s953_s5 + $0x1] sm:$0x1] }
   0xa   :  { %v819_v27 = vld [vmem:[%s954_s6] sm:$0x1]  ;;  %v824_v28 = vld [vmem:[%s954_s6 + $0x1] sm:$0x1]  ;;  %v450_v30 = vld [vmem:[%s950_s2 + $0x2] sm:$0x3]  }
   0xb   :  { %v64_v29 = vld [vmem:[%s950_s2] sm:$0x3]   ;;  %s836_s5 = smov 0  }
   0xc LB: > { %v470_v31 = vor.u32 %v724_v8, %v719_v7  ;;  %v479_v32 = vor.u32 %v784_v20, %v779_v19  ;;  %v497_v33 = vor.u32 %v764_v16, %v759_v15  ;;  %v506_v34 = vor.u32 %v804_v24, %v799_v23  ;;  %s75_s2 = ssub.s32 7, %s621_s5  ;;  %s451_s6 = sshll.u32 %s621_s5, 1  ;;  %s621_s5 = sphi %s836_s5, %s72_s5   ;;  %v617_v29 = vphi %v64_v29, %v959_v29   ;;  %v613_v30 = vphi %v450_v30, %v958_v30  }
   0xd   : > { %v466_v35 = vor.u32 %v714_v6, %v709_v5  ;;  %v475_v36 = vor.u32 %v774_v18, %v769_v17  ;;  %v493_v37 = vor.u32 %v754_v14, %v749_v13  ;;  %v502_v38 = vor.u32 %v794_v22, %v789_v21  ;;  %s869_s24 = sshll.u32 %s75_s2, 1  ;;  %s77_s27 = scalar_lea.vmem %s949_s1, %s451_s6 }
   0xe   : > { %126 = vmatpush.bf16.msra.mxu0 %v470_v31  ;;  %161 = vmatpush.bf16.msra.mxu1 %v479_v32  ;;  %v135_v39 = vpack.c.bf16 %v617_v29, %v617_v29  ;;  %vm151_vm0 = vcmask 261120   ;;  %v462_v40 = vor.u32 %v704_v4, %v699_v3  ;;  %v255_v41 = vpack.c.bf16 %v613_v30, %v613_v30  ;;  %s80_s29 = scalar_lea.vmem %s949_s1, %s869_s24  ;;  %v78_v44 = vld [vmem:[%s77_s27] sm:$0x3]  ;;  %s623_s30 = smov 64  }
   0xf   : > { %246 = vmatpush.bf16.msra.mxu2 %v497_v33  ;;  %280 = vmatpush.bf16.msra.mxu3 %v506_v34  ;;  %v489_v42 = vor.u32 %v744_v12, %v739_v11  ;;  %v458_v43 = vor.u32 %v694_v2, %v689_v1  ;;  %v485_v45 = vor.u32 %v734_v10, %v729_v9  ;;  %v81_v46 = vld [vmem:[%s80_s29] sm:$0x3]  ;;  %vm118_vm1 = vcmask 523264   ;;  %s624_s10 = smov 32   ;;  %s627_s11 = smov 96  }
  0x10   : > { %v90_v47 = vpack.c.bf16 %v78_v44, %v78_v44  ;;  %v211_v48 = vpack.c.bf16 %v81_v46, %v81_v46  ;;  %v137_v49 = vperm.slane %v819_v27, 0  ;;  %v257_v52 = vperm.slane %v824_v28, 0  ;;  %s353_s14 = scalar_lea.vmem %s956_s8, %s869_s24  ;;  %s340_s17 = scalar_lea.vmem %s955_s7, %s451_s6 }
  0x11   : > { %v92_v61 = vperm.slane %v809_v25, 0  ;;  %v213_v31 = vperm.slane %v814_v26, 0  ;;  %v82_v44 = vstv %s621_s5  ;;  %v625_v46 = vmov 0   ;;  %s72_s5 = sadd.s32 1, %s621_s5  }
  0x12   : > { %127 = vmatpush.bf16.msra.mxu0 %v466_v35  ;;  %162 = vmatpush.bf16.msra.mxu1 %v475_v36  ;;  %vm83_vm2 = vcmp.lt.s32.totalorder %v82_v44, %v684_v0  ;;  %vm341_vm12 = vcmask 254976   ;;  %p69_p0 = scmp.ge.s32.totalorder %s72_s5, 8  }
  0x13   : > { %247 = vmatpush.bf16.msra.mxu2 %v493_v37  ;;  %281 = vmatpush.bf16.msra.mxu3 %v502_v38  ;;  %s401_s19 = sshll.u32 (%p69_p0), %s957_s9, 4  ;;  %s628_s20 = smov (%p69_p0), [#allocation2]   ;;  %s402_s19 = int_to_ptr.hbm [resolvable:$true] %s401_s19 }
  0x14   : > { %553 = vset.pattern.permute.xlu2 %v625_v46  ;;  %554 = vset.pattern.permute.xlu1 %v625_v46  ;;  %s399_s4 = sshll.u32 (%p69_p0), %s628_s20, 4  ;;  %s629_s21 = smov (%p69_p0), 32   ;;  %s400_s4 = int_to_ptr.vmem [resolvable:$true] %s399_s4 }
  0x15   : > { %480 = vmatmul.msk.bf16.vlgmr.msra.gmra.mxu1 %vm151_vm0, %v135_v39  ;;  %560 = vset.pattern.permute.xlu0 %v625_v46  ;;  %s630_s22 = smov (%p69_p0), 2  }
  0x16   : > { %128 = vmatpush.bf16.msra.mxu0 %v462_v40  ;;  %507 = vmatmul.msk.bf16.vlgmr.msra.gmra.mxu3 %vm151_vm0, %v255_v41 }
  0x17   : > { %248 = vmatpush.bf16.msra.mxu2 %v489_v42 }
  0x1a   : > { %129 = vmatpush.bf16.msra.mxu0 %v458_v43 }
  0x1b   : > { %249 = vmatpush.bf16.msra.mxu2 %v485_v45  ;;  %v86_v45 = vstv %s75_s2 }
  0x1c   : > { %vm87_vm3 = vcmp.lt.s32.totalorder %v86_v45, %v684_v0 }
  0x1d   : > { %471 = vmatmul.msk.bf16.vlgmr.msra.gmra.mxu0 %vm118_vm1, %v90_v47 }
  0x1e   : > { %498 = vmatmul.msk.bf16.vlgmr.msra.gmra.mxu2 %vm118_vm1, %v211_v48 }
  0x92   : > { %v164_v50 = vpop.f32.mrf.mxu1 }
  0x93   : > { %v165_v51 = vadd.f32 %v164_v50, %v137_v49  ;;  %v626_v49 = vmov 0.0  }
  0x94   : > { %v453_v50 = vsel %vm83_vm2, 1.0, %v626_v49 }
  0x95   : > { %189 = vrot.lane.b32.xlu0 %v165_v51, %s623_s30 }
  0x99   : > { %v283_v53 = vpop.f32.mrf.mxu3 }
  0x9a   : > { %v131_v54 = vpop.f32.mrf.mxu0  ;;  %v166_v55 = vpop.f32.mrf.mxu1  ;;  %v284_v56 = vadd.f32 %v283_v53, %v257_v52 }
  0x9b   : > { %v897_v62 = vadd.f32 %v131_v54, %v92_v61  ;;  %v454_v54 = vsel %vm87_vm3, 1.0, %v626_v49 }
  0x9d   : > { %308 = vrot.lane.b32.xlu0 %v284_v56, %s623_s30  ;;  %v168_v63 = vadd.f32 %v165_v51, %v897_v62  ;;  %v355_v51 = vsub.f32 1.0, %v453_v50 }
  0x9f   : > { %v481_v32 = vmul.f32 -1.442695, %v168_v63  ;;  %358 = vperm.xlu2 %553, %v355_v51  }
  0xa1   : > { %v251_v57 = vpop.f32.mrf.mxu2  ;;  %v285_v58 = vpop.f32.mrf.mxu3  ;;  %561 = vpow2.f32 %v481_v32 }
  0xa2   : > { %v133_v59 = vpop.f32.mrf.mxu0  ;;  %v901_v33 = vadd.f32 %v251_v57, %v213_v31  ;;  %v367_v57 = vsub.f32 1.0, %v454_v54 }
  0xa4   : > { %v287_v34 = vadd.f32 %v284_v56, %v901_v33 }
  0xa5   : > { %325 = vrot.lane.b32.xlu0 %v613_v30, %s624_s10 }
  0xa6   : > { %v508_v35 = vmul.f32 -1.442695, %v287_v34 }
  0xa7   : > { %v562_v36 = vpop.eup %561  ;;  %370 = vperm.xlu2 %553, %v367_v57  }
  0xa8   : > { %563 = vpow2.f32 %v508_v35  ;;  %v172_v37 = vadd.f32 1.0, %v562_v36 }
  0xa9   : > { %v253_v60 = vpop.f32.mrf.mxu2 }
  0xaa   : > { %565 = vrcp.f32 %v172_v37  ;;  %v184_v55 = vand.u32 2147483648, %v172_v37  ;;  %vm178_vm5 = vweird.f32 %v172_v37  ;;  %v182_v56 = vand.u32 2147483647, %v172_v37 }
  0xac   : > { %v185_v60 = vor.u32 1.1754944e-38, %v184_v55  ;;  %vm183_vm7 = vcmp.eq.f32.partialorder %v182_v56, 8.507059e+37 }
  0xae   : > { %v564_v38 = vpop.eup %563 }
  0xaf   : > { %v291_v39 = vadd.f32 1.0, %v564_v38 }
  0xb0   : > { %v566_v40 = vpop.eup %565 }
  0xb1   : > { %567 = vrcp.f32 %v291_v39  ;;  %v174_v41 = vmul.f32 %v566_v40, %v172_v37  ;;  %vm179_vm4 = vweird.f32 %v566_v40  ;;  %vm297_vm8 = vweird.f32 %v291_v39 }
  0xb2   : > { %vm180_vm6 = vmor %vm178_vm5, %vm179_vm4  ;;  %v303_v31 = vand.u32 2147483648, %v291_v39  ;;  %v301_v35 = vand.u32 2147483647, %v291_v39 }
  0xb3   : > { %v175_v42 = vsub.f32 1.0, %v174_v41 }
  0xb4   : > { %v304_v36 = vor.u32 1.1754944e-38, %v303_v31  ;;  %vm302_vm11 = vcmp.eq.f32.partialorder %v301_v35, 8.507059e+37 }
  0xb5   : > { %v176_v47 = vmul.f32 %v566_v40, %v175_v42  ;;  %v555_v42 = vpack.i.bf16 %v454_v54, %v453_v50 }
  0xb7   : > { %v568_v43 = vpop.eup %567  ;;  %v177_v52 = vadd.f32 %v566_v40, %v176_v47 }
  0xb8   : > { %v293_v48 = vmul.f32 %v568_v43, %v291_v39  ;;  %vm298_vm9 = vweird.f32 %v568_v43 }
  0xb9   : > { %v181_v58 = vsel %vm180_vm6, %v566_v40, %v177_v52  ;;  %vm299_vm10 = vmor %vm297_vm8, %vm298_vm9 }
  0xba   : > { %v294_v53 = vsub.f32 1.0, %v293_v48  ;;  %v186_v63 = vsel %vm183_vm7, %v185_v60, %v181_v58 }
  0xbc   : > { %v295_v59 = vmul.f32 %v568_v43, %v294_v53 }
  0xbe   : > { %v296_v34 = vadd.f32 %v568_v43, %v295_v59 }
  0xc0   : > { %v300_v37 = vsel %vm299_vm10, %v568_v43, %v296_v34 }
  0xc1   : > { %v305_v40 = vsel %vm302_vm11, %v304_v36, %v300_v37 }
  0xf9   : > { %v359_v39 = vpop.permute.xlu2 %358 }
 0x101   : > { %v371_v48 = vpop.permute.xlu2 %370 }
 0x102   : > { %v373_v49 = vmul.f32 %v613_v30, %v371_v48  ;;  %v199_v30 = vsub.f32 1.0, %v186_v63 }
 0x107   : > { %v190_v61 = vpop.permute.xlu0 %189 }
 0x108   : > { %v192_v32 = vmul.f32 %v190_v61, %v186_v63 }
 0x10a   : > { %194 = vrot.lane.b32.xlu1 %v192_v32, %s623_s30 }
 0x10f   : > { %v309_v38 = vpop.permute.xlu0 %308 }
 0x110   : > { %v311_v41 = vmul.f32 %v309_v38, %v305_v40 }
 0x112   : > { %313 = vrot.lane.b32.xlu1 %v311_v41, %s623_s30 }
 0x117   : > { %v326_v52 = vpop.permute.xlu0 %325 }
 0x118   : > { %v328_v55 = vmul.f32 %v326_v52, %v305_v40 }
 0x11a   : > { %206 = vrot.lane.b32.xlu1 %v617_v29, %s624_s10 }
 0x122   : > { %556 = vperm.xlu1 %554, %v555_v42  }
 0x17c   : > { %v195_v44 = vpop.permute.xlu1 %194 }
 0x17d   : > { %v197_v45 = vadd.f32 %v195_v44, %v897_v62  ;;  %v361_v62 = vmul.f32 %v617_v29, %v359_v39 }
 0x17f   : > { %569 = vtanh.f32 %v197_v45 }
 0x184   : > { %v314_v46 = vpop.permute.xlu1 %313 }
 0x185   : > { %v570_v47 = vpop.eup %569  ;;  %v316_v43 = vadd.f32 %v314_v46, %v901_v33  ;;  %v318_v33 = vsub.f32 1.0, %v305_v40 }
 0x186   : > { %201 = vrot.lane.b32.xlu0 %v570_v47, %s627_s11 }
 0x187   : > { %571 = vtanh.f32 %v316_v43 }
 0x18c   : > { %v207_v50 = vpop.permute.xlu1 %206 }
 0x18d   : > { %v572_v51 = vpop.eup %571  ;;  %v209_v61 = vmul.f32 %v207_v50, %v186_v63 }
 0x18e   : > { %375 = vrot.lane.b32.xlu0 %v373_v49, %s624_s10  ;;  %320 = vrot.lane.b32.xlu2 %v572_v51, %s627_s11 }
 0x194   : > { %v557_v53 = vpop.permute.xlu1 %556 }
 0x195   : > { %v559_v57 = vunpack.i.h.bf16 %v557_v53  ;;  %v558_v29 = vunpack.i.l.bf16 %v557_v53 }
 0x196   : > { %363 = vrot.lane.b32.xlu2 %v361_v62, %s624_s10 }
 0x1e8   : > { %v321_v54 = vpop.permute.xlu2 %320 }
 0x1e9   : > { %v323_v56 = vmul.f32 %v321_v54, %v318_v33 }
 0x1eb   : > { %v329_v58 = vadd.f32 %v328_v55, %v323_v56 }
 0x1ed   : > { %v348_v59 = vmul.f32 %v559_v57, %v329_v58 }
 0x1ef   : > { %350 = vrot.lane.b32.xlu2 %v348_v59, %s627_s11 }
 0x1f0   : > { %v364_v35 = vpop.permute.xlu2 %363 }
 0x1f8   : > { %v202_v60 = vpop.permute.xlu0 %201 }
 0x1f9   : > { %v204_v31 = vmul.f32 %v202_v60, %v199_v30 }
 0x1fb   : > { %v210_v32 = vadd.f32 %v209_v61, %v204_v31 }
 0x1fd   : > { %v335_v34 = vmul.f32 %v558_v29, %v210_v32 }
 0x1ff   : > { %337 = vrot.lane.b32.xlu1 %v335_v34, %s627_s11  ;;  %v366_v36 = vadd.f32 %v364_v35, %v335_v34 }
 0x200   : > { %v376_v37 = vpop.permute.xlu0 %375 }
 0x201   : > { %380 = vrot.lane.b32.xlu0 %v366_v36, %s627_s11  ;;  %v378_v38 = vadd.f32 %v376_v37, %v348_v59 }
 0x207   : > { %384 = vrot.lane.b32.xlu1 %v378_v38, %s627_s11 }
 0x249   : > { %v351_v63 = vpop.permute.xlu2 %350 }
 0x24a   : > { %354 = vst.msk [vmem:[%s353_s14] sm:$0x3] %vm341_vm12, %v351_v63 }
 0x271   : > { %v338_v40 = vpop.permute.xlu1 %337 }
 0x272   : > { %342 = vst.msk [vmem:[%s340_s17] sm:$0x3] %vm341_vm12, %v338_v40 }
 0x273   : > { %v381_v41 = vpop.permute.xlu0 %380  }
 0x274   : > { %v959_v29 = vmov %v381_v41  ;;  %388 = vst.msk [vmem:[#allocation2] sm:$0x3] (%p69_p0), %vm341_vm12, %v381_v41 }
 0x276   :  { %71 = sbr.rel (!%p69_p0) target bundleno = 12 (0xc), region = 81 }
 0x279   : > { %v385_v42 = vpop.permute.xlu1 %384  }
 0x27a   : > { %v958_v30 = vmov %v385_v42  ;;  %390 = vst.msk [vmem:[#allocation2 + $0x2] sm:$0x3] (%p69_p0), %vm341_vm12, %v385_v42 }
 0x27b   :  { %407 = dma.vmem_to_hbm [thread:$0]  %s400_s4, 64, %s402_s19, [#allocation3], %s629_s21, %s629_s21, %s630_s22  }
 0x27c   :  { %609 = dma.done.wait [#allocation3], 64  }
 0x27d   :  { %610 = vsyncadd [#allocation3], 4294967232 }
 0x27e   :  { %416 = vsyncpa [#allocation3], 1 }

// kernel: encoder_forward.10
= control target key start
LH: loop header
LB: loop body
LE: loop exit
PB: predicated region body
PF: predicated region fallthrough
CT: control target
= control target key end

     0   :  { %15 = vsyncpa [#allocation3], 0  ;;  %s792_s0 = inlined_call_operand.vmem [shape: s32[2,1], index: 0, kind: input, shape index: {}]   ;;  %s793_s1 = inlined_call_operand.vmem [shape: f32[8,2,16], index: 1, kind: input, shape index: {}]   ;;  %s794_s2 = inlined_call_operand.vmem [shape: f32[2,2,32], index: 2, kind: input, shape index: {}]   ;;  %s795_s3 = inlined_call_operand.vmem [shape: bf16[2,16,96], index: 3, kind: input, shape index: {}]   ;;  %s796_s4 = inlined_call_operand.vmem [shape: bf16[2,32,96], index: 4, kind: input, shape index: {}]   ;;  %s797_s5 = inlined_call_operand.vmem [shape: f32[2,1,96], index: 5, kind: input, shape index: {}]   ;;  %s798_s6 = inlined_call_operand.vmem [shape: f32[2,1,96], index: 6, kind: input, shape index: {}]   ;;  %s799_s7 = inlined_call_operand.vmem [shape: f32[8,2,32], index: 7, kind: output, shape index: {0}]   ;;  %s800_s8 = inlined_call_operand.vmem [shape: f32[8,2,32], index: 8, kind: output, shape index: {1}]   ;;  %s801_s9 = inlined_call_operand.hbm [shape: f32[2,2,32], index: 9, kind: output, shape index: {2}]  }
   0x1   :  { %v600_v0 = vld [vmem:[%s792_s0] sm:$0x3]  ;;  %v610_v2 = vld [vmem:[%s795_s3] sm:$0xf0]  ;;  %v615_v3 = vld [vmem:[%s795_s3 + $0x8] sm:$0xf] }
   0x2   :  { %v605_v1 = vld [vmem:[%s795_s3] sm:$0xf]  ;;  %v620_v4 = vld [vmem:[%s795_s3 + $0x8] sm:$0xf0]  ;;  %v630_v6 = vld [vmem:[%s796_s4] sm:$0xf0] }
   0x3   :  { %v625_v5 = vld [vmem:[%s796_s4] sm:$0xf]  ;;  %v635_v7 = vld [vmem:[%s796_s4 + $0x8] sm:$0xf]  ;;  %v640_v8 = vld [vmem:[%s796_s4 + $0x8] sm:$0xf0] }
   0x4   :  { %v645_v9 = vld [vmem:[%s796_s4 + $0x10] sm:$0xf]  ;;  %v650_v10 = vld [vmem:[%s796_s4 + $0x10] sm:$0xf0]  ;;  %v655_v11 = vld [vmem:[%s796_s4 + $0x18] sm:$0xf] }
   0x5   :  { %v660_v12 = vld [vmem:[%s796_s4 + $0x18] sm:$0xf0]  ;;  %v665_v13 = vld [vmem:[%s797_s5] sm:$0x1]  ;;  %v670_v14 = vld [vmem:[%s797_s5 + $0x1] sm:$0x1] }
   0x6   :  { %v675_v15 = vld [vmem:[%s798_s6] sm:$0x1]  ;;  %v680_v16 = vld [vmem:[%s798_s6 + $0x1] sm:$0x1]  ;;  %v396_v18 = vld [vmem:[%s794_s2 + $0x2] sm:$0x3]  }
   0x7   :  { %v52_v17 = vld [vmem:[%s794_s2] sm:$0x3]   ;;  %s692_s5 = smov 0  }
   0x8 LB: > { %v413_v19 = vor.u32 %v640_v8, %v635_v7  ;;  %v428_v20 = vor.u32 %v660_v12, %v655_v11  ;;  %v404_v21 = vor.u32 %v610_v2, %v605_v1  ;;  %v409_v22 = vor.u32 %v630_v6, %v625_v5  ;;  %s397_s2 = sshll.u32 %s537_s5, 1  ;;  %s63_s6 = ssub.s32 7, %s537_s5  ;;  %s537_s5 = sphi %s692_s5, %s60_s5   ;;  %v533_v17 = vphi %v52_v17, %v803_v17   ;;  %v529_v18 = vphi %v396_v18, %v802_v18  }
   0x9   : > { %v424_v23 = vor.u32 %v650_v10, %v645_v9  ;;  %v419_v24 = vor.u32 %v620_v4, %v615_v3  ;;  %s65_s24 = scalar_lea.vmem %s793_s1, %s397_s2  ;;  %s724_s25 = sshll.u32 %s63_s6, 1  ;;  %vm88_vm0 = vcmask 130048   ;;  %v105_v27 = vpack.c.bf16 %v533_v17, %v533_v17 }
   0xa   : > { %131 = vmatpush.bf16.msra.mxu1 %v413_v19  ;;  %232 = vmatpush.bf16.msra.mxu3 %v428_v20  ;;  %v66_v25 = vld [vmem:[%s65_s24] sm:$0x3]  ;;  %s68_s27 = scalar_lea.vmem %s793_s1, %s724_s25  ;;  %v207_v28 = vpack.c.bf16 %v529_v18, %v529_v18  ;;  %vm121_vm1 = vcmask 261120   ;;  %v107_v31 = vperm.slane %v675_v15, 0  ;;  %s539_s28 = smov 64   ;;  %v209_v35 = vperm.slane %v680_v16, 0 }
   0xb   : > { %99 = vmatpush.bf16.msra.mxu0 %v404_v21  ;;  %201 = vmatpush.bf16.msra.mxu2 %v419_v24  ;;  %v78_v26 = vpack.c.bf16 %v66_v25, %v66_v25  ;;  %v69_v29 = vld [vmem:[%s68_s27] sm:$0x3]  ;;  %s540_s29 = smov 32   ;;  %v80_v43 = vperm.slane %v665_v13, 0  ;;  %v183_v46 = vperm.slane %v670_v14, 0  ;;  %v70_v59 = vstv %s537_s5  ;;  %s543_s30 = smov 96  }
   0xc   : > { %v181_v30 = vpack.c.bf16 %v69_v29, %v69_v29  ;;  %v74_v60 = vstv %s63_s6  ;;  %v541_v61 = vmov 0   ;;  %vm71_vm2 = vcmp.lt.s32.totalorder %v70_v59, %v600_v0  ;;  %s305_s12 = scalar_lea.vmem %s800_s8, %s724_s25  ;;  %s292_s15 = scalar_lea.vmem %s799_s7, %s397_s2 }
   0xd   : > { %469 = vset.pattern.permute.xlu2 %v541_v61  ;;  %470 = vset.pattern.permute.xlu1 %v541_v61  ;;  %v542_v19 = vmov 0.0   ;;  %vm75_vm3 = vcmp.lt.s32.totalorder %v74_v60, %v600_v0  ;;  %vm293_vm12 = vcmask 254976   ;;  %s60_s5 = sadd.s32 1, %s537_s5  }
   0xe   : > { %132 = vmatpush.bf16.msra.mxu1 %v409_v22  ;;  %233 = vmatpush.bf16.msra.mxu3 %v424_v23  ;;  %v399_v20 = vsel %vm71_vm2, 1.0, %v542_v19  ;;  %v400_v24 = vsel %vm75_vm3, 1.0, %v542_v19  ;;  %p57_p0 = scmp.ge.s32.totalorder %s60_s5, 8  }
   0xf   : > { %405 = vmatmul.msk.bf16.vlgmr.msra.gmra.mxu0 %vm88_vm0, %v78_v26  ;;  %420 = vmatmul.msk.bf16.vlgmr.msra.gmra.mxu2 %vm88_vm0, %v181_v30  ;;  %v307_v21 = vsub.f32 1.0, %v399_v20  ;;  %s353_s18 = sshll.u32 (%p57_p0), %s801_s9, 4  ;;  %s544_s0 = smov (%p57_p0), [#allocation2]   ;;  %s354_s18 = int_to_ptr.hbm [resolvable:$true] %s353_s18 }
  0x10   : > { %476 = vset.pattern.permute.xlu0 %v541_v61  ;;  %s351_s4 = sshll.u32 (%p57_p0), %s544_s0, 4  ;;  %s545_s19 = smov (%p57_p0), 32   ;;  %s352_s4 = int_to_ptr.vmem [resolvable:$true] %s351_s4 }
  0x11   : > { %414 = vmatmul.msk.bf16.vlgmr.msra.gmra.mxu1 %vm121_vm1, %v105_v27  ;;  %429 = vmatmul.msk.bf16.vlgmr.msra.gmra.mxu3 %vm121_vm1, %v207_v28  ;;  %v319_v27 = vsub.f32 1.0, %v400_v24  ;;  %s546_s20 = smov (%p57_p0), 2  }
  0x12   : > { %310 = vperm.xlu2 %469, %v307_v21  }
  0x1a   : > { %322 = vperm.xlu2 %469, %v319_v27  }
  0x8c   : > { %v101_v32 = vpop.f32.mrf.mxu0 }
  0x8d   : > { %v741_v44 = vadd.f32 %v101_v32, %v80_v43 }
  0x8e   : > { %v134_v33 = vpop.f32.mrf.mxu1 }
  0x8f   : > { %v135_v34 = vadd.f32 %v134_v33, %v107_v31 }
  0x91   : > { %159 = vrot.lane.b32.xlu0 %v135_v34, %s539_s28  ;;  %v138_v45 = vadd.f32 %v135_v34, %v741_v44 }
  0x92   : > { %v203_v36 = vpop.f32.mrf.mxu2 }
  0x93   : > { %v415_v47 = vmul.f32 -1.442695, %v138_v45  ;;  %v745_v48 = vadd.f32 %v203_v36, %v183_v46  ;;  %v311_v46 = vpop.permute.xlu2 %310 }
  0x94   : > { %v235_v37 = vpop.f32.mrf.mxu3  ;;  %v103_v38 = vpop.f32.mrf.mxu0 }
  0x95   : > { %v236_v39 = vadd.f32 %v235_v37, %v209_v35  ;;  %477 = vpow2.f32 %v415_v47 }
  0x96   : > { %v136_v40 = vpop.f32.mrf.mxu1 }
  0x97   : > { %v239_v49 = vadd.f32 %v236_v39, %v745_v48 }
  0x99   : > { %260 = vrot.lane.b32.xlu0 %v236_v39, %s539_s28  ;;  %v430_v50 = vmul.f32 -1.442695, %v239_v49 }
  0x9a   : > { %v205_v41 = vpop.f32.mrf.mxu2 }
  0x9b   : > { %v478_v51 = vpop.eup %477  ;;  %479 = vpow2.f32 %v430_v50 }
  0x9c   : > { %v237_v42 = vpop.f32.mrf.mxu3  ;;  %v142_v52 = vadd.f32 1.0, %v478_v51  ;;  %v323_v51 = vpop.permute.xlu2 %322 }
  0x9d   : > { %v471_v42 = vpack.i.bf16 %v400_v24, %v399_v20 }
  0x9e   : > { %481 = vrcp.f32 %v142_v52  ;;  %v154_v25 = vand.u32 2147483648, %v142_v52  ;;  %vm148_vm5 = vweird.f32 %v142_v52  ;;  %v152_v26 = vand.u32 2147483647, %v142_v52 }
  0xa0   : > { %v155_v30 = vor.u32 1.1754944e-38, %v154_v25  ;;  %vm153_vm7 = vcmp.eq.f32.partialorder %v152_v26, 8.507059e+37 }
  0xa1   : > { %277 = vrot.lane.b32.xlu0 %v529_v18, %s540_s29  ;;  %v480_v53 = vpop.eup %479 }
  0xa2   : > { %v243_v54 = vadd.f32 1.0, %v480_v53 }
  0xa4   : > { %v482_v55 = vpop.eup %481  ;;  %483 = vrcp.f32 %v243_v54  ;;  %vm249_vm8 = vweird.f32 %v243_v54  ;;  %v255_v33 = vand.u32 2147483648, %v243_v54  ;;  %v253_v36 = vand.u32 2147483647, %v243_v54 }
  0xa5   : > { %v144_v56 = vmul.f32 %v482_v55, %v142_v52  ;;  %vm149_vm4 = vweird.f32 %v482_v55  ;;  %v325_v52 = vmul.f32 %v529_v18, %v323_v51 }
  0xa6   : > { %vm150_vm6 = vmor %vm148_vm5, %vm149_vm4  ;;  %v256_v37 = vor.u32 1.1754944e-38, %v255_v33  ;;  %vm254_vm11 = vcmp.eq.f32.partialorder %v253_v36, 8.507059e+37 }
  0xa7   : > { %v145_v57 = vsub.f32 1.0, %v144_v56 }
  0xa9   : > { %v146_v62 = vmul.f32 %v482_v55, %v145_v57 }
  0xaa   : > { %v484_v58 = vpop.eup %483 }
  0xab   : > { %v245_v63 = vmul.f32 %v484_v58, %v243_v54  ;;  %v147_v22 = vadd.f32 %v482_v55, %v146_v62  ;;  %vm250_vm9 = vweird.f32 %v484_v58 }
  0xac   : > { %vm251_vm10 = vmor %vm249_vm8, %vm250_vm9 }
  0xad   : > { %v246_v23 = vsub.f32 1.0, %v245_v63  ;;  %v151_v28 = vsel %vm150_vm6, %v482_v55, %v147_v22 }
  0xae   : > { %v156_v32 = vsel %vm153_vm7, %v155_v30, %v151_v28 }
  0xaf   : > { %v247_v29 = vmul.f32 %v484_v58, %v246_v23  ;;  %v169_v18 = vsub.f32 1.0, %v156_v32 }
  0xb1   : > { %v248_v35 = vadd.f32 %v484_v58, %v247_v29 }
  0xb3   : > { %v252_v38 = vsel %vm251_vm10, %v484_v58, %v248_v35 }
  0xb4   : > { %v257_v40 = vsel %vm254_vm11, %v256_v37, %v252_v38 }
 0x103   : > { %v160_v31 = vpop.permute.xlu0 %159 }
 0x104   : > { %v162_v34 = vmul.f32 %v160_v31, %v156_v32 }
 0x106   : > { %164 = vrot.lane.b32.xlu1 %v162_v34, %s539_s28 }
 0x10b   : > { %v261_v39 = vpop.permute.xlu0 %260 }
 0x10c   : > { %v263_v41 = vmul.f32 %v261_v39, %v257_v40 }
 0x10e   : > { %265 = vrot.lane.b32.xlu1 %v263_v41, %s539_s28 }
 0x113   : > { %v278_v55 = vpop.permute.xlu0 %277 }
 0x114   : > { %v280_v58 = vmul.f32 %v278_v55, %v257_v40 }
 0x116   : > { %176 = vrot.lane.b32.xlu1 %v533_v17, %s540_s29 }
 0x11e   : > { %472 = vperm.xlu1 %470, %v471_v42  }
 0x178   : > { %v165_v43 = vpop.permute.xlu1 %164 }
 0x179   : > { %v167_v45 = vadd.f32 %v165_v43, %v741_v44  ;;  %v313_v44 = vmul.f32 %v533_v17, %v311_v46 }
 0x17b   : > { %485 = vtanh.f32 %v167_v45 }
 0x180   : > { %v266_v47 = vpop.permute.xlu1 %265 }
 0x181   : > { %v486_v49 = vpop.eup %485  ;;  %v268_v50 = vadd.f32 %v266_v47, %v745_v48  ;;  %v270_v48 = vsub.f32 1.0, %v257_v40 }
 0x182   : > { %171 = vrot.lane.b32.xlu0 %v486_v49, %s543_s30 }
 0x183   : > { %487 = vtanh.f32 %v268_v50 }
 0x188   : > { %v177_v54 = vpop.permute.xlu1 %176 }
 0x189   : > { %v488_v53 = vpop.eup %487  ;;  %v179_v19 = vmul.f32 %v177_v54, %v156_v32 }
 0x18a   : > { %327 = vrot.lane.b32.xlu0 %v325_v52, %s540_s29  ;;  %272 = vrot.lane.b32.xlu2 %v488_v53, %s543_s30 }
 0x190   : > { %v473_v56 = vpop.permute.xlu1 %472 }
 0x191   : > { %v475_v60 = vunpack.i.h.bf16 %v473_v56  ;;  %v474_v17 = vunpack.i.l.bf16 %v473_v56 }
 0x192   : > { %315 = vrot.lane.b32.xlu2 %v313_v44, %s540_s29 }
 0x1e4   : > { %v273_v57 = vpop.permute.xlu2 %272 }
 0x1e5   : > { %v275_v59 = vmul.f32 %v273_v57, %v270_v48 }
 0x1e7   : > { %v281_v61 = vadd.f32 %v280_v58, %v275_v59 }
 0x1e9   : > { %v300_v62 = vmul.f32 %v475_v60, %v281_v61 }
 0x1eb   : > { %302 = vrot.lane.b32.xlu2 %v300_v62, %s543_s30 }
 0x1ec   : > { %v316_v23 = vpop.permute.xlu2 %315 }
 0x1f4   : > { %v172_v63 = vpop.permute.xlu0 %171 }
 0x1f5   : > { %v174_v20 = vmul.f32 %v172_v63, %v169_v18 }
 0x1f7   : > { %v180_v21 = vadd.f32 %v179_v19, %v174_v20 }
 0x1f9   : > { %v287_v22 = vmul.f32 %v474_v17, %v180_v21 }
 0x1fb   : > { %289 = vrot.lane.b32.xlu1 %v287_v22, %s543_s30  ;;  %v318_v24 = vadd.f32 %v316_v23, %v287_v22 }
 0x1fc   : > { %v328_v25 = vpop.permute.xlu0 %327 }
 0x1fd   : > { %332 = vrot.lane.b32.xlu0 %v318_v24, %s543_s30  ;;  %v330_v26 = vadd.f32 %v328_v25, %v300_v62 }
 0x203   : > { %336 = vrot.lane.b32.xlu1 %v330_v26, %s543_s30 }
 0x245   : > { %v303_v27 = vpop.permute.xlu2 %302 }
 0x246   : > { %306 = vst.msk [vmem:[%s305_s12] sm:$0x3] %vm293_vm12, %v303_v27 }
 0x26d   : > { %v290_v28 = vpop.permute.xlu1 %289 }
 0x26e   : > { %294 = vst.msk [vmem:[%s292_s15] sm:$0x3] %vm293_vm12, %v290_v28 }
 0x26f   : > { %v333_v29 = vpop.permute.xlu0 %332  }
 0x270   : > { %v803_v17 = vmov %v333_v29  ;;  %340 = vst.msk [vmem:[#allocation2] sm:$0x3] (%p57_p0), %vm293_vm12, %v333_v29 }
 0x272   :  { %59 = sbr.rel (!%p57_p0) target bundleno = 8 (0x8), region = 81 }
 0x275   : > { %v337_v30 = vpop.permute.xlu1 %336  }
 0x276   : > { %v802_v18 = vmov %v337_v30  ;;  %342 = vst.msk [vmem:[#allocation2 + $0x2] sm:$0x3] (%p57_p0), %vm293_vm12, %v337_v30 }
 0x277   :  { %359 = dma.vmem_to_hbm [thread:$0]  %s352_s4, 64, %s354_s18, [#allocation3], %s545_s19, %s545_s19, %s546_s20  }
 0x278   :  { %525 = dma.done.wait [#allocation3], 64  }
 0x279   :  { %526 = vsyncadd [#allocation3], 4294967232 }
 0x27a   :  { %368 = vsyncpa [#allocation3], 1 }

// kernel: encoder_forward.8
= control target key start
LH: loop header
LB: loop body
LE: loop exit
PB: predicated region body
PF: predicated region fallthrough
CT: control target
= control target key end

     0   :  { %s749_s0 = inlined_call_operand.vmem [shape: s32[2,1], index: 0, kind: input, shape index: {}]   ;;  %s750_s1 = inlined_call_operand.vmem [shape: f32[8,2,16], index: 1, kind: input, shape index: {}]   ;;  %s751_s3 = inlined_call_operand.vmem [shape: bf16[2,16,96], index: 3, kind: input, shape index: {}]   ;;  %s752_s4 = inlined_call_operand.vmem [shape: bf16[2,32,96], index: 4, kind: input, shape index: {}]   ;;  %s753_s7 = inlined_call_operand.vmem [shape: f32[8,2,32], index: 7, kind: output, shape index: {0}]   ;;  %s754_s8 = inlined_call_operand.vmem [shape: f32[8,2,32], index: 8, kind: output, shape index: {1}]   ;;  %s755_s9 = inlined_call_operand.vmem [shape: f32[2,2,32], index: 9, kind: output, shape index: {2}]   ;;  %s756_s5 = inlined_call_operand.vmem [shape: f32[2,1,96], index: 5, kind: input, shape index: {}]   ;;  %s757_s2 = inlined_call_operand.vmem [shape: f32[2,2,32], index: 2, kind: input, shape index: {}]   ;;  %s758_s6 = inlined_call_operand.vmem [shape: f32[2,1,96], index: 6, kind: input, shape index: {}]  }
   0x1   :  { %v554_v0 = vld [vmem:[%s749_s0] sm:$0x3]  ;;  %v564_v2 = vld [vmem:[%s751_s3] sm:$0xf0]  ;;  %v569_v3 = vld [vmem:[%s751_s3 + $0x8] sm:$0xf] }
   0x2   :  { %v559_v1 = vld [vmem:[%s751_s3] sm:$0xf]  ;;  %v574_v4 = vld [vmem:[%s751_s3 + $0x8] sm:$0xf0]  ;;  %v584_v6 = vld [vmem:[%s752_s4] sm:$0xf0] }
   0x3   :  { %v579_v5 = vld [vmem:[%s752_s4] sm:$0xf]  ;;  %v589_v7 = vld [vmem:[%s752_s4 + $0x8] sm:$0xf]  ;;  %v594_v8 = vld [vmem:[%s752_s4 + $0x8] sm:$0xf0] }
   0x4   :  { %v599_v9 = vld [vmem:[%s752_s4 + $0x10] sm:$0xf]  ;;  %v604_v10 = vld [vmem:[%s752_s4 + $0x10] sm:$0xf0]  ;;  %v609_v11 = vld [vmem:[%s752_s4 + $0x18] sm:$0xf] }
   0x5   :  { %v614_v12 = vld [vmem:[%s752_s4 + $0x18] sm:$0xf0]  ;;  %v619_v13 = vld [vmem:[%s756_s5] sm:$0x1]  ;;  %v624_v14 = vld [vmem:[%s756_s5 + $0x1] sm:$0x1] }
   0x6   :  { %v629_v15 = vld [vmem:[%s758_s6] sm:$0x1]  ;;  %v634_v16 = vld [vmem:[%s758_s6 + $0x1] sm:$0x1]  ;;  %v381_v18 = vld [vmem:[%s757_s2 + $0x2] sm:$0x3]  }
   0x7   :  { %v51_v17 = vld [vmem:[%s757_s2] sm:$0x3]   ;;  %s646_s5 = smov 0  }
   0x8 LB: > { %v398_v19 = vor.u32 %v594_v8, %v589_v7  ;;  %v413_v20 = vor.u32 %v614_v12, %v609_v11  ;;  %v389_v21 = vor.u32 %v564_v2, %v559_v1  ;;  %v394_v22 = vor.u32 %v584_v6, %v579_v5  ;;  %s382_s2 = sshll.u32 %s494_s5, 1  ;;  %s62_s6 = ssub.s32 7, %s494_s5  ;;  %s494_s5 = sphi %s646_s5, %s59_s5   ;;  %v490_v17 = vphi %v51_v17, %v760_v17   ;;  %v486_v18 = vphi %v381_v18, %v759_v18  }
   0x9   : > { %v409_v23 = vor.u32 %v604_v10, %v599_v9  ;;  %v404_v24 = vor.u32 %v574_v4, %v569_v3  ;;  %s64_s24 = scalar_lea.vmem %s750_s1, %s382_s2  ;;  %s678_s25 = sshll.u32 %s62_s6, 1  ;;  %vm87_vm0 = vcmask 130048   ;;  %v104_v27 = vpack.c.bf16 %v490_v17, %v490_v17 }
   0xa   : > { %130 = vmatpush.bf16.msra.mxu1 %v398_v19  ;;  %231 = vmatpush.bf16.msra.mxu3 %v413_v20  ;;  %v65_v25 = vld [vmem:[%s64_s24] sm:$0x3]  ;;  %s67_s27 = scalar_lea.vmem %s750_s1, %s678_s25  ;;  %v206_v28 = vpack.c.bf16 %v486_v18, %v486_v18  ;;  %vm120_vm1 = vcmask 261120   ;;  %v106_v31 = vperm.slane %v629_v15, 0  ;;  %s496_s28 = smov 64   ;;  %v208_v35 = vperm.slane %v634_v16, 0 }
   0xb   : > { %98 = vmatpush.bf16.msra.mxu0 %v389_v21  ;;  %200 = vmatpush.bf16.msra.mxu2 %v404_v24  ;;  %v77_v26 = vpack.c.bf16 %v65_v25, %v65_v25  ;;  %v68_v29 = vld [vmem:[%s67_s27] sm:$0x3]  ;;  %s497_s29 = smov 32   ;;  %v79_v43 = vperm.slane %v619_v13, 0  ;;  %v182_v46 = vperm.slane %v624_v14, 0  ;;  %v69_v59 = vstv %s494_s5  ;;  %s500_s30 = smov 96  }
   0xc   : > { %v180_v30 = vpack.c.bf16 %v68_v29, %v68_v29  ;;  %v73_v60 = vstv %s62_s6  ;;  %v498_v61 = vmov 0   ;;  %vm70_vm2 = vcmp.lt.s32.totalorder %v69_v59, %v554_v0  ;;  %s304_s12 = scalar_lea.vmem %s754_s8, %s678_s25  ;;  %s291_s15 = scalar_lea.vmem %s753_s7, %s382_s2 }
   0xd   : > { %452 = vset.pattern.permute.xlu2 %v498_v61  ;;  %453 = vset.pattern.permute.xlu1 %v498_v61  ;;  %v499_v19 = vmov 0.0   ;;  %vm74_vm3 = vcmp.lt.s32.totalorder %v73_v60, %v554_v0  ;;  %vm292_vm12 = vcmask 254976   ;;  %s59_s5 = sadd.s32 1, %s494_s5  }
   0xe   : > { %131 = vmatpush.bf16.msra.mxu1 %v394_v22  ;;  %232 = vmatpush.bf16.msra.mxu3 %v409_v23  ;;  %v384_v20 = vsel %vm70_vm2, 1.0, %v499_v19  ;;  %v385_v24 = vsel %vm74_vm3, 1.0, %v499_v19  ;;  %p56_p0 = scmp.ge.s32.totalorder %s59_s5, 8  }
   0xf   : > { %390 = vmatmul.msk.bf16.vlgmr.msra.gmra.mxu0 %vm87_vm0, %v77_v26  ;;  %405 = vmatmul.msk.bf16.vlgmr.msra.gmra.mxu2 %vm87_vm0, %v180_v30  ;;  %v306_v21 = vsub.f32 1.0, %v384_v20 }
  0x10   : > { %459 = vset.pattern.permute.xlu0 %v498_v61 }
  0x11   : > { %399 = vmatmul.msk.bf16.vlgmr.msra.gmra.mxu1 %vm120_vm1, %v104_v27  ;;  %414 = vmatmul.msk.bf16.vlgmr.msra.gmra.mxu3 %vm120_vm1, %v206_v28  ;;  %v318_v27 = vsub.f32 1.0, %v385_v24 }
  0x12   : > { %309 = vperm.xlu2 %452, %v306_v21  }
  0x1a   : > { %321 = vperm.xlu2 %452, %v318_v27  }
  0x8c   : > { %v100_v32 = vpop.f32.mrf.mxu0 }
  0x8d   : > { %v695_v44 = vadd.f32 %v100_v32, %v79_v43 }
  0x8e   : > { %v133_v33 = vpop.f32.mrf.mxu1 }
  0x8f   : > { %v134_v34 = vadd.f32 %v133_v33, %v106_v31 }
  0x91   : > { %158 = vrot.lane.b32.xlu0 %v134_v34, %s496_s28  ;;  %v137_v45 = vadd.f32 %v134_v34, %v695_v44 }
  0x92   : > { %v202_v36 = vpop.f32.mrf.mxu2 }
  0x93   : > { %v400_v47 = vmul.f32 -1.442695, %v137_v45  ;;  %v699_v48 = vadd.f32 %v202_v36, %v182_v46  ;;  %v310_v46 = vpop.permute.xlu2 %309 }
  0x94   : > { %v234_v37 = vpop.f32.mrf.mxu3  ;;  %v102_v38 = vpop.f32.mrf.mxu0 }
  0x95   : > { %v235_v39 = vadd.f32 %v234_v37, %v208_v35  ;;  %460 = vpow2.f32 %v400_v47 }
  0x96   : > { %v135_v40 = vpop.f32.mrf.mxu1 }
  0x97   : > { %v238_v49 = vadd.f32 %v235_v39, %v699_v48 }
  0x99   : > { %259 = vrot.lane.b32.xlu0 %v235_v39, %s496_s28  ;;  %v415_v50 = vmul.f32 -1.442695, %v238_v49 }
  0x9a   : > { %v204_v41 = vpop.f32.mrf.mxu2 }
  0x9b   : > { %v461_v51 = vpop.eup %460  ;;  %462 = vpow2.f32 %v415_v50 }
  0x9c   : > { %v236_v42 = vpop.f32.mrf.mxu3  ;;  %v141_v52 = vadd.f32 1.0, %v461_v51  ;;  %v322_v51 = vpop.permute.xlu2 %321 }
  0x9d   : > { %v454_v42 = vpack.i.bf16 %v385_v24, %v384_v20 }
  0x9e   : > { %464 = vrcp.f32 %v141_v52  ;;  %v153_v25 = vand.u32 2147483648, %v141_v52  ;;  %vm147_vm5 = vweird.f32 %v141_v52  ;;  %v151_v26 = vand.u32 2147483647, %v141_v52 }
  0xa0   : > { %v154_v30 = vor.u32 1.1754944e-38, %v153_v25  ;;  %vm152_vm7 = vcmp.eq.f32.partialorder %v151_v26, 8.507059e+37 }
  0xa1   : > { %276 = vrot.lane.b32.xlu0 %v486_v18, %s497_s29  ;;  %v463_v53 = vpop.eup %462 }
  0xa2   : > { %v242_v54 = vadd.f32 1.0, %v463_v53 }
  0xa4   : > { %v465_v55 = vpop.eup %464  ;;  %466 = vrcp.f32 %v242_v54  ;;  %vm248_vm8 = vweird.f32 %v242_v54  ;;  %v254_v33 = vand.u32 2147483648, %v242_v54  ;;  %v252_v36 = vand.u32 2147483647, %v242_v54 }
  0xa5   : > { %v143_v56 = vmul.f32 %v465_v55, %v141_v52  ;;  %vm148_vm4 = vweird.f32 %v465_v55  ;;  %v324_v52 = vmul.f32 %v486_v18, %v322_v51 }
  0xa6   : > { %vm149_vm6 = vmor %vm147_vm5, %vm148_vm4  ;;  %v255_v37 = vor.u32 1.1754944e-38, %v254_v33  ;;  %vm253_vm11 = vcmp.eq.f32.partialorder %v252_v36, 8.507059e+37 }
  0xa7   : > { %v144_v57 = vsub.f32 1.0, %v143_v56 }
  0xa9   : > { %v145_v62 = vmul.f32 %v465_v55, %v144_v57 }
  0xaa   : > { %v467_v58 = vpop.eup %466 }
  0xab   : > { %v244_v63 = vmul.f32 %v467_v58, %v242_v54  ;;  %v146_v22 = vadd.f32 %v465_v55, %v145_v62  ;;  %vm249_vm9 = vweird.f32 %v467_v58 }
  0xac   : > { %vm250_vm10 = vmor %vm248_vm8, %vm249_vm9 }
  0xad   : > { %v245_v23 = vsub.f32 1.0, %v244_v63  ;;  %v150_v28 = vsel %vm149_vm6, %v465_v55, %v146_v22 }
  0xae   : > { %v155_v32 = vsel %vm152_vm7, %v154_v30, %v150_v28 }
  0xaf   : > { %v246_v29 = vmul.f32 %v467_v58, %v245_v23  ;;  %v168_v18 = vsub.f32 1.0, %v155_v32 }
  0xb1   : > { %v247_v35 = vadd.f32 %v467_v58, %v246_v29 }
  0xb3   : > { %v251_v38 = vsel %vm250_vm10, %v467_v58, %v247_v35 }
  0xb4   : > { %v256_v40 = vsel %vm253_vm11, %v255_v37, %v251_v38 }
 0x103   : > { %v159_v31 = vpop.permute.xlu0 %158 }
 0x104   : > { %v161_v34 = vmul.f32 %v159_v31, %v155_v32 }
 0x106   : > { %163 = vrot.lane.b32.xlu1 %v161_v34, %s496_s28 }
 0x10b   : > { %v260_v39 = vpop.permute.xlu0 %259 }
 0x10c   : > { %v262_v41 = vmul.f32 %v260_v39, %v256_v40 }
 0x10e   : > { %264 = vrot.lane.b32.xlu1 %v262_v41, %s496_s28 }
 0x113   : > { %v277_v55 = vpop.permute.xlu0 %276 }
 0x114   : > { %v279_v58 = vmul.f32 %v277_v55, %v256_v40 }
 0x116   : > { %175 = vrot.lane.b32.xlu1 %v490_v17, %s497_s29 }
 0x11e   : > { %455 = vperm.xlu1 %453, %v454_v42  }
 0x178   : > { %v164_v43 = vpop.permute.xlu1 %163 }
 0x179   : > { %v166_v45 = vadd.f32 %v164_v43, %v695_v44  ;;  %v312_v44 = vmul.f32 %v490_v17, %v310_v46 }
 0x17b   : > { %468 = vtanh.f32 %v166_v45 }
 0x180   : > { %v265_v47 = vpop.permute.xlu1 %264 }
 0x181   : > { %v469_v49 = vpop.eup %468  ;;  %v267_v50 = vadd.f32 %v265_v47, %v699_v48  ;;  %v269_v48 = vsub.f32 1.0, %v256_v40 }
 0x182   : > { %170 = vrot.lane.b32.xlu0 %v469_v49, %s500_s30 }
 0x183   : > { %470 = vtanh.f32 %v267_v50 }
 0x188   : > { %v176_v54 = vpop.permute.xlu1 %175 }
 0x189   : > { %v471_v53 = vpop.eup %470  ;;  %v178_v19 = vmul.f32 %v176_v54, %v155_v32 }
 0x18a   : > { %326 = vrot.lane.b32.xlu0 %v324_v52, %s497_s29  ;;  %271 = vrot.lane.b32.xlu2 %v471_v53, %s500_s30 }
 0x190   : > { %v456_v56 = vpop.permute.xlu1 %455 }
 0x191   : > { %v458_v60 = vunpack.i.h.bf16 %v456_v56  ;;  %v457_v17 = vunpack.i.l.bf16 %v456_v56 }
 0x192   : > { %314 = vrot.lane.b32.xlu2 %v312_v44, %s497_s29 }
 0x1e4   : > { %v272_v57 = vpop.permute.xlu2 %271 }
 0x1e5   : > { %v274_v59 = vmul.f32 %v272_v57, %v269_v48 }
 0x1e7   : > { %v280_v61 = vadd.f32 %v279_v58, %v274_v59 }
 0x1e9   : > { %v299_v62 = vmul.f32 %v458_v60, %v280_v61 }
 0x1eb   : > { %301 = vrot.lane.b32.xlu2 %v299_v62, %s500_s30 }
 0x1ec   : > { %v315_v23 = vpop.permute.xlu2 %314 }
 0x1f4   : > { %v171_v63 = vpop.permute.xlu0 %170 }
 0x1f5   : > { %v173_v20 = vmul.f32 %v171_v63, %v168_v18 }
 0x1f7   : > { %v179_v21 = vadd.f32 %v178_v19, %v173_v20 }
 0x1f9   : > { %v286_v22 = vmul.f32 %v457_v17, %v179_v21 }
 0x1fb   : > { %288 = vrot.lane.b32.xlu1 %v286_v22, %s500_s30  ;;  %v317_v24 = vadd.f32 %v315_v23, %v286_v22 }
 0x1fc   : > { %v327_v25 = vpop.permute.xlu0 %326 }
 0x1fd   : > { %331 = vrot.lane.b32.xlu0 %v317_v24, %s500_s30  ;;  %v329_v26 = vadd.f32 %v327_v25, %v299_v62 }
 0x203   : > { %335 = vrot.lane.b32.xlu1 %v329_v26, %s500_s30 }
 0x245   : > { %v302_v27 = vpop.permute.xlu2 %301 }
 0x246   : > { %305 = vst.msk [vmem:[%s304_s12] sm:$0x3] %vm292_vm12, %v302_v27 }
 0x26d   : > { %v289_v28 = vpop.permute.xlu1 %288 }
 0x26e   : > { %293 = vst.msk [vmem:[%s291_s15] sm:$0x3] %vm292_vm12, %v289_v28 }
 0x26f   : > { %v332_v29 = vpop.permute.xlu0 %331  }
 0x270   : > { %v760_v17 = vmov %v332_v29  ;;  %339 = vst.msk [vmem:[%s755_s9] sm:$0x3] (%p56_p0), %vm292_vm12, %v332_v29 }
 0x272   :  { %58 = sbr.rel (!%p56_p0) target bundleno = 8 (0x8), region = 81 }
 0x275   : > { %v336_v30 = vpop.permute.xlu1 %335  }
 0x276   : > { %v759_v18 = vmov %v336_v30  ;;  %416 = vst.msk [vmem:[%s755_s9 + $0x2] sm:$0x3] (%p56_p0), %vm292_vm12, %v336_v30 }

// kernel: encoder_forward.13
= control target key start
LH: loop header
LB: loop body
LE: loop exit
PB: predicated region body
PF: predicated region fallthrough
CT: control target
= control target key end

     0   :  { %s329_s6 = smov 0   ;;  %s360_s0 = inlined_call_operand.vmem [shape: f32[2,16,16], index: 0, kind: input, shape index: {}]   ;;  %s361_s1 = inlined_call_operand.vmem [shape: f32[2,1,1], index: 1, kind: output, shape index: {}]  }
   0x1 LB: > { %s280_s7 = sadd.s32 4294967295, %s317_s6   ;;  %p284_p0 = scmp.ge.s32.totalorder %s317_s6, 1  ;;  %s317_s6 = sphi %s329_s6, %s11_s6  }
   0x2   : > { %p87_p1 = scmp.lt.s32.totalorder %s317_s6, 3 }
   0x4   : > { %p88_p2 = pnand %p284_p0, %p87_p1 }
   0x5   : > { %p105_p3 = scmp.lt.s32.totalorder (!%p88_p2), %s280_s7, 1 }
   0x6   : > { %91 = sbr.rel (%p88_p2) target bundleno = 512 (0x200), region = 24 }
   0xb   : > { %s363_s7 = smov (!%p105_p3, %s280_s7), 1  ;;  %vm117_vm0 = vcmask 130048   ;;  %vm231_vm5 = vcmask 0  }
   0xc   : > { %s293_s8 = sshll.u32 %s363_s7, 4  ;;  %s112_s14 = scalar_lea.vmem %s361_s1, %s363_s7 }
   0xd   : > { %s109_s11 = scalar_lea.vmem %s360_s0, %s293_s8 }
   0xe   : > { %v113_v0 = vld [vmem:[%s109_s11] sm:$0xff]  ;;  %v114_v1 = vld [vmem:[%s109_s11 + $0x8] sm:$0xff] }
   0xf   : > { %v115_v2 = vmul.f32 %v113_v0, %v113_v0  ;;  %287 = vmatpush.xpose.msk.msra.mxu0 %vm117_vm0, %v114_v1  ;;  %294 = vmatpush.xpose.msk.msra.mxu1 %vm117_vm0, %v114_v1  ;;  %v116_v4 = vmul.f32 %v114_v1, %v114_v1 }
  0x11   : > { %v118_v3 = vsel %vm117_vm0, %v115_v2, 0.0  ;;  %v121_v5 = vsel %vm117_vm0, %v116_v4, 0.0 }
  0x12   : > { %119 = vadd.xlane.f32.xlu0 %v118_v3 }
  0x13   : > { %288 = vmatpush.xpose.msk.msra.mxu0 %vm117_vm0, %v113_v0  ;;  %295 = vmatpush.xpose.msk.msra.mxu1 %vm117_vm0, %v113_v0 }
  0x16   : > { %289 = vmatmul.msk.f32.vlgmr.msra.gmra.mxu0 %vm117_vm0, %v113_v0  ;;  %290 = vmatmul.msk.f32.vlgmr.msra.gmra.mxu1 %vm117_vm0, %v114_v1 }
  0x1a   : > { %122 = vadd.xlane.f32.xlu0 %v121_v5 }
  0x85   : > { %v120_v6 = vpop.xlane.xlu0 %119 }
  0x86   : > { %153 = vxpose.xlu1.b32.start [1/2] (short) (narrow) %v120_v6, 8 }
  0x8d   : > { %v123_v7 = vpop.xlane.xlu0 %122 }
  0x8e   : > { %154 = vxpose.xlu1.b32.end [2/2] (short) (narrow) %v123_v7, 8 }
  0x93   : > { %v147_v8 = vpop.f32.mrf.mxu0  ;;  %v150_v9 = vpop.f32.mrf.mxu1 }
  0x94   : > { %v188_v12 = vmul.f32 2.0, %v147_v8  ;;  %v189_v13 = vmul.f32 2.0, %v150_v9 }
 0x12a   : > { %v169_v10 = vpop.trf.xlu1 }
 0x12b   : > { %v185_v11 = vperm.slane %v169_v10, 0 }
 0x12d   : > { %v186_v14 = vadd.f32 %v185_v11, %v120_v6  ;;  %v187_v15 = vadd.f32 %v185_v11, %v123_v7 }
 0x12f   : > { %v190_v16 = vsub.f32 %v186_v14, %v188_v12  ;;  %v191_v17 = vsub.f32 %v187_v15, %v189_v13 }
 0x131   : > { %v192_v18 = vmax.f32 %v190_v16, 0.0  ;;  %v193_v19 = vmax.f32 %v191_v17, 0.0 }
 0x133   : > { %307 = vrsqrt.f32 %v192_v18  ;;  %vm201_vm1 = vcmp.eq.f32.partialorder %v192_v18, inf  ;;  %v204_v33 = vand.u32 2147483648, %v192_v18  ;;  %vm203_vm2 = vcmp.eq.f32.partialorder %v192_v18, 0.0 }
 0x134   : > { %309 = vrsqrt.f32 %v193_v19  ;;  %vm213_vm3 = vcmp.eq.f32.partialorder %v193_v19, inf  ;;  %v216_v36 = vand.u32 2147483648, %v193_v19  ;;  %vm215_vm4 = vcmp.eq.f32.partialorder %v193_v19, 0.0 }
 0x139   : > { %v308_v20 = vpop.eup %307 }
 0x13a   : > { %v310_v21 = vpop.eup %309  ;;  %v195_v22 = vmul.f32 %v308_v20, %v192_v18 }
 0x13b   : > { %v207_v23 = vmul.f32 %v310_v21, %v193_v19 }
 0x13c   : > { %v196_v24 = vmul.f32 %v308_v20, %v195_v22 }
 0x13d   : > { %v208_v25 = vmul.f32 %v310_v21, %v207_v23 }
 0x13e   : > { %v197_v26 = vmul.f32 0.5, %v196_v24 }
 0x13f   : > { %v209_v27 = vmul.f32 0.5, %v208_v25 }
 0x140   : > { %v198_v28 = vsub.f32 1.5, %v197_v26 }
 0x141   : > { %v210_v29 = vsub.f32 1.5, %v209_v27 }
 0x142   : > { %v199_v30 = vmul.f32 %v308_v20, %v198_v28 }
 0x143   : > { %v211_v31 = vmul.f32 %v310_v21, %v210_v29 }
 0x144   : > { %v200_v32 = vmul.f32 %v199_v30, %v192_v18 }
 0x145   : > { %v212_v34 = vmul.f32 %v211_v31, %v193_v19 }
 0x146   : > { %v202_v35 = vsel %vm201_vm1, %v192_v18, %v200_v32 }
 0x147   : > { %v205_v37 = vsel %vm203_vm2, %v204_v33, %v202_v35  ;;  %v214_v38 = vsel %vm213_vm3, %v193_v19, %v212_v34 }
 0x148   : > { %v217_v39 = vsel %vm215_vm4, %v216_v36, %v214_v38  ;;  %v218_v40 = vsel %vm117_vm0, %v205_v37, 0.0 }
 0x149   : > { %v219_v41 = vsel %vm117_vm0, %v217_v39, 0.0 }
 0x14a   : > { %v220_v42 = vadd.f32 %v219_v41, %v218_v40 }
 0x14c   : > { %221 = vadd.xlane.f32.xlu2 %v220_v42 }
 0x1bf   : > { %v222_v43 = vpop.xlane.xlu2 %221 }
 0x1c0   : > { %v223_v44 = vrot.slane %v222_v43, 4 }
 0x1c2   : > { %v224_v45 = vadd.f32 %v223_v44, %v222_v43 }
 0x1c4   : > { %v225_v46 = vrot.slane %v224_v45, 2 }
 0x1c6   : > { %v226_v47 = vadd.f32 %v225_v46, %v224_v45 }
 0x1c8   : > { %v227_v48 = vrot.slane %v226_v47, 1 }
 0x1ca   : > { %v228_v49 = vadd.f32 %v227_v48, %v226_v47 }
 0x1cc   : > { %296 = vpush %v228_v49 }
 0x1fd   : > { %s297_s15 = spop %296 }
 0x1fe   : > { %v230_v50 = vstv %s297_s15 }
 0x1ff   : > { %232 = vst.msk [vmem:[%s112_s14] sm:$0x1] %vm231_vm5, %v230_v50 }
 0x200 PF: > { %s11_s6 = sadd.s32 1, %s317_s6  }
 0x201   : > { %p8_p4 = scmp.ge.s32.totalorder %s11_s6, 4  }
 0x203   :  { %10 = sbr.rel (!%p8_p4) target bundleno = 1 (0x1), region = 54 }

// kernel: encoder_forward.14
= control target key start
LH: loop header
LB: loop body
LE: loop exit
PB: predicated region body
PF: predicated region fallthrough
CT: control target
= control target key end

     0   :  { %s644_s0 = inlined_call_operand.<no memory space> [shape: f32[1,1], index: 0, kind: input, shape index: {}]   ;;  %s645_s1 = inlined_call_operand.vmem [shape: f32[2,16,16], index: 1, kind: input, shape index: {}]   ;;  %s646_s2 = inlined_call_operand.hbm [shape: f32[2,16,16], index: 2, kind: output, shape index: {}]  }
   0x1   :  { %v7_v0 = vstv %s644_s0 }
   0x2   :  { %8 = vst [vmem:[#allocation2] sm:$0x1] %v7_v0 }
   0x3   :  { %9 = vsyncpa [#allocation4], 0 }
   0x4   :  { %11 = vsyncpa [#allocation4 + $0x1], 0  ;;  %s545_s11 = smov 0   ;;  %s547_s12 = smov 0  }
   0x5   :  { %s549_s13 = smov 0   ;;  %s551_s14 = smov 0  }
   0x6 LB: > { %s566_s0 = sadd.s32 4294967295, %s522_s14   ;;  %s380_s15 = sadd.s32 4294967294, %s522_s14   ;;  %s522_s14 = sphi %s551_s14, %s652_s14   ;;  %s518_s13 = sphi %s549_s13, %s651_s13   ;;  %s514_s12 = sphi %s547_s12, %s650_s12   ;;  %s510_s11 = sphi %s545_s11, %s649_s11  }
   0x7   : > { %s570_s16 = sadd.s32 1, %s522_s14   ;;  %s71_s17 = sadd.s32 1, %s518_s13 }
   0x8   : > { %s68_s18 = ssub.s32 %s522_s14, %s570_s16  ;;  %p81_p0 = scmp.ne.s32.totalorder %s518_s13, %s514_s12 }
   0x9   : > { %p69_p1 = scmp.eq.s32.totalorder %s68_s18, 0  ;;  %p82_p2 = scmp.eq.s32.totalorder %s566_s0, 1 }
   0xa   : > { %p87_p3 = scmp.ne.s32.totalorder %s514_s12, %s510_s11  ;;  %p88_p4 = scmp.eq.s32.totalorder %s380_s15, 1 }
   0xb   : > { %s581_s19 = scalar_select %p69_p1, %s518_s13, %s71_s17  }
   0xc   : > { %p583_p5 = por %p82_p2, %p81_p0  ;;  %p587_p6 = por %p88_p4, %p87_p3 }
   0xd   : > { %p383_p7 = scmp.ge.s32.totalorder %s522_s14, 1  ;;  %p117_p8 = scmp.lt.s32.totalorder %s522_s14, 3 }
   0xf   : > { %p118_p9 = pnand %p383_p7, %p117_p8 }
  0x10   : > { %p139_p10 = scmp.lt.s32.totalorder (!%p118_p9), %s566_s0, 1  ;;  %s136_s27 = sand.u32 (!%p118_p9), 1, %s514_s12  }
  0x11   : > { %121 = sbr.rel (%p118_p9) target bundleno = 377 (0x179), region = 28  ;;  %s384_s28 = sshll.u32 (!%p118_p9), %s136_s27, 4 }
  0x12   : > { %s399_s29 = sshll.u32 (!%p118_p9), %s566_s0, 4  ;;  %s138_s5 = scalar_lea.vmem (!%p118_p9), [#allocation3], %s384_s28 }
  0x13   : > { %s314_s4 = scalar_lea.hbm (!%p118_p9), %s646_s2, %s399_s29  ;;  %s315_s6 = sshll.u32 (!%p118_p9), %s138_s5, 4  ;;  %s316_s6 = int_to_ptr.vmem [resolvable:$true] %s315_s6 }
  0x14   : > { %s317_s7 = sshll.u32 (!%p118_p9), %s314_s4, 4  ;;  %s303_s8 = scalar_lea.sflag (!%p118_p9), [#allocation4], %s136_s27  ;;  %s318_s7 = int_to_ptr.hbm [resolvable:$true] %s317_s7 }
  0x15   : > { %s474_s9 = sshra.s32 (!%p118_p9), %s318_s7, 4  ;;  %s480_s17 = scalar_lea.hbm (!%p118_p9), %s646_s2, 32  ;;  %s475_s9 = int_to_ptr.hbm [resolvable:$true] %s474_s9 }
  0x16   : > { %s140_s22 = scalar_select %p139_p10, %s566_s0, 1  ;;  %vm149_vm0 = vcmask 130048   ;;  %v447_v7 = vld [vmem:[#allocation2] ss:$0 sm:$0xff]  ;;  %v524_v8 = vmov 0  }
  0x17   : > { %445 = vset.pattern.permute.xlu2 %v524_v8  ;;  %446 = vset.pattern.permute.xlu0 %v524_v8  ;;  %s476_s10 = scalar_lea.hbm %s475_s9, 16  ;;  %p481_p0 = scmp.lt.s32.totalorder %s475_s9, %s646_s2 }
  0x18   : > { %s398_s23 = sshll.u32 %s140_s22, 4  ;;  %253 = vperm.xlu2 %445, %v447_v7   ;;  %p477_p11 = scmp.ne.s32.totalorder %s475_s9, %s476_s10 }
  0x19   : > { %s143_s26 = scalar_lea.vmem %s645_s1, %s398_s23  ;;  %p482_p1 = scmp.lt.s32.totalorder %s480_s17, %s476_s10 }
  0x1a   : > { %v145_v1 = vld [vmem:[%s143_s26] sm:$0xff]  ;;  %v146_v2 = vld [vmem:[%s143_s26 + $0x8] sm:$0xff]  ;;  %p478_p12 = pnand %p477_p11, %p583_p5 }
  0x1b   : > { %v147_v3 = vmul.f32 %v145_v1, %v145_v1  ;;  %387 = vmatpush.xpose.msk.msra.mxu0 %vm149_vm0, %v146_v2  ;;  %400 = vmatpush.xpose.msk.msra.mxu1 %vm149_vm0, %v146_v2  ;;  %v148_v5 = vmul.f32 %v146_v2, %v146_v2  ;;  %p483_p2 = por %p482_p1, %p481_p0 }
  0x1c   : > { %p479_p13 = pneg %p478_p12 }
  0x1d   : > { %v150_v4 = vsel %vm149_vm0, %v147_v3, 0.0  ;;  %v153_v6 = vsel %vm149_vm0, %v148_v5, 0.0 }
  0x1e   : > { %151 = vadd.xlane.f32.xlu0 %v150_v4  ;;  %p484_p3 = pnand %p483_p2, %p479_p13 }
  0x1f   : > { %388 = vmatpush.xpose.msk.msra.mxu0 %vm149_vm0, %v145_v1  ;;  %401 = vmatpush.xpose.msk.msra.mxu1 %vm149_vm0, %v145_v1 }
  0x22   : > { %389 = vmatmul.msk.f32.vlgmr.msra.gmra.mxu0 %vm149_vm0, %v145_v1  ;;  %390 = vmatmul.msk.f32.vlgmr.msra.gmra.mxu1 %vm149_vm0, %v146_v2 }
  0x26   : > { %154 = vadd.xlane.f32.xlu0 %v153_v6 }
  0x72   : > { %v254_v36 = vpop.permute.xlu2 %253 }
  0x91   : > { %v152_v9 = vpop.xlane.xlu0 %151 }
  0x92   : > { %185 = vxpose.xlu1.b32.start [1/2] (short) (narrow) %v152_v9, 8 }
  0x99   : > { %v155_v10 = vpop.xlane.xlu0 %154 }
  0x9a   : > { %186 = vxpose.xlu1.b32.end [2/2] (short) (narrow) %v155_v10, 8 }
  0x9f   : > { %v179_v11 = vpop.f32.mrf.mxu0  ;;  %v182_v12 = vpop.f32.mrf.mxu1 }
  0xa0   : > { %v220_v15 = vmul.f32 2.0, %v179_v11  ;;  %v221_v16 = vmul.f32 2.0, %v182_v12 }
 0x136   : > { %v201_v13 = vpop.trf.xlu1 }
 0x137   : > { %v217_v14 = vperm.slane %v201_v13, 0 }
 0x139   : > { %v218_v17 = vadd.f32 %v217_v14, %v152_v9  ;;  %v219_v18 = vadd.f32 %v217_v14, %v155_v10 }
 0x13b   : > { %v222_v19 = vsub.f32 %v218_v17, %v220_v15  ;;  %v223_v20 = vsub.f32 %v219_v18, %v221_v16 }
 0x13d   : > { %v224_v21 = vmax.f32 %v222_v19, 0.0  ;;  %v225_v22 = vmax.f32 %v223_v20, 0.0 }
 0x13f   : > { %448 = vrsqrt.f32 %v224_v21  ;;  %vm233_vm1 = vcmp.eq.f32.partialorder %v224_v21, inf  ;;  %v236_v37 = vand.u32 2147483648, %v224_v21  ;;  %vm235_vm2 = vcmp.eq.f32.partialorder %v224_v21, 0.0 }
 0x140   : > { %450 = vrsqrt.f32 %v225_v22  ;;  %vm245_vm3 = vcmp.eq.f32.partialorder %v225_v22, inf  ;;  %v248_v40 = vand.u32 2147483648, %v225_v22  ;;  %vm247_vm4 = vcmp.eq.f32.partialorder %v225_v22, 0.0 }
 0x145   : > { %v449_v23 = vpop.eup %448 }
 0x146   : > { %v451_v24 = vpop.eup %450  ;;  %v227_v25 = vmul.f32 %v449_v23, %v224_v21 }
 0x147   : > { %v239_v26 = vmul.f32 %v451_v24, %v225_v22 }
 0x148   : > { %v228_v27 = vmul.f32 %v449_v23, %v227_v25 }
 0x149   : > { %v240_v28 = vmul.f32 %v451_v24, %v239_v26 }
 0x14a   : > { %v229_v29 = vmul.f32 0.5, %v228_v27 }
 0x14b   : > { %v241_v30 = vmul.f32 0.5, %v240_v28 }
 0x14c   : > { %v230_v31 = vsub.f32 1.5, %v229_v29 }
 0x14d   : > { %v242_v32 = vsub.f32 1.5, %v241_v30 }
 0x14e   : > { %v231_v33 = vmul.f32 %v449_v23, %v230_v31 }
 0x14f   : > { %v243_v34 = vmul.f32 %v451_v24, %v242_v32 }
 0x150   : > { %v232_v35 = vmul.f32 %v231_v33, %v224_v21 }
 0x151   : > { %v244_v38 = vmul.f32 %v243_v34, %v225_v22 }
 0x152   : > { %v234_v39 = vsel %vm233_vm1, %v224_v21, %v232_v35 }
 0x153   : > { %v237_v41 = vsel %vm235_vm2, %v236_v37, %v234_v39  ;;  %v246_v42 = vsel %vm245_vm3, %v225_v22, %v244_v38 }
 0x154   : > { %v249_v43 = vsel %vm247_vm4, %v248_v40, %v246_v42  ;;  %v256_v44 = vsub.f32 %v254_v36, %v237_v41 }
 0x155   : > { %v257_v45 = vsub.f32 %v254_v36, %v249_v43 }
 0x156   : > { %v391_v46 = vmul.f32 -1.442695, %v256_v44 }
 0x157   : > { %v392_v47 = vmul.f32 -1.442695, %v257_v45 }
 0x158   : > { %452 = vpow2.f32 %v391_v46 }
 0x159   : > { %454 = vpow2.f32 %v392_v47 }
 0x15e   : > { %v453_v48 = vpop.eup %452 }
 0x15f   : > { %v455_v49 = vpop.eup %454  ;;  %v264_v50 = vadd.f32 1.0, %v453_v48 }
 0x160   : > { %v265_v51 = vadd.f32 1.0, %v455_v49 }
 0x161   : > { %456 = vrcp.f32 %v264_v50  ;;  %v277_v57 = vand.u32 2147483648, %v264_v50  ;;  %v275_v60 = vand.u32 2147483647, %v264_v50  ;;  %vm271_vm7 = vweird.f32 %v264_v50 }
 0x162   : > { %458 = vrcp.f32 %v265_v51  ;;  %v292_v61 = vand.u32 2147483648, %v265_v51  ;;  %v290_v63 = vand.u32 2147483647, %v265_v51  ;;  %vm286_vm9 = vweird.f32 %v265_v51 }
 0x163   : > { %v278_v1 = vor.u32 1.1754944e-38, %v277_v57  ;;  %vm276_vm10 = vcmp.eq.f32.partialorder %v275_v60, 8.507059e+37 }
 0x164   : > { %v293_v3 = vor.u32 1.1754944e-38, %v292_v61  ;;  %vm291_vm12 = vcmp.eq.f32.partialorder %v290_v63, 8.507059e+37 }
 0x167   : > { %v457_v52 = vpop.eup %456 }
 0x168   : > { %v459_v53 = vpop.eup %458  ;;  %v267_v54 = vmul.f32 %v457_v52, %v264_v50  ;;  %vm272_vm5 = vweird.f32 %v457_v52 }
 0x169   : > { %v282_v55 = vmul.f32 %v459_v53, %v265_v51  ;;  %vm287_vm6 = vweird.f32 %v459_v53  ;;  %vm273_vm8 = vmor %vm271_vm7, %vm272_vm5 }
 0x16a   : > { %v268_v56 = vsub.f32 1.0, %v267_v54  ;;  %vm288_vm11 = vmor %vm286_vm9, %vm287_vm6 }
 0x16b   : > { %v283_v58 = vsub.f32 1.0, %v282_v55 }
 0x16c   : > { %v269_v59 = vmul.f32 %v457_v52, %v268_v56 }
 0x16d   : > { %v284_v62 = vmul.f32 %v459_v53, %v283_v58 }
 0x16e   : > { %v270_v0 = vadd.f32 %v457_v52, %v269_v59 }
 0x16f   : > { %v285_v2 = vadd.f32 %v459_v53, %v284_v62 }
 0x170   : > { %v274_v4 = vsel %vm273_vm8, %v457_v52, %v270_v0 }
 0x171   : > { %v279_v5 = vsel %vm276_vm10, %v278_v1, %v274_v4  ;;  %v289_v6 = vsel %vm288_vm11, %v459_v53, %v285_v2 }
 0x172   : > { %v294_v7 = vsel %vm291_vm12, %v293_v3, %v289_v6  ;;  %vm296_vm13 = vcmp.lt.f32.partialorder %v279_v5, 0.5 }
 0x173   : > { %vm297_vm14 = vcmp.lt.f32.partialorder %v294_v7, 0.5  ;;  %v298_v8 = vsel %vm296_vm13, 0.0, %v279_v5 }
 0x174   : > { %v299_v9 = vsel %vm297_vm14, 0.0, %v294_v7  ;;  %300 = vst.msk [vmem:[%s138_s5] sm:$0xff] %vm149_vm0, %v298_v8 }
 0x175   : > { %301 = vst.msk [vmem:[%s138_s5 + $0x8] sm:$0xff] %vm149_vm0, %v299_v9 }
 0x176   : > { %487 = shalt.err (!%p484_p3)
}
 0x177   : > { %s525_s23 = smov 128   ;;  %s526_s24 = smov 8  }
 0x178   : > { %402 = dma.vmem_to_hbm [thread:$0]  (%p583_p5), %s316_s6, 256, %s318_s7, %s303_s8, %s525_s23, %s525_s23, %s526_s24  }
 0x179 PF: > { %p408_p4 = scmp.ge.s32.totalorder %s522_s14, 2  ;;  %s332_s25 = sand.u32 1, %s510_s11  }
 0x17a   : > { %s333_s26 = scalar_lea.sflag [#allocation4], %s332_s25 }
 0x17b   : > { %p405_p7 = pnand %p408_p4, %p587_p6 }
 0x17d   : > { %p406_p8 = pneg %p405_p7 }
 0x17f   : > { %505 = dma.done.wait (%p406_p8), %s333_s26, 256  }
 0x180   : > { %507 = vsyncadd (%p406_p8), %s333_s26, 4294967040  ;;  %p14_p9 = scmp.ge.s32.totalorder %s570_s16, 4   ;;  %s649_s11 = smov %s514_s12 }
 0x181   : > { %s650_s12 = smov %s518_s13  ;;  %s651_s13 = smov %s581_s19 }
 0x182   : > { %s652_s14 = smov %s570_s16  ;;  %16 = sbr.rel (!%p14_p9) target bundleno = 6 (0x6), region = 63 }
 0x187   :  { %339 = vsyncpa [#allocation4], 1 }
 0x188   :  { %341 = vsyncpa [#allocation4 + $0x1], 1 }

// kernel: encoder_forward.12
= control target key start
LH: loop header
LB: loop body
LE: loop exit
PB: predicated region body
PF: predicated region fallthrough
CT: control target
= control target key end

     0   :  { %vm33_vm0 = vcmask 130048   ;;  %vm59_vm1 = vcmask 64512   ;;  %s127_s1 = inlined_call_operand.vmem [shape: bf16[16,8], index: 1, kind: input, shape index: {}]   ;;  %s128_s0 = inlined_call_operand.vmem [shape: f32[32,16], index: 0, kind: input, shape index: {}]   ;;  %s129_s2 = inlined_call_operand.vmem [shape: f32[1,8], index: 2, kind: input, shape index: {}]   ;;  %s130_s3 = inlined_call_operand.vmem [shape: f32[32,8], index: 3, kind: output, shape index: {}]  }
   0x1   :  { %v74_v0 = vld [vmem:[%s127_s1] sm:$0xff]  ;;  %v16_v2 = vld [vmem:[%s128_s0 + $0x8] sm:$0xff]  ;;  %v17_v4 = vld [vmem:[%s128_s0 + $0x10] sm:$0xff] }
   0x2   :  { %v15_v1 = vld [vmem:[%s128_s0] sm:$0xff]  ;;  %v18_v5 = vld [vmem:[%s128_s0 + $0x18] sm:$0xff]  ;;  %47 = vmatpush.bf16.msra.mxu0 %v74_v0  ;;  %75 = vmatpush.bf16.msra.mxu1 %v74_v0 }
   0x3   :  { %v19_v3 = vpack.c.bf16 %v16_v2, %v15_v1  ;;  %v20_v6 = vpack.c.bf16 %v18_v5, %v17_v4  ;;  %v76_v7 = vld [vmem:[%s129_s2] ss:$0 sm:$0xff] }
   0x5   :  { %72 = vmatmul.msk.bf16.vlgmr.msra.gmra.mxu0 %vm33_vm0, %v19_v3  ;;  %73 = vmatmul.msk.bf16.vlgmr.msra.gmra.mxu1 %vm33_vm0, %v20_v6 }
  0x82   :  { %v49_v8 = vpop.f32.mrf.mxu0  ;;  %v54_v9 = vpop.f32.mrf.mxu1 }
  0x83   :  { %v50_v10 = vadd.f32 %v76_v7, %v49_v8  ;;  %v55_v11 = vadd.f32 %v76_v7, %v54_v9 }
  0x85   :  { %60 = vst.msk [vmem:[%s130_s3] sm:$0xff] %vm59_vm1, %v50_v10 }
  0x86   :  { %62 = vst.msk [vmem:[%s130_s3 + $0x10] sm:$0xff] %vm59_vm1, %v55_v11 }
  0x8a   :  { %v51_v12 = vpop.f32.mrf.mxu0  ;;  %v56_v13 = vpop.f32.mrf.mxu1 }
  0x8b   :  { %v52_v14 = vadd.f32 %v76_v7, %v51_v12  ;;  %v57_v15 = vadd.f32 %v76_v7, %v56_v13 }
  0x8d   :  { %61 = vst.msk [vmem:[%s130_s3 + $0x8] sm:$0xff] %vm59_vm1, %v52_v14 }
  0x8e   :  { %63 = vst.msk [vmem:[%s130_s3 + $0x18] sm:$0xff] %vm59_vm1, %v57_v15 }

// kernel: encoder_forward.15
= control target key start
LH: loop header
LB: loop body
LE: loop exit
PB: predicated region body
PF: predicated region fallthrough
CT: control target
= control target key end

     0   :  { %s553_s18 = smov 0   ;;  %s600_s0 = inlined_call_operand.vmem [shape: f32[2,2,32], index: 0, kind: input, shape index: {}, may-alias: {0,1}]   ;;  %s601_s1 = inlined_call_operand.vmem [shape: f32[2,2,32], index: 1, kind: input, shape index: {}, may-alias: {0,1}]   ;;  %s602_s2 = inlined_call_operand.vmem [shape: f32[2,1,2], index: 2, kind: input, shape index: {}]   ;;  %s603_s3 = inlined_call_operand.vmem [shape: bf16[2,32,32], index: 3, kind: input, shape index: {}]   ;;  %s604_s4 = inlined_call_operand.vmem [shape: f32[1,32], index: 4, kind: input, shape index: {}]   ;;  %s605_s5 = inlined_call_operand.vmem [shape: f32[2,2,32], index: 5, kind: output, shape index: {}]  }
   0x1 LB: > { %s460_s19 = sadd.s32 4294967295, %s520_s18   ;;  %p464_p0 = scmp.ge.s32.totalorder %s520_s18, 1  ;;  %s520_s18 = sphi %s553_s18, %s15_s18  }
   0x2   : > { %p203_p1 = scmp.lt.s32.totalorder %s520_s18, 3 }
   0x4   : > { %p204_p2 = pnand %p464_p0, %p203_p1 }
   0x5   : > { %p236_p3 = scmp.lt.s32.totalorder (!%p204_p2), %s460_s19, 1 }
   0x6   : > { %207 = sbr.rel (%p204_p2) target bundleno = 680 (0x2a8), region = 40 }
   0xb   : > { %s607_s19 = smov (!%p236_p3, %s460_s19), 1  ;;  %vm257_vm0 = vcmask 261120   ;;  %v522_v6 = vmov 0   ;;  %vm282_vm3 = vcmask 9216   ;;  %vm299_vm4 = vcmask 1040384   ;;  %v497_v19 = vld [vmem:[%s603_s3 + $0x18] sm:$0xff] }
   0xc   : > { %s561_s20 = sshll.u32 %s607_s19, 1  ;;  %s246_s29 = scalar_lea.vmem %s602_s2, %s607_s19  ;;  %v495_v20 = vld [vmem:[%s603_s3 + $0x8] sm:$0xff]  ;;  %343 = vmatpush.bf16.msra.mxu2 %v497_v19  ;;  %v496_v21 = vld [vmem:[%s603_s3 + $0x10] sm:$0xff]  ;;  %vm295_vm5 = vcmask 15360   ;;  %v494_v26 = vld [vmem:[%s603_s3] sm:$0xff]  ;;  %vm384_vm6 = vcmask 254976  }
   0xd   : > { %s243_s23 = scalar_lea.vmem %s601_s1, %s561_s20  ;;  %s239_s26 = scalar_lea.vmem %s600_s0, %s561_s20  ;;  %v254_v5 = vld [vmem:[%s246_s29] sm:$0x1]  ;;  %371 = vmatpush.bf16.msra.mxu3 %v495_v20 }
   0xe   : > { %v253_v0 = vld [vmem:[%s243_s23] sm:$0x3]  ;;  %vm277_vm1 = vcmp.gt.f32.partialorder %v254_v5, 0.5  ;;  %s250_s17 = scalar_lea.vmem %s605_s5, %s561_s20 }
   0xf   : > { %v256_v1 = vpack.c.bf16 %v253_v0, %v253_v0  ;;  %v252_v3 = vld [vmem:[%s239_s26] sm:$0x3]  ;;  %v278_v7 = vsel %vm277_vm1, 1, %v522_v6 }
  0x10   : > { %v255_v4 = vpack.c.bf16 %v252_v3, %v252_v3  ;;  %v279_v8 = vperm.slane %v278_v7, 0  ;;  %344 = vmatpush.bf16.msra.mxu2 %v496_v21  ;;  %v507_v32 = vld [vmem:[%s604_s4] ss:$0 sm:$0xff] }
  0x11   : > { %v262_v2 = vsel %vm257_vm0, %v256_v1, 0  ;;  %v300_v18 = vsel %vm299_vm4, %v256_v1, 0  ;;  %372 = vmatpush.bf16.msra.mxu3 %v494_v26 }
  0x12   : > { %271 = vmatpush.bf16.xpose.msra.mxu0 %v262_v2  ;;  %vm280_vm2 = vcmp.eq.s32.totalorder %v279_v8, 1  ;;  %309 = vmatpush.bf16.msra.mxu1 %v300_v18 }
  0x13   : > { %482 = vmatmul.msk.bf16.vlgmr.msra.gmra.mxu2 %vm257_vm0, %v255_v4 }
  0x19   : > { %468 = vmatmul.msk.bf16.vlgmr.msra.gmra.mxu0 %vm257_vm0, %v255_v4 }
  0x96   : > { %v273_v9 = vpop.f32.mrf.mxu0  ;;  %v346_v27 = vpop.f32.mrf.mxu2 }
  0x97   : > { %v281_v10 = vsel %vm280_vm2, -1e+30, %v273_v9 }
  0x98   : > { %v283_v11 = vsel %vm282_vm3, %v281_v10, -inf }
  0x99   : > { %284 = vmax.xlane.f32.xlu0 %v283_v11 }
  0x9e   : > { %v275_v12 = vpop.f32.mrf.mxu0  ;;  %v348_v28 = vpop.f32.mrf.mxu2 }
 0x10c   : > { %v285_v13 = vpop.xlane.xlu0 %284 }
 0x10d   : > { %v286_v14 = vsub.f32 %v281_v10, %v285_v13 }
 0x10f   : > { %v287_v15 = vmul.f32 1.442695, %v286_v14 }
 0x111   : > { %508 = vpow2.f32 %v287_v15 }
 0x117   : > { %v509_v16 = vpop.eup %508 }
 0x118   : > { %v289_v17 = vsel %vm282_vm3, %v509_v16, 0.0 }
 0x119   : > { %290 = vadd.xlane.f32.xlu0 %v289_v17 }
 0x18c   : > { %v291_v22 = vpop.xlane.xlu0 %290 }
 0x18d   : > { %510 = vrcp.f32 %v291_v22 }
 0x193   : > { %v511_v23 = vpop.eup %510 }
 0x194   : > { %v293_v24 = vmul.f32 %v511_v23, %v509_v16 }
 0x196   : > { %v294_v25 = vpack.c.bf16 %v293_v24, %v293_v24 }
 0x198   : > { %469 = vmatmul.msk.bf16.vlgmr.msra.gmra.mxu1 %vm295_vm5, %v294_v25 }
 0x215   : > { %v311_v29 = vpop.f32.mrf.mxu1 }
 0x216   : > { %v315_v30 = vpack.c.bf16 %v311_v29, %v311_v29 }
 0x218   : > { %491 = vmatmul.msk.bf16.vlgmr.msra.gmra.mxu3 %vm257_vm0, %v315_v30 }
 0x21d   : > { %v313_v31 = vpop.f32.mrf.mxu1 }
 0x29b   : > { %v374_v33 = vpop.f32.mrf.mxu3 }
 0x29c   : > { %v375_v34 = vadd.f32 %v374_v33, %v346_v27 }
 0x29e   : > { %v382_v35 = vadd.f32 %v507_v32, %v375_v34 }
 0x2a0   : > { %512 = vtanh.f32 %v382_v35 }
 0x2a3   : > { %v376_v36 = vpop.f32.mrf.mxu3 }
 0x2a6   : > { %v513_v37 = vpop.eup %512 }
 0x2a7   : > { %385 = vst.msk [vmem:[%s250_s17] sm:$0x3] %vm384_vm6, %v513_v37 }
 0x2a8 PF: > { %s15_s18 = sadd.s32 1, %s520_s18  }
 0x2a9   : > { %p12_p4 = scmp.ge.s32.totalorder %s15_s18, 4  }
 0x2ab   :  { %14 = sbr.rel (!%p12_p4) target bundleno = 1 (0x1), region = 77 }

</bundles_post_ra>
